<compile_context>
chip_gen: v7x
topology: tpu7x:2x2x1
jax: 0.10.0
libtpu: 0.0.40
codegen_flags: <defaults>
</compile_context>

<pallas_src>
import functools

import jax
import jax.numpy as jnp
from jax import lax
from jax.experimental import pallas as pl
from jax.experimental.pallas import tpu as pltpu


# ------------------------------ fused kernel -------------------------------- #

def _make_fused_kernel(num_layers, T1, BP, E, H, V):
    """Fused encoder + embedding + multi-layer LSTM kernel.

    Inputs (all VMEM, batch padded to BP rows, time-major row = t*BP + b):
      img_ref   : [BP, C*HW]  f32   flattened image
      wfc_ref   : [C*HW, E]   f32   fc weight / HW repeated over spatial (pool folded in)
      bfc_ref   : [1, E]      f32
      cap_ref   : [T*BP, 1]   i32   captions
      embed_ref : [V, E]      f32
      per layer l: wih [Din,4H], whh [4,H,H] (per-gate), b [1,4H]  (i,f,g,o order)
    Output:
      out_ref   : [T1*BP, H]  f32   LSTM outputs of the last layer
    Scratch:
      seq, gx_i, gx_f, gx_g, gx_o, act  (all [T1*BP, ·]),  h, c  ([BP, H])
    """
    T = T1 - 1

    def kernel(img_ref, wfc_ref, bfc_ref, cap_ref, embed_ref, *rest):
        lstm = rest[:3 * num_layers]
        out_ref = rest[3 * num_layers]
        (seq_scr, gx0, gx1, gx2, gx3, act_scr, h_scr, c_scr) = rest[3 * num_layers + 1:]
        gx = (gx0, gx1, gx2, gx3)
        f32 = jnp.float32

        # ---------------- EncoderCNN (backbone stand-in) --------------------
        # Global-average pool folded into the fc weight -> one MXU matmul.
        feat = jnp.dot(img_ref[...], wfc_ref[...],
                       preferred_element_type=f32) + bfc_ref[...]
        feat = jnp.maximum(feat, 0.0)                 # ReLU; Dropout = identity (eval)
        seq_scr[0:BP, :] = feat                       # decoder input, time step 0

        # ---------------- Embedding lookup ----------------------------------
        # One-hot @ table on the MXU keeps the gather fused in-kernel (V small).
        # TODO(synk): for production vocab sizes use a scalar-prefetch / DMA row
        #             gather instead of a one-hot matmul.
        caps = cap_ref[...]                                          # [T*BP, 1]
        onehot = (caps == lax.broadcasted_iota(jnp.int32, (T * BP, V), 1)
                  ).astype(f32)                                      # [T*BP, V]
        emb = jnp.dot(onehot, embed_ref[...], preferred_element_type=f32)
        seq_scr[BP:T1 * BP, :] = emb                  # Dropout = identity (eval)

        # --------- Multi-layer LSTM, fused; activations stay in VMEM --------
        for l in range(num_layers):
            wih_ref, whh_ref, b_ref = lstm[3 * l], lstm[3 * l + 1], lstm[3 * l + 2]

            # Hoisted input projection: one big matmul over all T1*BP rows,
            # bias folded in; per-gate split done once per layer (not per step).
            x_all = seq_scr[...] if l == 0 else act_scr[...]         # [T1*BP, Din]
            gall = jnp.dot(x_all, wih_ref[...],
                           preferred_element_type=f32) + b_ref[...]  # [T1*BP, 4H]
            for k in range(4):
                gx[k][...] = gall[:, k * H:(k + 1) * H]

            # Loop-invariant per-gate hidden weights, loaded once.
            w_i, w_f, w_g, w_o = whh_ref[0], whh_ref[1], whh_ref[2], whh_ref[3]

            h_scr[...] = jnp.zeros_like(h_scr)
            c_scr[...] = jnp.zeros_like(c_scr)

            # Recurrence: only h @ W_hh left inside the time loop.  T is static
            # and small, so it is fully unrolled with static, sublane-aligned
            # (BP = 8) slices -> no masked lane work per step.
            for t in range(T1):
                r0, r1 = t * BP, (t + 1) * BP
                h_prev = h_scr[...]
                gi = gx0[r0:r1, :] + jnp.dot(h_prev, w_i, preferred_element_type=f32)
                gf = gx1[r0:r1, :] + jnp.dot(h_prev, w_f, preferred_element_type=f32)
                gg = gx2[r0:r1, :] + jnp.dot(h_prev, w_g, preferred_element_type=f32)
                go = gx3[r0:r1, :] + jnp.dot(h_prev, w_o, preferred_element_type=f32)
                i_g = jax.nn.sigmoid(gi)
                f_g = jax.nn.sigmoid(gf)
                g_g = jnp.tanh(gg)
                o_g = jax.nn.sigmoid(go)
                c_new = f_g * c_scr[...] + i_g * g_g
                h_new = o_g * jnp.tanh(c_new)
                c_scr[...] = c_new
                h_scr[...] = h_new
                act_scr[r0:r1, :] = h_new             # feeds the next layer's projection

        # Single slab store of the whole sequence instead of per-step stores.
        out_ref[...] = act_scr[...]

    return kernel


# ------------------------------- JAX wrapper --------------------------------- #

def cnn_to_rnn_forward(params, images, captions):
    """images: [B, C, H, W] float32; captions: [T, B] int32 -> [T+1, B, hidden]."""
    B, C, Hi, Wi = images.shape
    HW = Hi * Wi
    E = params["fc_w"].shape[1]
    Hh = params["w_hh_0"].shape[0]
    V = params["embed"].shape[0]
    T = captions.shape[0]
    L = params["num_layers"]
    T1 = T + 1
    BP = 8 * pl.cdiv(B, 8)            # pad batch to a sublane multiple
    f32 = jnp.float32

    # Encoder: fold the global-average pool into the fc weight -> single matmul.
    wfc_big = jnp.repeat(params["fc_w"].astype(f32) / HW, HW, axis=0)    # [C*HW, E]
    img_pad = jnp.zeros((BP, C * HW), f32).at[:B].set(images.reshape(B, C * HW))

    cap_pad = jnp.zeros((T, BP), jnp.int32).at[:, :B].set(captions)
    cap_flat = cap_pad.reshape(T * BP, 1)                                # row = t*BP + b

    inputs = [img_pad, wfc_big, params["fc_b"].reshape(1, E).astype(f32),
              cap_flat, params["embed"].astype(f32)]
    for l in range(L):
        w_ih = params[f"w_ih_{l}"].astype(f32)                  # [Din, 4H]
        w_hh = params[f"w_hh_{l}"].astype(f32)                  # [H, 4H]
        b = params[f"b_{l}"].astype(f32)                        # [4H]
        whh4 = w_hh.reshape(Hh, 4, Hh).transpose(1, 0, 2)       # [4, H, H] (i,f,g,o)
        inputs += [w_ih, whh4, b.reshape(1, 4 * Hh)]

    kernel = _make_fused_kernel(L, T1, BP, E, Hh, V)
    vmem_spec = pl.BlockSpec(memory_space=pltpu.MemorySpace.VMEM)

    out_flat = pl.pallas_call(
        kernel,
        out_shape=jax.ShapeDtypeStruct((T1 * BP, Hh), f32),
        in_specs=[vmem_spec] * len(inputs),
        out_specs=vmem_spec,
        scratch_shapes=[
            pltpu.VMEM((T1 * BP, E), f32),        # seq (features + embeddings)
            pltpu.VMEM((T1 * BP, Hh), f32),       # gate-x i
            pltpu.VMEM((T1 * BP, Hh), f32),       # gate-x f
            pltpu.VMEM((T1 * BP, Hh), f32),       # gate-x g
            pltpu.VMEM((T1 * BP, Hh), f32),       # gate-x o
            pltpu.VMEM((T1 * BP, Hh), f32),       # act (current layer output)
            pltpu.VMEM((BP, Hh), f32),            # h
            pltpu.VMEM((BP, Hh), f32),            # c
        ],
        compiler_params=pltpu.CompilerParams(vmem_limit_bytes=32 * 1024 * 1024),
    )(*inputs)

    return out_flat.reshape(T1, BP, Hh)[:, :B, :]                 # [T+1, B, H]


# ---------------------------- pure-JAX reference ------------------------------ #

def reference_forward(params, images, captions):
    B, C, Hi, Wi = images.shape
    pooled = jnp.mean(images.reshape(B, C, Hi * Wi), axis=-1)
    feat = jnp.maximum(pooled @ params["fc_w"] + params["fc_b"], 0.0)

    emb = jnp.take(params["embed"], captions, axis=0)
    seq = jnp.concatenate([feat[None], emb], axis=0)

    x = seq
    for l in range(params["num_layers"]):
        w_ih, w_hh, b = params[f"w_ih_{l}"], params[f"w_hh_{l}"], params[f"b_{l}"]
        Hh = w_hh.shape[0]

        def step(carry, x_t):
            h, c = carry
            gates = x_t @ w_ih + h @ w_hh + b
            i = jax.nn.sigmoid(gates[:, 0 * Hh:1 * Hh])
            f = jax.nn.sigmoid(gates[:, 1 * Hh:2 * Hh])
            g = jnp.tanh(gates[:, 2 * Hh:3 * Hh])
            o = jax.nn.sigmoid(gates[:, 3 * Hh:4 * Hh])
            c = f * c + i * g
            h = o * jnp.tanh(c)
            return (h, c), h

        init = (jnp.zeros((x.shape[1], Hh)), jnp.zeros((x.shape[1], Hh)))
        _, hs = lax.scan(step, init, x)
        x = hs
    return x


# ----------------------------------- main ------------------------------------- #

if __name__ == "__main__":
    B, C, Hi, Wi = 2, 4, 16, 16
    embed_size, hidden_size, vocab_size, num_layers = 32, 32, 64, 2
    seq_len = 8

    key = jax.random.PRNGKey(0)
    ks = jax.random.split(key, 16)

    params = {"num_layers": num_layers}
    # Encoder fc head (stand-in backbone feature dim = C after global avg pool).
    params["fc_w"] = 0.1 * jax.random.normal(ks[0], (C, embed_size), jnp.float32)
    params["fc_b"] = 0.1 * jax.random.normal(ks[1], (embed_size,), jnp.float32)
    # Decoder embedding table.
    params["embed"] = 0.1 * jax.random.normal(ks[2], (vocab_size, embed_size),
                                              jnp.float32)
    # LSTM stacks (PyTorch param shapes transposed for right-multiplication).
    for l in range(num_layers):
        d_in = embed_size if l == 0 else hidden_size
        params[f"w_ih_{l}"] = 0.1 * jax.random.normal(
            ks[3 + 3 * l], (d_in, 4 * hidden_size), jnp.float32)
        params[f"w_hh_{l}"] = 0.1 * jax.random.normal(
            ks[4 + 3 * l], (hidden_size, 4 * hidden_size), jnp.float32)
        params[f"b_{l}"] = 0.1 * jax.random.normal(
            ks[5 + 3 * l], (4 * hidden_size,), jnp.float32)

    images = jax.random.normal(ks[12], (B, C, Hi, Wi), jnp.float32)
    captions = jax.random.randint(ks[13], (seq_len, B), 0, vocab_size, jnp.int32)

    fwd = jax.jit(functools.partial(cnn_to_rnn_forward, params))
    out = fwd(images, captions)
    out = jax.block_until_ready(out)

    ref = reference_forward(params, images, captions)
    assert out.shape == (seq_len + 1, B, hidden_size), out.shape
    assert jnp.allclose(out, ref, atol=1e-4, rtol=1e-4), \
        float(jnp.max(jnp.abs(out - ref)))

    print("KERNEL_OK")
</pallas_src>

<mosaic_0001>
module attributes {stable_mosaic.version = 11 : i64} {
  func.func @kernel(%arg0: memref<8x1024xf32, #tpu.memory_space<vmem>>, %arg1: memref<1024x32xf32, #tpu.memory_space<vmem>>, %arg2: memref<1x32xf32, #tpu.memory_space<vmem>>, %arg3: memref<64x1xi32, #tpu.memory_space<vmem>>, %arg4: memref<64x32xf32, #tpu.memory_space<vmem>>, %arg5: memref<32x128xf32, #tpu.memory_space<vmem>>, %arg6: memref<4x32x32xf32, #tpu.memory_space<vmem>>, %arg7: memref<1x128xf32, #tpu.memory_space<vmem>>, %arg8: memref<32x128xf32, #tpu.memory_space<vmem>>, %arg9: memref<4x32x32xf32, #tpu.memory_space<vmem>>, %arg10: memref<1x128xf32, #tpu.memory_space<vmem>>, %arg11: memref<72x32xf32, #tpu.memory_space<vmem>>, %arg12: memref<72x32xf32, #tpu.memory_space<vmem>>, %arg13: memref<72x32xf32, #tpu.memory_space<vmem>>, %arg14: memref<72x32xf32, #tpu.memory_space<vmem>>, %arg15: memref<72x32xf32, #tpu.memory_space<vmem>>, %arg16: memref<72x32xf32, #tpu.memory_space<vmem>>, %arg17: memref<72x32xf32, #tpu.memory_space<vmem>>, %arg18: memref<8x32xf32, #tpu.memory_space<vmem>>, %arg19: memref<8x32xf32, #tpu.memory_space<vmem>>) attributes {dimension_semantics = [], scalar_prefetch = 0 : i64, scratch_operands = 8 : i64, tpu.core_type = #tpu.core_type<tc>} {
    %c0 = arith.constant 0 : index
    %c0_0 = arith.constant 0 : index
    %0 = vector.load %arg0[%c0, %c0_0] : memref<8x1024xf32, #tpu.memory_space<vmem>>, vector<8x1024xf32>
    %c0_1 = arith.constant 0 : index
    %c0_2 = arith.constant 0 : index
    %1 = vector.load %arg1[%c0_1, %c0_2] : memref<1024x32xf32, #tpu.memory_space<vmem>>, vector<1024x32xf32>
    %cst = arith.constant dense<0.000000e+00> : vector<8x32xf32>
    %2 = tpu.matmul %0, %1, %cst {dimension_numbers = #tpu.dot_dimension_numbers<[1], [0], [0], [1], [0, 0, 1, 1], [], []>} : vector<8x1024xf32>, vector<1024x32xf32>, vector<8x32xf32> -> vector<8x32xf32>
    %c0_3 = arith.constant 0 : index
    %c0_4 = arith.constant 0 : index
    %3 = vector.load %arg2[%c0_3, %c0_4] : memref<1x32xf32, #tpu.memory_space<vmem>>, vector<1x32xf32>
    %4 = vector.broadcast %3 : vector<1x32xf32> to vector<8x32xf32>
    %5 = arith.addf %2, %4 : vector<8x32xf32>
    %cst_5 = arith.constant 0.000000e+00 : f32
    %6 = vector.broadcast %cst_5 : f32 to vector<8x32xf32>
    %7 = arith.maximumf %5, %6 : vector<8x32xf32>
    %c0_6 = arith.constant 0 : index
    %c0_7 = arith.constant 0 : index
    %8 = vector.load %arg12[%c0_6, %c0_7] : memref<72x32xf32, #tpu.memory_space<vmem>>, vector<8x32xf32>
    tpu.vector_store %arg12[%c0_6, %c0_7], %7 {strides = array<i32>} : memref<72x32xf32, #tpu.memory_space<vmem>>, vector<8x32xf32>,
    %c0_8 = arith.constant 0 : index
    %c0_9 = arith.constant 0 : index
    %9 = vector.load %arg3[%c0_8, %c0_9] : memref<64x1xi32, #tpu.memory_space<vmem>>, vector<64x1xi32>
    %10 = tpu.iota {dimensions = array<i32: 1>} : vector<64x64xi32>
    %11 = vector.broadcast %9 : vector<64x1xi32> to vector<64x64xi32>
    %12 = arith.cmpi eq, %11, %10 : vector<64x64xi32>
    %13 = arith.extui %12 : vector<64x64xi1> to vector<64x64xi32>
    %14 = arith.sitofp %13 : vector<64x64xi32> to vector<64x64xf32>
    %c0_10 = arith.constant 0 : index
    %c0_11 = arith.constant 0 : index
    %15 = vector.load %arg4[%c0_10, %c0_11] : memref<64x32xf32, #tpu.memory_space<vmem>>, vector<64x32xf32>
    %cst_12 = arith.constant dense<0.000000e+00> : vector<64x32xf32>
    %16 = tpu.matmul %14, %15, %cst_12 {dimension_numbers = #tpu.dot_dimension_numbers<[1], [0], [0], [1], [0, 0, 1, 1], [], []>} : vector<64x64xf32>, vector<64x32xf32>, vector<64x32xf32> -> vector<64x32xf32>
    %c8 = arith.constant 8 : index
    %c0_13 = arith.constant 0 : index
    %17 = vector.load %arg12[%c8, %c0_13] : memref<72x32xf32, #tpu.memory_space<vmem>>, vector<64x32xf32>
    tpu.vector_store %arg12[%c8, %c0_13], %16 {strides = array<i32>} : memref<72x32xf32, #tpu.memory_space<vmem>>, vector<64x32xf32>,
    %c0_14 = arith.constant 0 : index
    %c0_15 = arith.constant 0 : index
    %18 = vector.load %arg12[%c0_14, %c0_15] : memref<72x32xf32, #tpu.memory_space<vmem>>, vector<72x32xf32>
    %c0_16 = arith.constant 0 : index
    %c0_17 = arith.constant 0 : index
    %19 = vector.load %arg5[%c0_16, %c0_17] : memref<32x128xf32, #tpu.memory_space<vmem>>, vector<32x128xf32>
    %cst_18 = arith.constant dense<0.000000e+00> : vector<72x128xf32>
    %20 = tpu.matmul %18, %19, %cst_18 {dimension_numbers = #tpu.dot_dimension_numbers<[1], [0], [0], [1], [0, 0, 1, 1], [], []>} : vector<72x32xf32>, vector<32x128xf32>, vector<72x128xf32> -> vector<72x128xf32>
    %c0_19 = arith.constant 0 : index
    %c0_20 = arith.constant 0 : index
    %21 = vector.load %arg7[%c0_19, %c0_20] : memref<1x128xf32, #tpu.memory_space<vmem>>, vector<1x128xf32>
    %22 = vector.broadcast %21 : vector<1x128xf32> to vector<72x128xf32>
    %23 = arith.addf %20, %22 : vector<72x128xf32>
    %24 = vector.extract_strided_slice %23 {offsets = [0, 0], sizes = [72, 32], strides = [1, 1]} : vector<72x128xf32> to vector<72x32xf32>
    %c0_21 = arith.constant 0 : index
    %c0_22 = arith.constant 0 : index
    %25 = vector.load %arg13[%c0_21, %c0_22] : memref<72x32xf32, #tpu.memory_space<vmem>>, vector<72x32xf32>
    tpu.vector_store %arg13[%c0_21, %c0_22], %24 {strides = array<i32>} : memref<72x32xf32, #tpu.memory_space<vmem>>, vector<72x32xf32>,
    %26 = vector.extract_strided_slice %23 {offsets = [0, 32], sizes = [72, 32], strides = [1, 1]} : vector<72x128xf32> to vector<72x32xf32>
    %c0_23 = arith.constant 0 : index
    %c0_24 = arith.constant 0 : index
    %27 = vector.load %arg14[%c0_23, %c0_24] : memref<72x32xf32, #tpu.memory_space<vmem>>, vector<72x32xf32>
    tpu.vector_store %arg14[%c0_23, %c0_24], %26 {strides = array<i32>} : memref<72x32xf32, #tpu.memory_space<vmem>>, vector<72x32xf32>,
    %28 = vector.extract_strided_slice %23 {offsets = [0, 64], sizes = [72, 32], strides = [1, 1]} : vector<72x128xf32> to vector<72x32xf32>
    %c0_25 = arith.constant 0 : index
    %c0_26 = arith.constant 0 : index
    %29 = vector.load %arg15[%c0_25, %c0_26] : memref<72x32xf32, #tpu.memory_space<vmem>>, vector<72x32xf32>
    tpu.vector_store %arg15[%c0_25, %c0_26], %28 {strides = array<i32>} : memref<72x32xf32, #tpu.memory_space<vmem>>, vector<72x32xf32>,
    %30 = vector.extract_strided_slice %23 {offsets = [0, 96], sizes = [72, 32], strides = [1, 1]} : vector<72x128xf32> to vector<72x32xf32>
    %c0_27 = arith.constant 0 : index
    %c0_28 = arith.constant 0 : index
    %31 = vector.load %arg16[%c0_27, %c0_28] : memref<72x32xf32, #tpu.memory_space<vmem>>, vector<72x32xf32>
    tpu.vector_store %arg16[%c0_27, %c0_28], %30 {strides = array<i32>} : memref<72x32xf32, #tpu.memory_space<vmem>>, vector<72x32xf32>,
    %c0_29 = arith.constant 0 : index
    %c0_30 = arith.constant 0 : index
    %c0_31 = arith.constant 0 : index
    %32 = vector.load %arg6[%c0_29, %c0_30, %c0_31] : memref<4x32x32xf32, #tpu.memory_space<vmem>>, vector<1x32x32xf32>
    %33 = vector.shape_cast %32 : vector<1x32x32xf32> to vector<32x32xf32>
    %c1 = arith.constant 1 : index
    %c0_32 = arith.constant 0 : index
    %c0_33 = arith.constant 0 : index
    %34 = vector.load %arg6[%c1, %c0_32, %c0_33] : memref<4x32x32xf32, #tpu.memory_space<vmem>>, vector<1x32x32xf32>
    %35 = vector.shape_cast %34 : vector<1x32x32xf32> to vector<32x32xf32>
    %c2 = arith.constant 2 : index
    %c0_34 = arith.constant 0 : index
    %c0_35 = arith.constant 0 : index
    %36 = vector.load %arg6[%c2, %c0_34, %c0_35] : memref<4x32x32xf32, #tpu.memory_space<vmem>>, vector<1x32x32xf32>
    %37 = vector.shape_cast %36 : vector<1x32x32xf32> to vector<32x32xf32>
    %c3 = arith.constant 3 : index
    %c0_36 = arith.constant 0 : index
    %c0_37 = arith.constant 0 : index
    %38 = vector.load %arg6[%c3, %c0_36, %c0_37] : memref<4x32x32xf32, #tpu.memory_space<vmem>>, vector<1x32x32xf32>
    %39 = vector.shape_cast %38 : vector<1x32x32xf32> to vector<32x32xf32>
    %cst_38 = arith.constant 0.000000e+00 : f32
    %40 = vector.broadcast %cst_38 : f32 to vector<8x32xf32>
    %c0_39 = arith.constant 0 : index
    %c0_40 = arith.constant 0 : index
    %41 = vector.load %arg18[%c0_39, %c0_40] : memref<8x32xf32, #tpu.memory_space<vmem>>, vector<8x32xf32>
    tpu.vector_store %arg18[%c0_39, %c0_40], %40 {strides = array<i32>} : memref<8x32xf32, #tpu.memory_space<vmem>>, vector<8x32xf32>,
    %cst_41 = arith.constant 0.000000e+00 : f32
    %42 = vector.broadcast %cst_41 : f32 to vector<8x32xf32>
    %c0_42 = arith.constant 0 : index
    %c0_43 = arith.constant 0 : index
    %43 = vector.load %arg19[%c0_42, %c0_43] : memref<8x32xf32, #tpu.memory_space<vmem>>, vector<8x32xf32>
    tpu.vector_store %arg19[%c0_42, %c0_43], %42 {strides = array<i32>} : memref<8x32xf32, #tpu.memory_space<vmem>>, vector<8x32xf32>,
    %c0_44 = arith.constant 0 : index
    %c0_45 = arith.constant 0 : index
    %44 = vector.load %arg18[%c0_44, %c0_45] : memref<8x32xf32, #tpu.memory_space<vmem>>, vector<8x32xf32>
    %c0_46 = arith.constant 0 : index
    %c0_47 = arith.constant 0 : index
    %45 = vector.load %arg13[%c0_46, %c0_47] : memref<72x32xf32, #tpu.memory_space<vmem>>, vector<8x32xf32>
    %cst_48 = arith.constant dense<0.000000e+00> : vector<8x32xf32>
    %46 = tpu.matmul %44, %33, %cst_48 {dimension_numbers = #tpu.dot_dimension_numbers<[1], [0], [0], [1], [0, 0, 1, 1], [], []>} : vector<8x32xf32>, vector<32x32xf32>, vector<8x32xf32> -> vector<8x32xf32>
    %47 = arith.addf %45, %46 : vector<8x32xf32>
    %c0_49 = arith.constant 0 : index
    %c0_50 = arith.constant 0 : index
    %48 = vector.load %arg14[%c0_49, %c0_50] : memref<72x32xf32, #tpu.memory_space<vmem>>, vector<8x32xf32>
    %cst_51 = arith.constant dense<0.000000e+00> : vector<8x32xf32>
    %49 = tpu.matmul %44, %35, %cst_51 {dimension_numbers = #tpu.dot_dimension_numbers<[1], [0], [0], [1], [0, 0, 1, 1], [], []>} : vector<8x32xf32>, vector<32x32xf32>, vector<8x32xf32> -> vector<8x32xf32>
    %50 = arith.addf %48, %49 : vector<8x32xf32>
    %c0_52 = arith.constant 0 : index
    %c0_53 = arith.constant 0 : index
    %51 = vector.load %arg15[%c0_52, %c0_53] : memref<72x32xf32, #tpu.memory_space<vmem>>, vector<8x32xf32>
    %cst_54 = arith.constant dense<0.000000e+00> : vector<8x32xf32>
    %52 = tpu.matmul %44, %37, %cst_54 {dimension_numbers = #tpu.dot_dimension_numbers<[1], [0], [0], [1], [0, 0, 1, 1], [], []>} : vector<8x32xf32>, vector<32x32xf32>, vector<8x32xf32> -> vector<8x32xf32>
    %53 = arith.addf %51, %52 : vector<8x32xf32>
    %c0_55 = arith.constant 0 : index
    %c0_56 = arith.constant 0 : index
    %54 = vector.load %arg16[%c0_55, %c0_56] : memref<72x32xf32, #tpu.memory_space<vmem>>, vector<8x32xf32>
    %cst_57 = arith.constant dense<0.000000e+00> : vector<8x32xf32>
    %55 = tpu.matmul %44, %39, %cst_57 {dimension_numbers = #tpu.dot_dimension_numbers<[1], [0], [0], [1], [0, 0, 1, 1], [], []>} : vector<8x32xf32>, vector<32x32xf32>, vector<8x32xf32> -> vector<8x32xf32>
    %56 = arith.addf %54, %55 : vector<8x32xf32>
    %57 = arith.negf %47 : vector<8x32xf32>
    %58 = math.exp %57 : vector<8x32xf32>
    %cst_58 = arith.constant 1.000000e+00 : f32
    %59 = vector.broadcast %cst_58 : f32 to vector<8x32xf32>
    %60 = arith.addf %59, %58 : vector<8x32xf32>
    %61 = arith.divf %59, %60 : vector<8x32xf32>
    %62 = arith.negf %50 : vector<8x32xf32>
    %63 = math.exp %62 : vector<8x32xf32>
    %cst_59 = arith.constant 1.000000e+00 : f32
    %64 = vector.broadcast %cst_59 : f32 to vector<8x32xf32>
    %65 = arith.addf %64, %63 : vector<8x32xf32>
    %66 = arith.divf %64, %65 : vector<8x32xf32>
    %67 = math.tanh %53 : vector<8x32xf32>
    %68 = arith.negf %56 : vector<8x32xf32>
    %69 = math.exp %68 : vector<8x32xf32>
    %cst_60 = arith.constant 1.000000e+00 : f32
    %70 = vector.broadcast %cst_60 : f32 to vector<8x32xf32>
    %71 = arith.addf %70, %69 : vector<8x32xf32>
    %72 = arith.divf %70, %71 : vector<8x32xf32>
    %c0_61 = arith.constant 0 : index
    %c0_62 = arith.constant 0 : index
    %73 = vector.load %arg19[%c0_61, %c0_62] : memref<8x32xf32, #tpu.memory_space<vmem>>, vector<8x32xf32>
    %74 = arith.mulf %66, %73 : vector<8x32xf32>
    %75 = arith.mulf %61, %67 : vector<8x32xf32>
    %76 = arith.addf %74, %75 : vector<8x32xf32>
    %77 = math.tanh %76 : vector<8x32xf32>
    %78 = arith.mulf %72, %77 : vector<8x32xf32>
    %c0_63 = arith.constant 0 : index
    %c0_64 = arith.constant 0 : index
    %79 = vector.load %arg19[%c0_63, %c0_64] : memref<8x32xf32, #tpu.memory_space<vmem>>, vector<8x32xf32>
    tpu.vector_store %arg19[%c0_63, %c0_64], %76 {strides = array<i32>} : memref<8x32xf32, #tpu.memory_space<vmem>>, vector<8x32xf32>,
    %c0_65 = arith.constant 0 : index
    %c0_66 = arith.constant 0 : index
    %80 = vector.load %arg18[%c0_65, %c0_66] : memref<8x32xf32, #tpu.memory_space<vmem>>, vector<8x32xf32>
    tpu.vector_store %arg18[%c0_65, %c0_66], %78 {strides = array<i32>} : memref<8x32xf32, #tpu.memory_space<vmem>>, vector<8x32xf32>,
    %c0_67 = arith.constant 0 : index
    %c0_68 = arith.constant 0 : index
    %81 = vector.load %arg17[%c0_67, %c0_68] : memref<72x32xf32, #tpu.memory_space<vmem>>, vector<8x32xf32>
    tpu.vector_store %arg17[%c0_67, %c0_68], %78 {strides = array<i32>} : memref<72x32xf32, #tpu.memory_space<vmem>>, vector<8x32xf32>,
    %c0_69 = arith.constant 0 : index
    %c0_70 = arith.constant 0 : index
    %82 = vector.load %arg18[%c0_69, %c0_70] : memref<8x32xf32, #tpu.memory_space<vmem>>, vector<8x32xf32>
    %c8_71 = arith.constant 8 : index
    %c0_72 = arith.constant 0 : index
    %83 = vector.load %arg13[%c8_71, %c0_72] : memref<72x32xf32, #tpu.memory_space<vmem>>, vector<8x32xf32>
    %cst_73 = arith.constant dense<0.000000e+00> : vector<8x32xf32>
    %84 = tpu.matmul %82, %33, %cst_73 {dimension_numbers = #tpu.dot_dimension_numbers<[1], [0], [0], [1], [0, 0, 1, 1], [], []>} : vector<8x32xf32>, vector<32x32xf32>, vector<8x32xf32> -> vector<8x32xf32>
    %85 = arith.addf %83, %84 : vector<8x32xf32>
    %c8_74 = arith.constant 8 : index
    %c0_75 = arith.constant 0 : index
    %86 = vector.load %arg14[%c8_74, %c0_75] : memref<72x32xf32, #tpu.memory_space<vmem>>, vector<8x32xf32>
    %cst_76 = arith.constant dense<0.000000e+00> : vector<8x32xf32>
    %87 = tpu.matmul %82, %35, %cst_76 {dimension_numbers = #tpu.dot_dimension_numbers<[1], [0], [0], [1], [0, 0, 1, 1], [], []>} : vector<8x32xf32>, vector<32x32xf32>, vector<8x32xf32> -> vector<8x32xf32>
    %88 = arith.addf %86, %87 : vector<8x32xf32>
    %c8_77 = arith.constant 8 : index
    %c0_78 = arith.constant 0 : index
    %89 = vector.load %arg15[%c8_77, %c0_78] : memref<72x32xf32, #tpu.memory_space<vmem>>, vector<8x32xf32>
    %cst_79 = arith.constant dense<0.000000e+00> : vector<8x32xf32>
    %90 = tpu.matmul %82, %37, %cst_79 {dimension_numbers = #tpu.dot_dimension_numbers<[1], [0], [0], [1], [0, 0, 1, 1], [], []>} : vector<8x32xf32>, vector<32x32xf32>, vector<8x32xf32> -> vector<8x32xf32>
    %91 = arith.addf %89, %90 : vector<8x32xf32>
    %c8_80 = arith.constant 8 : index
    %c0_81 = arith.constant 0 : index
    %92 = vector.load %arg16[%c8_80, %c0_81] : memref<72x32xf32, #tpu.memory_space<vmem>>, vector<8x32xf32>
    %cst_82 = arith.constant dense<0.000000e+00> : vector<8x32xf32>
    %93 = tpu.matmul %82, %39, %cst_82 {dimension_numbers = #tpu.dot_dimension_numbers<[1], [0], [0], [1], [0, 0, 1, 1], [], []>} : vector<8x32xf32>, vector<32x32xf32>, vector<8x32xf32> -> vector<8x32xf32>
    %94 = arith.addf %92, %93 : vector<8x32xf32>
    %95 = arith.negf %85 : vector<8x32xf32>
    %96 = math.exp %95 : vector<8x32xf32>
    %cst_83 = arith.constant 1.000000e+00 : f32
    %97 = vector.broadcast %cst_83 : f32 to vector<8x32xf32>
    %98 = arith.addf %97, %96 : vector<8x32xf32>
    %99 = arith.divf %97, %98 : vector<8x32xf32>
    %100 = arith.negf %88 : vector<8x32xf32>
    %101 = math.exp %100 : vector<8x32xf32>
    %cst_84 = arith.constant 1.000000e+00 : f32
    %102 = vector.broadcast %cst_84 : f32 to vector<8x32xf32>
    %103 = arith.addf %102, %101 : vector<8x32xf32>
    %104 = arith.divf %102, %103 : vector<8x32xf32>
    %105 = math.tanh %91 : vector<8x32xf32>
    %106 = arith.negf %94 : vector<8x32xf32>
    %107 = math.exp %106 : vector<8x32xf32>
    %cst_85 = arith.constant 1.000000e+00 : f32
    %108 = vector.broadcast %cst_85 : f32 to vector<8x32xf32>
    %109 = arith.addf %108, %107 : vector<8x32xf32>
    %110 = arith.divf %108, %109 : vector<8x32xf32>
    %c0_86 = arith.constant 0 : index
    %c0_87 = arith.constant 0 : index
    %111 = vector.load %arg19[%c0_86, %c0_87] : memref<8x32xf32, #tpu.memory_space<vmem>>, vector<8x32xf32>
    %112 = arith.mulf %104, %111 : vector<8x32xf32>
    %113 = arith.mulf %99, %105 : vector<8x32xf32>
    %114 = arith.addf %112, %113 : vector<8x32xf32>
    %115 = math.tanh %114 : vector<8x32xf32>
    %116 = arith.mulf %110, %115 : vector<8x32xf32>
    %c0_88 = arith.constant 0 : index
    %c0_89 = arith.constant 0 : index
    %117 = vector.load %arg19[%c0_88, %c0_89] : memref<8x32xf32, #tpu.memory_space<vmem>>, vector<8x32xf32>
    tpu.vector_store %arg19[%c0_88, %c0_89], %114 {strides = array<i32>} : memref<8x32xf32, #tpu.memory_space<vmem>>, vector<8x32xf32>,
    %c0_90 = arith.constant 0 : index
    %c0_91 = arith.constant 0 : index
    %118 = vector.load %arg18[%c0_90, %c0_91] : memref<8x32xf32, #tpu.memory_space<vmem>>, vector<8x32xf32>
    tpu.vector_store %arg18[%c0_90, %c0_91], %116 {strides = array<i32>} : memref<8x32xf32, #tpu.memory_space<vmem>>, vector<8x32xf32>,
    %c8_92 = arith.constant 8 : index
    %c0_93 = arith.constant 0 : index
    %119 = vector.load %arg17[%c8_92, %c0_93] : memref<72x32xf32, #tpu.memory_space<vmem>>, vector<8x32xf32>
    tpu.vector_store %arg17[%c8_92, %c0_93], %116 {strides = array<i32>} : memref<72x32xf32, #tpu.memory_space<vmem>>, vector<8x32xf32>,
    %c0_94 = arith.constant 0 : index
    %c0_95 = arith.constant 0 : index
    %120 = vector.load %arg18[%c0_94, %c0_95] : memref<8x32xf32, #tpu.memory_space<vmem>>, vector<8x32xf32>
    %c16 = arith.constant 16 : index
    %c0_96 = arith.constant 0 : index
    %121 = vector.load %arg13[%c16, %c0_96] : memref<72x32xf32, #tpu.memory_space<vmem>>, vector<8x32xf32>
    %cst_97 = arith.constant dense<0.000000e+00> : vector<8x32xf32>
    %122 = tpu.matmul %120, %33, %cst_97 {dimension_numbers = #tpu.dot_dimension_numbers<[1], [0], [0], [1], [0, 0, 1, 1], [], []>} : vector<8x32xf32>, vector<32x32xf32>, vector<8x32xf32> -> vector<8x32xf32>
    %123 = arith.addf %121, %122 : vector<8x32xf32>
    %c16_98 = arith.constant 16 : index
    %c0_99 = arith.constant 0 : index
    %124 = vector.load %arg14[%c16_98, %c0_99] : memref<72x32xf32, #tpu.memory_space<vmem>>, vector<8x32xf32>
    %cst_100 = arith.constant dense<0.000000e+00> : vector<8x32xf32>
    %125 = tpu.matmul %120, %35, %cst_100 {dimension_numbers = #tpu.dot_dimension_numbers<[1], [0], [0], [1], [0, 0, 1, 1], [], []>} : vector<8x32xf32>, vector<32x32xf32>, vector<8x32xf32> -> vector<8x32xf32>
    %126 = arith.addf %124, %125 : vector<8x32xf32>
    %c16_101 = arith.constant 16 : index
    %c0_102 = arith.constant 0 : index
    %127 = vector.load %arg15[%c16_101, %c0_102] : memref<72x32xf32, #tpu.memory_space<vmem>>, vector<8x32xf32>
    %cst_103 = arith.constant dense<0.000000e+00> : vector<8x32xf32>
    %128 = tpu.matmul %120, %37, %cst_103 {dimension_numbers = #tpu.dot_dimension_numbers<[1], [0], [0], [1], [0, 0, 1, 1], [], []>} : vector<8x32xf32>, vector<32x32xf32>, vector<8x32xf32> -> vector<8x32xf32>
    %129 = arith.addf %127, %128 : vector<8x32xf32>
    %c16_104 = arith.constant 16 : index
    %c0_105 = arith.constant 0 : index
    %130 = vector.load %arg16[%c16_104, %c0_105] : memref<72x32xf32, #tpu.memory_space<vmem>>, vector<8x32xf32>
    %cst_106 = arith.constant dense<0.000000e+00> : vector<8x32xf32>
    %131 = tpu.matmul %120, %39, %cst_106 {dimension_numbers = #tpu.dot_dimension_numbers<[1], [0], [0], [1], [0, 0, 1, 1], [], []>} : vector<8x32xf32>, vector<32x32xf32>, vector<8x32xf32> -> vector<8x32xf32>
    %132 = arith.addf %130, %131 : vector<8x32xf32>
    %133 = arith.negf %123 : vector<8x32xf32>
    %134 = math.exp %133 : vector<8x32xf32>
    %cst_107 = arith.constant 1.000000e+00 : f32
    %135 = vector.broadcast %cst_107 : f32 to vector<8x32xf32>
    %136 = arith.addf %135, %134 : vector<8x32xf32>
    %137 = arith.divf %135, %136 : vector<8x32xf32>
    %138 = arith.negf %126 : vector<8x32xf32>
    %139 = math.exp %138 : vector<8x32xf32>
    %cst_108 = arith.constant 1.000000e+00 : f32
    %140 = vector.broadcast %cst_108 : f32 to vector<8x32xf32>
    %141 = arith.addf %140, %139 : vector<8x32xf32>
    %142 = arith.divf %140, %141 : vector<8x32xf32>
    %143 = math.tanh %129 : vector<8x32xf32>
    %144 = arith.negf %132 : vector<8x32xf32>
    %145 = math.exp %144 : vector<8x32xf32>
    %cst_109 = arith.constant 1.000000e+00 : f32
    %146 = vector.broadcast %cst_109 : f32 to vector<8x32xf32>
    %147 = arith.addf %146, %145 : vector<8x32xf32>
    %148 = arith.divf %146, %147 : vector<8x32xf32>
    %c0_110 = arith.constant 0 : index
    %c0_111 = arith.constant 0 : index
    %149 = vector.load %arg19[%c0_110, %c0_111] : memref<8x32xf32, #tpu.memory_space<vmem>>, vector<8x32xf32>
    %150 = arith.mulf %142, %149 : vector<8x32xf32>
    %151 = arith.mulf %137, %143 : vector<8x32xf32>
    %152 = arith.addf %150, %151 : vector<8x32xf32>
    %153 = math.tanh %152 : vector<8x32xf32>
    %154 = arith.mulf %148, %153 : vector<8x32xf32>
    %c0_112 = arith.constant 0 : index
    %c0_113 = arith.constant 0 : index
    %155 = vector.load %arg19[%c0_112, %c0_113] : memref<8x32xf32, #tpu.memory_space<vmem>>, vector<8x32xf32>
    tpu.vector_store %arg19[%c0_112, %c0_113], %152 {strides = array<i32>} : memref<8x32xf32, #tpu.memory_space<vmem>>, vector<8x32xf32>,
    %c0_114 = arith.constant 0 : index
    %c0_115 = arith.constant 0 : index
    %156 = vector.load %arg18[%c0_114, %c0_115] : memref<8x32xf32, #tpu.memory_space<vmem>>, vector<8x32xf32>
    tpu.vector_store %arg18[%c0_114, %c0_115], %154 {strides = array<i32>} : memref<8x32xf32, #tpu.memory_space<vmem>>, vector<8x32xf32>,
    %c16_116 = arith.constant 16 : index
    %c0_117 = arith.constant 0 : index
    %157 = vector.load %arg17[%c16_116, %c0_117] : memref<72x32xf32, #tpu.memory_space<vmem>>, vector<8x32xf32>
    tpu.vector_store %arg17[%c16_116, %c0_117], %154 {strides = array<i32>} : memref<72x32xf32, #tpu.memory_space<vmem>>, vector<8x32xf32>,
    %c0_118 = arith.constant 0 : index
    %c0_119 = arith.constant 0 : index
    %158 = vector.load %arg18[%c0_118, %c0_119] : memref<8x32xf32, #tpu.memory_space<vmem>>, vector<8x32xf32>
    %c24 = arith.constant 24 : index
    %c0_120 = arith.constant 0 : index
    %159 = vector.load %arg13[%c24, %c0_120] : memref<72x32xf32, #tpu.memory_space<vmem>>, vector<8x32xf32>
    %cst_121 = arith.constant dense<0.000000e+00> : vector<8x32xf32>
    %160 = tpu.matmul %158, %33, %cst_121 {dimension_numbers = #tpu.dot_dimension_numbers<[1], [0], [0], [1], [0, 0, 1, 1], [], []>} : vector<8x32xf32>, vector<32x32xf32>, vector<8x32xf32> -> vector<8x32xf32>
    %161 = arith.addf %159, %160 : vector<8x32xf32>
    %c24_122 = arith.constant 24 : index
    %c0_123 = arith.constant 0 : index
    %162 = vector.load %arg14[%c24_122, %c0_123] : memref<72x32xf32, #tpu.memory_space<vmem>>, vector<8x32xf32>
    %cst_124 = arith.constant dense<0.000000e+00> : vector<8x32xf32>
    %163 = tpu.matmul %158, %35, %cst_124 {dimension_numbers = #tpu.dot_dimension_numbers<[1], [0], [0], [1], [0, 0, 1, 1], [], []>} : vector<8x32xf32>, vector<32x32xf32>, vector<8x32xf32> -> vector<8x32xf32>
    %164 = arith.addf %162, %163 : vector<8x32xf32>
    %c24_125 = arith.constant 24 : index
    %c0_126 = arith.constant 0 : index
    %165 = vector.load %arg15[%c24_125, %c0_126] : memref<72x32xf32, #tpu.memory_space<vmem>>, vector<8x32xf32>
    %cst_127 = arith.constant dense<0.000000e+00> : vector<8x32xf32>
    %166 = tpu.matmul %158, %37, %cst_127 {dimension_numbers = #tpu.dot_dimension_numbers<[1], [0], [0], [1], [0, 0, 1, 1], [], []>} : vector<8x32xf32>, vector<32x32xf32>, vector<8x32xf32> -> vector<8x32xf32>
    %167 = arith.addf %165, %166 : vector<8x32xf32>
    %c24_128 = arith.constant 24 : index
    %c0_129 = arith.constant 0 : index
    %168 = vector.load %arg16[%c24_128, %c0_129] : memref<72x32xf32, #tpu.memory_space<vmem>>, vector<8x32xf32>
    %cst_130 = arith.constant dense<0.000000e+00> : vector<8x32xf32>
    %169 = tpu.matmul %158, %39, %cst_130 {dimension_numbers = #tpu.dot_dimension_numbers<[1], [0], [0], [1], [0, 0, 1, 1], [], []>} : vector<8x32xf32>, vector<32x32xf32>, vector<8x32xf32> -> vector<8x32xf32>
    %170 = arith.addf %168, %169 : vector<8x32xf32>
    %171 = arith.negf %161 : vector<8x32xf32>
    %172 = math.exp %171 : vector<8x32xf32>
    %cst_131 = arith.constant 1.000000e+00 : f32
    %173 = vector.broadcast %cst_131 : f32 to vector<8x32xf32>
    %174 = arith.addf %173, %172 : vector<8x32xf32>
    %175 = arith.divf %173, %174 : vector<8x32xf32>
    %176 = arith.negf %164 : vector<8x32xf32>
    %177 = math.exp %176 : vector<8x32xf32>
    %cst_132 = arith.constant 1.000000e+00 : f32
    %178 = vector.broadcast %cst_132 : f32 to vector<8x32xf32>
    %179 = arith.addf %178, %177 : vector<8x32xf32>
    %180 = arith.divf %178, %179 : vector<8x32xf32>
    %181 = math.tanh %167 : vector<8x32xf32>
    %182 = arith.negf %170 : vector<8x32xf32>
    %183 = math.exp %182 : vector<8x32xf32>
    %cst_133 = arith.constant 1.000000e+00 : f32
    %184 = vector.broadcast %cst_133 : f32 to vector<8x32xf32>
    %185 = arith.addf %184, %183 : vector<8x32xf32>
    %186 = arith.divf %184, %185 : vector<8x32xf32>
    %c0_134 = arith.constant 0 : index
    %c0_135 = arith.constant 0 : index
    %187 = vector.load %arg19[%c0_134, %c0_135] : memref<8x32xf32, #tpu.memory_space<vmem>>, vector<8x32xf32>
    %188 = arith.mulf %180, %187 : vector<8x32xf32>
    %189 = arith.mulf %175, %181 : vector<8x32xf32>
    %190 = arith.addf %188, %189 : vector<8x32xf32>
    %191 = math.tanh %190 : vector<8x32xf32>
    %192 = arith.mulf %186, %191 : vector<8x32xf32>
    %c0_136 = arith.constant 0 : index
    %c0_137 = arith.constant 0 : index
    %193 = vector.load %arg19[%c0_136, %c0_137] : memref<8x32xf32, #tpu.memory_space<vmem>>, vector<8x32xf32>
    tpu.vector_store %arg19[%c0_136, %c0_137], %190 {strides = array<i32>} : memref<8x32xf32, #tpu.memory_space<vmem>>, vector<8x32xf32>,
    %c0_138 = arith.constant 0 : index
    %c0_139 = arith.constant 0 : index
    %194 = vector.load %arg18[%c0_138, %c0_139] : memref<8x32xf32, #tpu.memory_space<vmem>>, vector<8x32xf32>
    tpu.vector_store %arg18[%c0_138, %c0_139], %192 {strides = array<i32>} : memref<8x32xf32, #tpu.memory_space<vmem>>, vector<8x32xf32>,
    %c24_140 = arith.constant 24 : index
    %c0_141 = arith.constant 0 : index
    %195 = vector.load %arg17[%c24_140, %c0_141] : memref<72x32xf32, #tpu.memory_space<vmem>>, vector<8x32xf32>
    tpu.vector_store %arg17[%c24_140, %c0_141], %192 {strides = array<i32>} : memref<72x32xf32, #tpu.memory_space<vmem>>, vector<8x32xf32>,
    %c0_142 = arith.constant 0 : index
    %c0_143 = arith.constant 0 : index
    %196 = vector.load %arg18[%c0_142, %c0_143] : memref<8x32xf32, #tpu.memory_space<vmem>>, vector<8x32xf32>
    %c32 = arith.constant 32 : index
    %c0_144 = arith.constant 0 : index
    %197 = vector.load %arg13[%c32, %c0_144] : memref<72x32xf32, #tpu.memory_space<vmem>>, vector<8x32xf32>
    %cst_145 = arith.constant dense<0.000000e+00> : vector<8x32xf32>
    %198 = tpu.matmul %196, %33, %cst_145 {dimension_numbers = #tpu.dot_dimension_numbers<[1], [0], [0], [1], [0, 0, 1, 1], [], []>} : vector<8x32xf32>, vector<32x32xf32>, vector<8x32xf32> -> vector<8x32xf32>
    %199 = arith.addf %197, %198 : vector<8x32xf32>
    %c32_146 = arith.constant 32 : index
    %c0_147 = arith.constant 0 : index
    %200 = vector.load %arg14[%c32_146, %c0_147] : memref<72x32xf32, #tpu.memory_space<vmem>>, vector<8x32xf32>
    %cst_148 = arith.constant dense<0.000000e+00> : vector<8x32xf32>
    %201 = tpu.matmul %196, %35, %cst_148 {dimension_numbers = #tpu.dot_dimension_numbers<[1], [0], [0], [1], [0, 0, 1, 1], [], []>} : vector<8x32xf32>, vector<32x32xf32>, vector<8x32xf32> -> vector<8x32xf32>
    %202 = arith.addf %200, %201 : vector<8x32xf32>
    %c32_149 = arith.constant 32 : index
    %c0_150 = arith.constant 0 : index
    %203 = vector.load %arg15[%c32_149, %c0_150] : memref<72x32xf32, #tpu.memory_space<vmem>>, vector<8x32xf32>
    %cst_151 = arith.constant dense<0.000000e+00> : vector<8x32xf32>
    %204 = tpu.matmul %196, %37, %cst_151 {dimension_numbers = #tpu.dot_dimension_numbers<[1], [0], [0], [1], [0, 0, 1, 1], [], []>} : vector<8x32xf32>, vector<32x32xf32>, vector<8x32xf32> -> vector<8x32xf32>
    %205 = arith.addf %203, %204 : vector<8x32xf32>
    %c32_152 = arith.constant 32 : index
    %c0_153 = arith.constant 0 : index
    %206 = vector.load %arg16[%c32_152, %c0_153] : memref<72x32xf32, #tpu.memory_space<vmem>>, vector<8x32xf32>
    %cst_154 = arith.constant dense<0.000000e+00> : vector<8x32xf32>
    %207 = tpu.matmul %196, %39, %cst_154 {dimension_numbers = #tpu.dot_dimension_numbers<[1], [0], [0], [1], [0, 0, 1, 1], [], []>} : vector<8x32xf32>, vector<32x32xf32>, vector<8x32xf32> -> vector<8x32xf32>
    %208 = arith.addf %206, %207 : vector<8x32xf32>
    %209 = arith.negf %199 : vector<8x32xf32>
    %210 = math.exp %209 : vector<8x32xf32>
    %cst_155 = arith.constant 1.000000e+00 : f32
    %211 = vector.broadcast %cst_155 : f32 to vector<8x32xf32>
    %212 = arith.addf %211, %210 : vector<8x32xf32>
    %213 = arith.divf %211, %212 : vector<8x32xf32>
    %214 = arith.negf %202 : vector<8x32xf32>
    %215 = math.exp %214 : vector<8x32xf32>
    %cst_156 = arith.constant 1.000000e+00 : f32
    %216 = vector.broadcast %cst_156 : f32 to vector<8x32xf32>
    %217 = arith.addf %216, %215 : vector<8x32xf32>
    %218 = arith.divf %216, %217 : vector<8x32xf32>
    %219 = math.tanh %205 : vector<8x32xf32>
    %220 = arith.negf %208 : vector<8x32xf32>
    %221 = math.exp %220 : vector<8x32xf32>
    %cst_157 = arith.constant 1.000000e+00 : f32
    %222 = vector.broadcast %cst_157 : f32 to vector<8x32xf32>
    %223 = arith.addf %222, %221 : vector<8x32xf32>
    %224 = arith.divf %222, %223 : vector<8x32xf32>
    %c0_158 = arith.constant 0 : index
    %c0_159 = arith.constant 0 : index
    %225 = vector.load %arg19[%c0_158, %c0_159] : memref<8x32xf32, #tpu.memory_space<vmem>>, vector<8x32xf32>
    %226 = arith.mulf %218, %225 : vector<8x32xf32>
    %227 = arith.mulf %213, %219 : vector<8x32xf32>
    %228 = arith.addf %226, %227 : vector<8x32xf32>
    %229 = math.tanh %228 : vector<8x32xf32>
    %230 = arith.mulf %224, %229 : vector<8x32xf32>
    %c0_160 = arith.constant 0 : index
    %c0_161 = arith.constant 0 : index
    %231 = vector.load %arg19[%c0_160, %c0_161] : memref<8x32xf32, #tpu.memory_space<vmem>>, vector<8x32xf32>
    tpu.vector_store %arg19[%c0_160, %c0_161], %228 {strides = array<i32>} : memref<8x32xf32, #tpu.memory_space<vmem>>, vector<8x32xf32>,
    %c0_162 = arith.constant 0 : index
    %c0_163 = arith.constant 0 : index
    %232 = vector.load %arg18[%c0_162, %c0_163] : memref<8x32xf32, #tpu.memory_space<vmem>>, vector<8x32xf32>
    tpu.vector_store %arg18[%c0_162, %c0_163], %230 {strides = array<i32>} : memref<8x32xf32, #tpu.memory_space<vmem>>, vector<8x32xf32>,
    %c32_164 = arith.constant 32 : index
    %c0_165 = arith.constant 0 : index
    %233 = vector.load %arg17[%c32_164, %c0_165] : memref<72x32xf32, #tpu.memory_space<vmem>>, vector<8x32xf32>
    tpu.vector_store %arg17[%c32_164, %c0_165], %230 {strides = array<i32>} : memref<72x32xf32, #tpu.memory_space<vmem>>, vector<8x32xf32>,
    %c0_166 = arith.constant 0 : index
    %c0_167 = arith.constant 0 : index
    %234 = vector.load %arg18[%c0_166, %c0_167] : memref<8x32xf32, #tpu.memory_space<vmem>>, vector<8x32xf32>
    %c40 = arith.constant 40 : index
    %c0_168 = arith.constant 0 : index
    %235 = vector.load %arg13[%c40, %c0_168] : memref<72x32xf32, #tpu.memory_space<vmem>>, vector<8x32xf32>
    %cst_169 = arith.constant dense<0.000000e+00> : vector<8x32xf32>
    %236 = tpu.matmul %234, %33, %cst_169 {dimension_numbers = #tpu.dot_dimension_numbers<[1], [0], [0], [1], [0, 0, 1, 1], [], []>} : vector<8x32xf32>, vector<32x32xf32>, vector<8x32xf32> -> vector<8x32xf32>
    %237 = arith.addf %235, %236 : vector<8x32xf32>
    %c40_170 = arith.constant 40 : index
    %c0_171 = arith.constant 0 : index
    %238 = vector.load %arg14[%c40_170, %c0_171] : memref<72x32xf32, #tpu.memory_space<vmem>>, vector<8x32xf32>
    %cst_172 = arith.constant dense<0.000000e+00> : vector<8x32xf32>
    %239 = tpu.matmul %234, %35, %cst_172 {dimension_numbers = #tpu.dot_dimension_numbers<[1], [0], [0], [1], [0, 0, 1, 1], [], []>} : vector<8x32xf32>, vector<32x32xf32>, vector<8x32xf32> -> vector<8x32xf32>
    %240 = arith.addf %238, %239 : vector<8x32xf32>
    %c40_173 = arith.constant 40 : index
    %c0_174 = arith.constant 0 : index
    %241 = vector.load %arg15[%c40_173, %c0_174] : memref<72x32xf32, #tpu.memory_space<vmem>>, vector<8x32xf32>
    %cst_175 = arith.constant dense<0.000000e+00> : vector<8x32xf32>
    %242 = tpu.matmul %234, %37, %cst_175 {dimension_numbers = #tpu.dot_dimension_numbers<[1], [0], [0], [1], [0, 0, 1, 1], [], []>} : vector<8x32xf32>, vector<32x32xf32>, vector<8x32xf32> -> vector<8x32xf32>
    %243 = arith.addf %241, %242 : vector<8x32xf32>
    %c40_176 = arith.constant 40 : index
    %c0_177 = arith.constant 0 : index
    %244 = vector.load %arg16[%c40_176, %c0_177] : memref<72x32xf32, #tpu.memory_space<vmem>>, vector<8x32xf32>
    %cst_178 = arith.constant dense<0.000000e+00> : vector<8x32xf32>
    %245 = tpu.matmul %234, %39, %cst_178 {dimension_numbers = #tpu.dot_dimension_numbers<[1], [0], [0], [1], [0, 0, 1, 1], [], []>} : vector<8x32xf32>, vector<32x32xf32>, vector<8x32xf32> -> vector<8x32xf32>
    %246 = arith.addf %244, %245 : vector<8x32xf32>
    %247 = arith.negf %237 : vector<8x32xf32>
    %248 = math.exp %247 : vector<8x32xf32>
    %cst_179 = arith.constant 1.000000e+00 : f32
    %249 = vector.broadcast %cst_179 : f32 to vector<8x32xf32>
    %250 = arith.addf %249, %248 : vector<8x32xf32>
    %251 = arith.divf %249, %250 : vector<8x32xf32>
    %252 = arith.negf %240 : vector<8x32xf32>
    %253 = math.exp %252 : vector<8x32xf32>
    %cst_180 = arith.constant 1.000000e+00 : f32
    %254 = vector.broadcast %cst_180 : f32 to vector<8x32xf32>
    %255 = arith.addf %254, %253 : vector<8x32xf32>
    %256 = arith.divf %254, %255 : vector<8x32xf32>
    %257 = math.tanh %243 : vector<8x32xf32>
    %258 = arith.negf %246 : vector<8x32xf32>
    %259 = math.exp %258 : vector<8x32xf32>
    %cst_181 = arith.constant 1.000000e+00 : f32
    %260 = vector.broadcast %cst_181 : f32 to vector<8x32xf32>
    %261 = arith.addf %260, %259 : vector<8x32xf32>
    %262 = arith.divf %260, %261 : vector<8x32xf32>
    %c0_182 = arith.constant 0 : index
    %c0_183 = arith.constant 0 : index
    %263 = vector.load %arg19[%c0_182, %c0_183] : memref<8x32xf32, #tpu.memory_space<vmem>>, vector<8x32xf32>
    %264 = arith.mulf %256, %263 : vector<8x32xf32>
    %265 = arith.mulf %251, %257 : vector<8x32xf32>
    %266 = arith.addf %264, %265 : vector<8x32xf32>
    %267 = math.tanh %266 : vector<8x32xf32>
    %268 = arith.mulf %262, %267 : vector<8x32xf32>
    %c0_184 = arith.constant 0 : index
    %c0_185 = arith.constant 0 : index
    %269 = vector.load %arg19[%c0_184, %c0_185] : memref<8x32xf32, #tpu.memory_space<vmem>>, vector<8x32xf32>
    tpu.vector_store %arg19[%c0_184, %c0_185], %266 {strides = array<i32>} : memref<8x32xf32, #tpu.memory_space<vmem>>, vector<8x32xf32>,
    %c0_186 = arith.constant 0 : index
    %c0_187 = arith.constant 0 : index
    %270 = vector.load %arg18[%c0_186, %c0_187] : memref<8x32xf32, #tpu.memory_space<vmem>>, vector<8x32xf32>
    tpu.vector_store %arg18[%c0_186, %c0_187], %268 {strides = array<i32>} : memref<8x32xf32, #tpu.memory_space<vmem>>, vector<8x32xf32>,
    %c40_188 = arith.constant 40 : index
    %c0_189 = arith.constant 0 : index
    %271 = vector.load %arg17[%c40_188, %c0_189] : memref<72x32xf32, #tpu.memory_space<vmem>>, vector<8x32xf32>
    tpu.vector_store %arg17[%c40_188, %c0_189], %268 {strides = array<i32>} : memref<72x32xf32, #tpu.memory_space<vmem>>, vector<8x32xf32>,
    %c0_190 = arith.constant 0 : index
    %c0_191 = arith.constant 0 : index
    %272 = vector.load %arg18[%c0_190, %c0_191] : memref<8x32xf32, #tpu.memory_space<vmem>>, vector<8x32xf32>
    %c48 = arith.constant 48 : index
    %c0_192 = arith.constant 0 : index
    %273 = vector.load %arg13[%c48, %c0_192] : memref<72x32xf32, #tpu.memory_space<vmem>>, vector<8x32xf32>
    %cst_193 = arith.constant dense<0.000000e+00> : vector<8x32xf32>
    %274 = tpu.matmul %272, %33, %cst_193 {dimension_numbers = #tpu.dot_dimension_numbers<[1], [0], [0], [1], [0, 0, 1, 1], [], []>} : vector<8x32xf32>, vector<32x32xf32>, vector<8x32xf32> -> vector<8x32xf32>
    %275 = arith.addf %273, %274 : vector<8x32xf32>
    %c48_194 = arith.constant 48 : index
    %c0_195 = arith.constant 0 : index
    %276 = vector.load %arg14[%c48_194, %c0_195] : memref<72x32xf32, #tpu.memory_space<vmem>>, vector<8x32xf32>
    %cst_196 = arith.constant dense<0.000000e+00> : vector<8x32xf32>
    %277 = tpu.matmul %272, %35, %cst_196 {dimension_numbers = #tpu.dot_dimension_numbers<[1], [0], [0], [1], [0, 0, 1, 1], [], []>} : vector<8x32xf32>, vector<32x32xf32>, vector<8x32xf32> -> vector<8x32xf32>
    %278 = arith.addf %276, %277 : vector<8x32xf32>
    %c48_197 = arith.constant 48 : index
    %c0_198 = arith.constant 0 : index
    %279 = vector.load %arg15[%c48_197, %c0_198] : memref<72x32xf32, #tpu.memory_space<vmem>>, vector<8x32xf32>
    %cst_199 = arith.constant dense<0.000000e+00> : vector<8x32xf32>
    %280 = tpu.matmul %272, %37, %cst_199 {dimension_numbers = #tpu.dot_dimension_numbers<[1], [0], [0], [1], [0, 0, 1, 1], [], []>} : vector<8x32xf32>, vector<32x32xf32>, vector<8x32xf32> -> vector<8x32xf32>
    %281 = arith.addf %279, %280 : vector<8x32xf32>
    %c48_200 = arith.constant 48 : index
    %c0_201 = arith.constant 0 : index
    %282 = vector.load %arg16[%c48_200, %c0_201] : memref<72x32xf32, #tpu.memory_space<vmem>>, vector<8x32xf32>
    %cst_202 = arith.constant dense<0.000000e+00> : vector<8x32xf32>
    %283 = tpu.matmul %272, %39, %cst_202 {dimension_numbers = #tpu.dot_dimension_numbers<[1], [0], [0], [1], [0, 0, 1, 1], [], []>} : vector<8x32xf32>, vector<32x32xf32>, vector<8x32xf32> -> vector<8x32xf32>
    %284 = arith.addf %282, %283 : vector<8x32xf32>
    %285 = arith.negf %275 : vector<8x32xf32>
    %286 = math.exp %285 : vector<8x32xf32>
    %cst_203 = arith.constant 1.000000e+00 : f32
    %287 = vector.broadcast %cst_203 : f32 to vector<8x32xf32>
    %288 = arith.addf %287, %286 : vector<8x32xf32>
    %289 = arith.divf %287, %288 : vector<8x32xf32>
    %290 = arith.negf %278 : vector<8x32xf32>
    %291 = math.exp %290 : vector<8x32xf32>
    %cst_204 = arith.constant 1.000000e+00 : f32
    %292 = vector.broadcast %cst_204 : f32 to vector<8x32xf32>
    %293 = arith.addf %292, %291 : vector<8x32xf32>
    %294 = arith.divf %292, %293 : vector<8x32xf32>
    %295 = math.tanh %281 : vector<8x32xf32>
    %296 = arith.negf %284 : vector<8x32xf32>
    %297 = math.exp %296 : vector<8x32xf32>
    %cst_205 = arith.constant 1.000000e+00 : f32
    %298 = vector.broadcast %cst_205 : f32 to vector<8x32xf32>
    %299 = arith.addf %298, %297 : vector<8x32xf32>
    %300 = arith.divf %298, %299 : vector<8x32xf32>
    %c0_206 = arith.constant 0 : index
    %c0_207 = arith.constant 0 : index
    %301 = vector.load %arg19[%c0_206, %c0_207] : memref<8x32xf32, #tpu.memory_space<vmem>>, vector<8x32xf32>
    %302 = arith.mulf %294, %301 : vector<8x32xf32>
    %303 = arith.mulf %289, %295 : vector<8x32xf32>
    %304 = arith.addf %302, %303 : vector<8x32xf32>
    %305 = math.tanh %304 : vector<8x32xf32>
    %306 = arith.mulf %300, %305 : vector<8x32xf32>
    %c0_208 = arith.constant 0 : index
    %c0_209 = arith.constant 0 : index
    %307 = vector.load %arg19[%c0_208, %c0_209] : memref<8x32xf32, #tpu.memory_space<vmem>>, vector<8x32xf32>
    tpu.vector_store %arg19[%c0_208, %c0_209], %304 {strides = array<i32>} : memref<8x32xf32, #tpu.memory_space<vmem>>, vector<8x32xf32>,
    %c0_210 = arith.constant 0 : index
    %c0_211 = arith.constant 0 : index
    %308 = vector.load %arg18[%c0_210, %c0_211] : memref<8x32xf32, #tpu.memory_space<vmem>>, vector<8x32xf32>
    tpu.vector_store %arg18[%c0_210, %c0_211], %306 {strides = array<i32>} : memref<8x32xf32, #tpu.memory_space<vmem>>, vector<8x32xf32>,
    %c48_212 = arith.constant 48 : index
    %c0_213 = arith.constant 0 : index
    %309 = vector.load %arg17[%c48_212, %c0_213] : memref<72x32xf32, #tpu.memory_space<vmem>>, vector<8x32xf32>
    tpu.vector_store %arg17[%c48_212, %c0_213], %306 {strides = array<i32>} : memref<72x32xf32, #tpu.memory_space<vmem>>, vector<8x32xf32>,
    %c0_214 = arith.constant 0 : index
    %c0_215 = arith.constant 0 : index
    %310 = vector.load %arg18[%c0_214, %c0_215] : memref<8x32xf32, #tpu.memory_space<vmem>>, vector<8x32xf32>
    %c56 = arith.constant 56 : index
    %c0_216 = arith.constant 0 : index
    %311 = vector.load %arg13[%c56, %c0_216] : memref<72x32xf32, #tpu.memory_space<vmem>>, vector<8x32xf32>
    %cst_217 = arith.constant dense<0.000000e+00> : vector<8x32xf32>
    %312 = tpu.matmul %310, %33, %cst_217 {dimension_numbers = #tpu.dot_dimension_numbers<[1], [0], [0], [1], [0, 0, 1, 1], [], []>} : vector<8x32xf32>, vector<32x32xf32>, vector<8x32xf32> -> vector<8x32xf32>
    %313 = arith.addf %311, %312 : vector<8x32xf32>
    %c56_218 = arith.constant 56 : index
    %c0_219 = arith.constant 0 : index
    %314 = vector.load %arg14[%c56_218, %c0_219] : memref<72x32xf32, #tpu.memory_space<vmem>>, vector<8x32xf32>
    %cst_220 = arith.constant dense<0.000000e+00> : vector<8x32xf32>
    %315 = tpu.matmul %310, %35, %cst_220 {dimension_numbers = #tpu.dot_dimension_numbers<[1], [0], [0], [1], [0, 0, 1, 1], [], []>} : vector<8x32xf32>, vector<32x32xf32>, vector<8x32xf32> -> vector<8x32xf32>
    %316 = arith.addf %314, %315 : vector<8x32xf32>
    %c56_221 = arith.constant 56 : index
    %c0_222 = arith.constant 0 : index
    %317 = vector.load %arg15[%c56_221, %c0_222] : memref<72x32xf32, #tpu.memory_space<vmem>>, vector<8x32xf32>
    %cst_223 = arith.constant dense<0.000000e+00> : vector<8x32xf32>
    %318 = tpu.matmul %310, %37, %cst_223 {dimension_numbers = #tpu.dot_dimension_numbers<[1], [0], [0], [1], [0, 0, 1, 1], [], []>} : vector<8x32xf32>, vector<32x32xf32>, vector<8x32xf32> -> vector<8x32xf32>
    %319 = arith.addf %317, %318 : vector<8x32xf32>
    %c56_224 = arith.constant 56 : index
    %c0_225 = arith.constant 0 : index
    %320 = vector.load %arg16[%c56_224, %c0_225] : memref<72x32xf32, #tpu.memory_space<vmem>>, vector<8x32xf32>
    %cst_226 = arith.constant dense<0.000000e+00> : vector<8x32xf32>
    %321 = tpu.matmul %310, %39, %cst_226 {dimension_numbers = #tpu.dot_dimension_numbers<[1], [0], [0], [1], [0, 0, 1, 1], [], []>} : vector<8x32xf32>, vector<32x32xf32>, vector<8x32xf32> -> vector<8x32xf32>
    %322 = arith.addf %320, %321 : vector<8x32xf32>
    %323 = arith.negf %313 : vector<8x32xf32>
    %324 = math.exp %323 : vector<8x32xf32>
    %cst_227 = arith.constant 1.000000e+00 : f32
    %325 = vector.broadcast %cst_227 : f32 to vector<8x32xf32>
    %326 = arith.addf %325, %324 : vector<8x32xf32>
    %327 = arith.divf %325, %326 : vector<8x32xf32>
    %328 = arith.negf %316 : vector<8x32xf32>
    %329 = math.exp %328 : vector<8x32xf32>
    %cst_228 = arith.constant 1.000000e+00 : f32
    %330 = vector.broadcast %cst_228 : f32 to vector<8x32xf32>
    %331 = arith.addf %330, %329 : vector<8x32xf32>
    %332 = arith.divf %330, %331 : vector<8x32xf32>
    %333 = math.tanh %319 : vector<8x32xf32>
    %334 = arith.negf %322 : vector<8x32xf32>
    %335 = math.exp %334 : vector<8x32xf32>
    %cst_229 = arith.constant 1.000000e+00 : f32
    %336 = vector.broadcast %cst_229 : f32 to vector<8x32xf32>
    %337 = arith.addf %336, %335 : vector<8x32xf32>
    %338 = arith.divf %336, %337 : vector<8x32xf32>
    %c0_230 = arith.constant 0 : index
    %c0_231 = arith.constant 0 : index
    %339 = vector.load %arg19[%c0_230, %c0_231] : memref<8x32xf32, #tpu.memory_space<vmem>>, vector<8x32xf32>
    %340 = arith.mulf %332, %339 : vector<8x32xf32>
    %341 = arith.mulf %327, %333 : vector<8x32xf32>
    %342 = arith.addf %340, %341 : vector<8x32xf32>
    %343 = math.tanh %342 : vector<8x32xf32>
    %344 = arith.mulf %338, %343 : vector<8x32xf32>
    %c0_232 = arith.constant 0 : index
    %c0_233 = arith.constant 0 : index
    %345 = vector.load %arg19[%c0_232, %c0_233] : memref<8x32xf32, #tpu.memory_space<vmem>>, vector<8x32xf32>
    tpu.vector_store %arg19[%c0_232, %c0_233], %342 {strides = array<i32>} : memref<8x32xf32, #tpu.memory_space<vmem>>, vector<8x32xf32>,
    %c0_234 = arith.constant 0 : index
    %c0_235 = arith.constant 0 : index
    %346 = vector.load %arg18[%c0_234, %c0_235] : memref<8x32xf32, #tpu.memory_space<vmem>>, vector<8x32xf32>
    tpu.vector_store %arg18[%c0_234, %c0_235], %344 {strides = array<i32>} : memref<8x32xf32, #tpu.memory_space<vmem>>, vector<8x32xf32>,
    %c56_236 = arith.constant 56 : index
    %c0_237 = arith.constant 0 : index
    %347 = vector.load %arg17[%c56_236, %c0_237] : memref<72x32xf32, #tpu.memory_space<vmem>>, vector<8x32xf32>
    tpu.vector_store %arg17[%c56_236, %c0_237], %344 {strides = array<i32>} : memref<72x32xf32, #tpu.memory_space<vmem>>, vector<8x32xf32>,
    %c0_238 = arith.constant 0 : index
    %c0_239 = arith.constant 0 : index
    %348 = vector.load %arg18[%c0_238, %c0_239] : memref<8x32xf32, #tpu.memory_space<vmem>>, vector<8x32xf32>
    %c64 = arith.constant 64 : index
    %c0_240 = arith.constant 0 : index
    %349 = vector.load %arg13[%c64, %c0_240] : memref<72x32xf32, #tpu.memory_space<vmem>>, vector<8x32xf32>
    %cst_241 = arith.constant dense<0.000000e+00> : vector<8x32xf32>
    %350 = tpu.matmul %348, %33, %cst_241 {dimension_numbers = #tpu.dot_dimension_numbers<[1], [0], [0], [1], [0, 0, 1, 1], [], []>} : vector<8x32xf32>, vector<32x32xf32>, vector<8x32xf32> -> vector<8x32xf32>
    %351 = arith.addf %349, %350 : vector<8x32xf32>
    %c64_242 = arith.constant 64 : index
    %c0_243 = arith.constant 0 : index
    %352 = vector.load %arg14[%c64_242, %c0_243] : memref<72x32xf32, #tpu.memory_space<vmem>>, vector<8x32xf32>
    %cst_244 = arith.constant dense<0.000000e+00> : vector<8x32xf32>
    %353 = tpu.matmul %348, %35, %cst_244 {dimension_numbers = #tpu.dot_dimension_numbers<[1], [0], [0], [1], [0, 0, 1, 1], [], []>} : vector<8x32xf32>, vector<32x32xf32>, vector<8x32xf32> -> vector<8x32xf32>
    %354 = arith.addf %352, %353 : vector<8x32xf32>
    %c64_245 = arith.constant 64 : index
    %c0_246 = arith.constant 0 : index
    %355 = vector.load %arg15[%c64_245, %c0_246] : memref<72x32xf32, #tpu.memory_space<vmem>>, vector<8x32xf32>
    %cst_247 = arith.constant dense<0.000000e+00> : vector<8x32xf32>
    %356 = tpu.matmul %348, %37, %cst_247 {dimension_numbers = #tpu.dot_dimension_numbers<[1], [0], [0], [1], [0, 0, 1, 1], [], []>} : vector<8x32xf32>, vector<32x32xf32>, vector<8x32xf32> -> vector<8x32xf32>
    %357 = arith.addf %355, %356 : vector<8x32xf32>
    %c64_248 = arith.constant 64 : index
    %c0_249 = arith.constant 0 : index
    %358 = vector.load %arg16[%c64_248, %c0_249] : memref<72x32xf32, #tpu.memory_space<vmem>>, vector<8x32xf32>
    %cst_250 = arith.constant dense<0.000000e+00> : vector<8x32xf32>
    %359 = tpu.matmul %348, %39, %cst_250 {dimension_numbers = #tpu.dot_dimension_numbers<[1], [0], [0], [1], [0, 0, 1, 1], [], []>} : vector<8x32xf32>, vector<32x32xf32>, vector<8x32xf32> -> vector<8x32xf32>
    %360 = arith.addf %358, %359 : vector<8x32xf32>
    %361 = arith.negf %351 : vector<8x32xf32>
    %362 = math.exp %361 : vector<8x32xf32>
    %cst_251 = arith.constant 1.000000e+00 : f32
    %363 = vector.broadcast %cst_251 : f32 to vector<8x32xf32>
    %364 = arith.addf %363, %362 : vector<8x32xf32>
    %365 = arith.divf %363, %364 : vector<8x32xf32>
    %366 = arith.negf %354 : vector<8x32xf32>
    %367 = math.exp %366 : vector<8x32xf32>
    %cst_252 = arith.constant 1.000000e+00 : f32
    %368 = vector.broadcast %cst_252 : f32 to vector<8x32xf32>
    %369 = arith.addf %368, %367 : vector<8x32xf32>
    %370 = arith.divf %368, %369 : vector<8x32xf32>
    %371 = math.tanh %357 : vector<8x32xf32>
    %372 = arith.negf %360 : vector<8x32xf32>
    %373 = math.exp %372 : vector<8x32xf32>
    %cst_253 = arith.constant 1.000000e+00 : f32
    %374 = vector.broadcast %cst_253 : f32 to vector<8x32xf32>
    %375 = arith.addf %374, %373 : vector<8x32xf32>
    %376 = arith.divf %374, %375 : vector<8x32xf32>
    %c0_254 = arith.constant 0 : index
    %c0_255 = arith.constant 0 : index
    %377 = vector.load %arg19[%c0_254, %c0_255] : memref<8x32xf32, #tpu.memory_space<vmem>>, vector<8x32xf32>
    %378 = arith.mulf %370, %377 : vector<8x32xf32>
    %379 = arith.mulf %365, %371 : vector<8x32xf32>
    %380 = arith.addf %378, %379 : vector<8x32xf32>
    %381 = math.tanh %380 : vector<8x32xf32>
    %382 = arith.mulf %376, %381 : vector<8x32xf32>
    %c0_256 = arith.constant 0 : index
    %c0_257 = arith.constant 0 : index
    %383 = vector.load %arg19[%c0_256, %c0_257] : memref<8x32xf32, #tpu.memory_space<vmem>>, vector<8x32xf32>
    tpu.vector_store %arg19[%c0_256, %c0_257], %380 {strides = array<i32>} : memref<8x32xf32, #tpu.memory_space<vmem>>, vector<8x32xf32>,
    %c0_258 = arith.constant 0 : index
    %c0_259 = arith.constant 0 : index
    %384 = vector.load %arg18[%c0_258, %c0_259] : memref<8x32xf32, #tpu.memory_space<vmem>>, vector<8x32xf32>
    tpu.vector_store %arg18[%c0_258, %c0_259], %382 {strides = array<i32>} : memref<8x32xf32, #tpu.memory_space<vmem>>, vector<8x32xf32>,
    %c64_260 = arith.constant 64 : index
    %c0_261 = arith.constant 0 : index
    %385 = vector.load %arg17[%c64_260, %c0_261] : memref<72x32xf32, #tpu.memory_space<vmem>>, vector<8x32xf32>
    tpu.vector_store %arg17[%c64_260, %c0_261], %382 {strides = array<i32>} : memref<72x32xf32, #tpu.memory_space<vmem>>, vector<8x32xf32>,
    %c0_262 = arith.constant 0 : index
    %c0_263 = arith.constant 0 : index
    %386 = vector.load %arg17[%c0_262, %c0_263] : memref<72x32xf32, #tpu.memory_space<vmem>>, vector<72x32xf32>
    %c0_264 = arith.constant 0 : index
    %c0_265 = arith.constant 0 : index
    %387 = vector.load %arg8[%c0_264, %c0_265] : memref<32x128xf32, #tpu.memory_space<vmem>>, vector<32x128xf32>
    %cst_266 = arith.constant dense<0.000000e+00> : vector<72x128xf32>
    %388 = tpu.matmul %386, %387, %cst_266 {dimension_numbers = #tpu.dot_dimension_numbers<[1], [0], [0], [1], [0, 0, 1, 1], [], []>} : vector<72x32xf32>, vector<32x128xf32>, vector<72x128xf32> -> vector<72x128xf32>
    %c0_267 = arith.constant 0 : index
    %c0_268 = arith.constant 0 : index
    %389 = vector.load %arg10[%c0_267, %c0_268] : memref<1x128xf32, #tpu.memory_space<vmem>>, vector<1x128xf32>
    %390 = vector.broadcast %389 : vector<1x128xf32> to vector<72x128xf32>
    %391 = arith.addf %388, %390 : vector<72x128xf32>
    %392 = vector.extract_strided_slice %391 {offsets = [0, 0], sizes = [72, 32], strides = [1, 1]} : vector<72x128xf32> to vector<72x32xf32>
    %c0_269 = arith.constant 0 : index
    %c0_270 = arith.constant 0 : index
    %393 = vector.load %arg13[%c0_269, %c0_270] : memref<72x32xf32, #tpu.memory_space<vmem>>, vector<72x32xf32>
    tpu.vector_store %arg13[%c0_269, %c0_270], %392 {strides = array<i32>} : memref<72x32xf32, #tpu.memory_space<vmem>>, vector<72x32xf32>,
    %394 = vector.extract_strided_slice %391 {offsets = [0, 32], sizes = [72, 32], strides = [1, 1]} : vector<72x128xf32> to vector<72x32xf32>
    %c0_271 = arith.constant 0 : index
    %c0_272 = arith.constant 0 : index
    %395 = vector.load %arg14[%c0_271, %c0_272] : memref<72x32xf32, #tpu.memory_space<vmem>>, vector<72x32xf32>
    tpu.vector_store %arg14[%c0_271, %c0_272], %394 {strides = array<i32>} : memref<72x32xf32, #tpu.memory_space<vmem>>, vector<72x32xf32>,
    %396 = vector.extract_strided_slice %391 {offsets = [0, 64], sizes = [72, 32], strides = [1, 1]} : vector<72x128xf32> to vector<72x32xf32>
    %c0_273 = arith.constant 0 : index
    %c0_274 = arith.constant 0 : index
    %397 = vector.load %arg15[%c0_273, %c0_274] : memref<72x32xf32, #tpu.memory_space<vmem>>, vector<72x32xf32>
    tpu.vector_store %arg15[%c0_273, %c0_274], %396 {strides = array<i32>} : memref<72x32xf32, #tpu.memory_space<vmem>>, vector<72x32xf32>,
    %398 = vector.extract_strided_slice %391 {offsets = [0, 96], sizes = [72, 32], strides = [1, 1]} : vector<72x128xf32> to vector<72x32xf32>
    %c0_275 = arith.constant 0 : index
    %c0_276 = arith.constant 0 : index
    %399 = vector.load %arg16[%c0_275, %c0_276] : memref<72x32xf32, #tpu.memory_space<vmem>>, vector<72x32xf32>
    tpu.vector_store %arg16[%c0_275, %c0_276], %398 {strides = array<i32>} : memref<72x32xf32, #tpu.memory_space<vmem>>, vector<72x32xf32>,
    %c0_277 = arith.constant 0 : index
    %c0_278 = arith.constant 0 : index
    %c0_279 = arith.constant 0 : index
    %400 = vector.load %arg9[%c0_277, %c0_278, %c0_279] : memref<4x32x32xf32, #tpu.memory_space<vmem>>, vector<1x32x32xf32>
    %401 = vector.shape_cast %400 : vector<1x32x32xf32> to vector<32x32xf32>
    %c1_280 = arith.constant 1 : index
    %c0_281 = arith.constant 0 : index
    %c0_282 = arith.constant 0 : index
    %402 = vector.load %arg9[%c1_280, %c0_281, %c0_282] : memref<4x32x32xf32, #tpu.memory_space<vmem>>, vector<1x32x32xf32>
    %403 = vector.shape_cast %402 : vector<1x32x32xf32> to vector<32x32xf32>
    %c2_283 = arith.constant 2 : index
    %c0_284 = arith.constant 0 : index
    %c0_285 = arith.constant 0 : index
    %404 = vector.load %arg9[%c2_283, %c0_284, %c0_285] : memref<4x32x32xf32, #tpu.memory_space<vmem>>, vector<1x32x32xf32>
    %405 = vector.shape_cast %404 : vector<1x32x32xf32> to vector<32x32xf32>
    %c3_286 = arith.constant 3 : index
    %c0_287 = arith.constant 0 : index
    %c0_288 = arith.constant 0 : index
    %406 = vector.load %arg9[%c3_286, %c0_287, %c0_288] : memref<4x32x32xf32, #tpu.memory_space<vmem>>, vector<1x32x32xf32>
    %407 = vector.shape_cast %406 : vector<1x32x32xf32> to vector<32x32xf32>
    %cst_289 = arith.constant 0.000000e+00 : f32
    %408 = vector.broadcast %cst_289 : f32 to vector<8x32xf32>
    %c0_290 = arith.constant 0 : index
    %c0_291 = arith.constant 0 : index
    %409 = vector.load %arg18[%c0_290, %c0_291] : memref<8x32xf32, #tpu.memory_space<vmem>>, vector<8x32xf32>
    tpu.vector_store %arg18[%c0_290, %c0_291], %408 {strides = array<i32>} : memref<8x32xf32, #tpu.memory_space<vmem>>, vector<8x32xf32>,
    %cst_292 = arith.constant 0.000000e+00 : f32
    %410 = vector.broadcast %cst_292 : f32 to vector<8x32xf32>
    %c0_293 = arith.constant 0 : index
    %c0_294 = arith.constant 0 : index
    %411 = vector.load %arg19[%c0_293, %c0_294] : memref<8x32xf32, #tpu.memory_space<vmem>>, vector<8x32xf32>
    tpu.vector_store %arg19[%c0_293, %c0_294], %410 {strides = array<i32>} : memref<8x32xf32, #tpu.memory_space<vmem>>, vector<8x32xf32>,
    %c0_295 = arith.constant 0 : index
    %c0_296 = arith.constant 0 : index
    %412 = vector.load %arg18[%c0_295, %c0_296] : memref<8x32xf32, #tpu.memory_space<vmem>>, vector<8x32xf32>
    %c0_297 = arith.constant 0 : index
    %c0_298 = arith.constant 0 : index
    %413 = vector.load %arg13[%c0_297, %c0_298] : memref<72x32xf32, #tpu.memory_space<vmem>>, vector<8x32xf32>
    %cst_299 = arith.constant dense<0.000000e+00> : vector<8x32xf32>
    %414 = tpu.matmul %412, %401, %cst_299 {dimension_numbers = #tpu.dot_dimension_numbers<[1], [0], [0], [1], [0, 0, 1, 1], [], []>} : vector<8x32xf32>, vector<32x32xf32>, vector<8x32xf32> -> vector<8x32xf32>
    %415 = arith.addf %413, %414 : vector<8x32xf32>
    %c0_300 = arith.constant 0 : index
    %c0_301 = arith.constant 0 : index
    %416 = vector.load %arg14[%c0_300, %c0_301] : memref<72x32xf32, #tpu.memory_space<vmem>>, vector<8x32xf32>
    %cst_302 = arith.constant dense<0.000000e+00> : vector<8x32xf32>
    %417 = tpu.matmul %412, %403, %cst_302 {dimension_numbers = #tpu.dot_dimension_numbers<[1], [0], [0], [1], [0, 0, 1, 1], [], []>} : vector<8x32xf32>, vector<32x32xf32>, vector<8x32xf32> -> vector<8x32xf32>
    %418 = arith.addf %416, %417 : vector<8x32xf32>
    %c0_303 = arith.constant 0 : index
    %c0_304 = arith.constant 0 : index
    %419 = vector.load %arg15[%c0_303, %c0_304] : memref<72x32xf32, #tpu.memory_space<vmem>>, vector<8x32xf32>
    %cst_305 = arith.constant dense<0.000000e+00> : vector<8x32xf32>
    %420 = tpu.matmul %412, %405, %cst_305 {dimension_numbers = #tpu.dot_dimension_numbers<[1], [0], [0], [1], [0, 0, 1, 1], [], []>} : vector<8x32xf32>, vector<32x32xf32>, vector<8x32xf32> -> vector<8x32xf32>
    %421 = arith.addf %419, %420 : vector<8x32xf32>
    %c0_306 = arith.constant 0 : index
    %c0_307 = arith.constant 0 : index
    %422 = vector.load %arg16[%c0_306, %c0_307] : memref<72x32xf32, #tpu.memory_space<vmem>>, vector<8x32xf32>
    %cst_308 = arith.constant dense<0.000000e+00> : vector<8x32xf32>
    %423 = tpu.matmul %412, %407, %cst_308 {dimension_numbers = #tpu.dot_dimension_numbers<[1], [0], [0], [1], [0, 0, 1, 1], [], []>} : vector<8x32xf32>, vector<32x32xf32>, vector<8x32xf32> -> vector<8x32xf32>
    %424 = arith.addf %422, %423 : vector<8x32xf32>
    %425 = arith.negf %415 : vector<8x32xf32>
    %426 = math.exp %425 : vector<8x32xf32>
    %cst_309 = arith.constant 1.000000e+00 : f32
    %427 = vector.broadcast %cst_309 : f32 to vector<8x32xf32>
    %428 = arith.addf %427, %426 : vector<8x32xf32>
    %429 = arith.divf %427, %428 : vector<8x32xf32>
    %430 = arith.negf %418 : vector<8x32xf32>
    %431 = math.exp %430 : vector<8x32xf32>
    %cst_310 = arith.constant 1.000000e+00 : f32
    %432 = vector.broadcast %cst_310 : f32 to vector<8x32xf32>
    %433 = arith.addf %432, %431 : vector<8x32xf32>
    %434 = arith.divf %432, %433 : vector<8x32xf32>
    %435 = math.tanh %421 : vector<8x32xf32>
    %436 = arith.negf %424 : vector<8x32xf32>
    %437 = math.exp %436 : vector<8x32xf32>
    %cst_311 = arith.constant 1.000000e+00 : f32
    %438 = vector.broadcast %cst_311 : f32 to vector<8x32xf32>
    %439 = arith.addf %438, %437 : vector<8x32xf32>
    %440 = arith.divf %438, %439 : vector<8x32xf32>
    %c0_312 = arith.constant 0 : index
    %c0_313 = arith.constant 0 : index
    %441 = vector.load %arg19[%c0_312, %c0_313] : memref<8x32xf32, #tpu.memory_space<vmem>>, vector<8x32xf32>
    %442 = arith.mulf %434, %441 : vector<8x32xf32>
    %443 = arith.mulf %429, %435 : vector<8x32xf32>
    %444 = arith.addf %442, %443 : vector<8x32xf32>
    %445 = math.tanh %444 : vector<8x32xf32>
    %446 = arith.mulf %440, %445 : vector<8x32xf32>
    %c0_314 = arith.constant 0 : index
    %c0_315 = arith.constant 0 : index
    %447 = vector.load %arg19[%c0_314, %c0_315] : memref<8x32xf32, #tpu.memory_space<vmem>>, vector<8x32xf32>
    tpu.vector_store %arg19[%c0_314, %c0_315], %444 {strides = array<i32>} : memref<8x32xf32, #tpu.memory_space<vmem>>, vector<8x32xf32>,
    %c0_316 = arith.constant 0 : index
    %c0_317 = arith.constant 0 : index
    %448 = vector.load %arg18[%c0_316, %c0_317] : memref<8x32xf32, #tpu.memory_space<vmem>>, vector<8x32xf32>
    tpu.vector_store %arg18[%c0_316, %c0_317], %446 {strides = array<i32>} : memref<8x32xf32, #tpu.memory_space<vmem>>, vector<8x32xf32>,
    %c0_318 = arith.constant 0 : index
    %c0_319 = arith.constant 0 : index
    %449 = vector.load %arg17[%c0_318, %c0_319] : memref<72x32xf32, #tpu.memory_space<vmem>>, vector<8x32xf32>
    tpu.vector_store %arg17[%c0_318, %c0_319], %446 {strides = array<i32>} : memref<72x32xf32, #tpu.memory_space<vmem>>, vector<8x32xf32>,
    %c0_320 = arith.constant 0 : index
    %c0_321 = arith.constant 0 : index
    %450 = vector.load %arg18[%c0_320, %c0_321] : memref<8x32xf32, #tpu.memory_space<vmem>>, vector<8x32xf32>
    %c8_322 = arith.constant 8 : index
    %c0_323 = arith.constant 0 : index
    %451 = vector.load %arg13[%c8_322, %c0_323] : memref<72x32xf32, #tpu.memory_space<vmem>>, vector<8x32xf32>
    %cst_324 = arith.constant dense<0.000000e+00> : vector<8x32xf32>
    %452 = tpu.matmul %450, %401, %cst_324 {dimension_numbers = #tpu.dot_dimension_numbers<[1], [0], [0], [1], [0, 0, 1, 1], [], []>} : vector<8x32xf32>, vector<32x32xf32>, vector<8x32xf32> -> vector<8x32xf32>
    %453 = arith.addf %451, %452 : vector<8x32xf32>
    %c8_325 = arith.constant 8 : index
    %c0_326 = arith.constant 0 : index
    %454 = vector.load %arg14[%c8_325, %c0_326] : memref<72x32xf32, #tpu.memory_space<vmem>>, vector<8x32xf32>
    %cst_327 = arith.constant dense<0.000000e+00> : vector<8x32xf32>
    %455 = tpu.matmul %450, %403, %cst_327 {dimension_numbers = #tpu.dot_dimension_numbers<[1], [0], [0], [1], [0, 0, 1, 1], [], []>} : vector<8x32xf32>, vector<32x32xf32>, vector<8x32xf32> -> vector<8x32xf32>
    %456 = arith.addf %454, %455 : vector<8x32xf32>
    %c8_328 = arith.constant 8 : index
    %c0_329 = arith.constant 0 : index
    %457 = vector.load %arg15[%c8_328, %c0_329] : memref<72x32xf32, #tpu.memory_space<vmem>>, vector<8x32xf32>
    %cst_330 = arith.constant dense<0.000000e+00> : vector<8x32xf32>
    %458 = tpu.matmul %450, %405, %cst_330 {dimension_numbers = #tpu.dot_dimension_numbers<[1], [0], [0], [1], [0, 0, 1, 1], [], []>} : vector<8x32xf32>, vector<32x32xf32>, vector<8x32xf32> -> vector<8x32xf32>
    %459 = arith.addf %457, %458 : vector<8x32xf32>
    %c8_331 = arith.constant 8 : index
    %c0_332 = arith.constant 0 : index
    %460 = vector.load %arg16[%c8_331, %c0_332] : memref<72x32xf32, #tpu.memory_space<vmem>>, vector<8x32xf32>
    %cst_333 = arith.constant dense<0.000000e+00> : vector<8x32xf32>
    %461 = tpu.matmul %450, %407, %cst_333 {dimension_numbers = #tpu.dot_dimension_numbers<[1], [0], [0], [1], [0, 0, 1, 1], [], []>} : vector<8x32xf32>, vector<32x32xf32>, vector<8x32xf32> -> vector<8x32xf32>
    %462 = arith.addf %460, %461 : vector<8x32xf32>
    %463 = arith.negf %453 : vector<8x32xf32>
    %464 = math.exp %463 : vector<8x32xf32>
    %cst_334 = arith.constant 1.000000e+00 : f32
    %465 = vector.broadcast %cst_334 : f32 to vector<8x32xf32>
    %466 = arith.addf %465, %464 : vector<8x32xf32>
    %467 = arith.divf %465, %466 : vector<8x32xf32>
    %468 = arith.negf %456 : vector<8x32xf32>
    %469 = math.exp %468 : vector<8x32xf32>
    %cst_335 = arith.constant 1.000000e+00 : f32
    %470 = vector.broadcast %cst_335 : f32 to vector<8x32xf32>
    %471 = arith.addf %470, %469 : vector<8x32xf32>
    %472 = arith.divf %470, %471 : vector<8x32xf32>
    %473 = math.tanh %459 : vector<8x32xf32>
    %474 = arith.negf %462 : vector<8x32xf32>
    %475 = math.exp %474 : vector<8x32xf32>
    %cst_336 = arith.constant 1.000000e+00 : f32
    %476 = vector.broadcast %cst_336 : f32 to vector<8x32xf32>
    %477 = arith.addf %476, %475 : vector<8x32xf32>
    %478 = arith.divf %476, %477 : vector<8x32xf32>
    %c0_337 = arith.constant 0 : index
    %c0_338 = arith.constant 0 : index
    %479 = vector.load %arg19[%c0_337, %c0_338] : memref<8x32xf32, #tpu.memory_space<vmem>>, vector<8x32xf32>
    %480 = arith.mulf %472, %479 : vector<8x32xf32>
    %481 = arith.mulf %467, %473 : vector<8x32xf32>
    %482 = arith.addf %480, %481 : vector<8x32xf32>
    %483 = math.tanh %482 : vector<8x32xf32>
    %484 = arith.mulf %478, %483 : vector<8x32xf32>
    %c0_339 = arith.constant 0 : index
    %c0_340 = arith.constant 0 : index
    %485 = vector.load %arg19[%c0_339, %c0_340] : memref<8x32xf32, #tpu.memory_space<vmem>>, vector<8x32xf32>
    tpu.vector_store %arg19[%c0_339, %c0_340], %482 {strides = array<i32>} : memref<8x32xf32, #tpu.memory_space<vmem>>, vector<8x32xf32>,
    %c0_341 = arith.constant 0 : index
    %c0_342 = arith.constant 0 : index
    %486 = vector.load %arg18[%c0_341, %c0_342] : memref<8x32xf32, #tpu.memory_space<vmem>>, vector<8x32xf32>
    tpu.vector_store %arg18[%c0_341, %c0_342], %484 {strides = array<i32>} : memref<8x32xf32, #tpu.memory_space<vmem>>, vector<8x32xf32>,
    %c8_343 = arith.constant 8 : index
    %c0_344 = arith.constant 0 : index
    %487 = vector.load %arg17[%c8_343, %c0_344] : memref<72x32xf32, #tpu.memory_space<vmem>>, vector<8x32xf32>
    tpu.vector_store %arg17[%c8_343, %c0_344], %484 {strides = array<i32>} : memref<72x32xf32, #tpu.memory_space<vmem>>, vector<8x32xf32>,
    %c0_345 = arith.constant 0 : index
    %c0_346 = arith.constant 0 : index
    %488 = vector.load %arg18[%c0_345, %c0_346] : memref<8x32xf32, #tpu.memory_space<vmem>>, vector<8x32xf32>
    %c16_347 = arith.constant 16 : index
    %c0_348 = arith.constant 0 : index
    %489 = vector.load %arg13[%c16_347, %c0_348] : memref<72x32xf32, #tpu.memory_space<vmem>>, vector<8x32xf32>
    %cst_349 = arith.constant dense<0.000000e+00> : vector<8x32xf32>
    %490 = tpu.matmul %488, %401, %cst_349 {dimension_numbers = #tpu.dot_dimension_numbers<[1], [0], [0], [1], [0, 0, 1, 1], [], []>} : vector<8x32xf32>, vector<32x32xf32>, vector<8x32xf32> -> vector<8x32xf32>
    %491 = arith.addf %489, %490 : vector<8x32xf32>
    %c16_350 = arith.constant 16 : index
    %c0_351 = arith.constant 0 : index
    %492 = vector.load %arg14[%c16_350, %c0_351] : memref<72x32xf32, #tpu.memory_space<vmem>>, vector<8x32xf32>
    %cst_352 = arith.constant dense<0.000000e+00> : vector<8x32xf32>
    %493 = tpu.matmul %488, %403, %cst_352 {dimension_numbers = #tpu.dot_dimension_numbers<[1], [0], [0], [1], [0, 0, 1, 1], [], []>} : vector<8x32xf32>, vector<32x32xf32>, vector<8x32xf32> -> vector<8x32xf32>
    %494 = arith.addf %492, %493 : vector<8x32xf32>
    %c16_353 = arith.constant 16 : index
    %c0_354 = arith.constant 0 : index
    %495 = vector.load %arg15[%c16_353, %c0_354] : memref<72x32xf32, #tpu.memory_space<vmem>>, vector<8x32xf32>
    %cst_355 = arith.constant dense<0.000000e+00> : vector<8x32xf32>
    %496 = tpu.matmul %488, %405, %cst_355 {dimension_numbers = #tpu.dot_dimension_numbers<[1], [0], [0], [1], [0, 0, 1, 1], [], []>} : vector<8x32xf32>, vector<32x32xf32>, vector<8x32xf32> -> vector<8x32xf32>
    %497 = arith.addf %495, %496 : vector<8x32xf32>
    %c16_356 = arith.constant 16 : index
    %c0_357 = arith.constant 0 : index
    %498 = vector.load %arg16[%c16_356, %c0_357] : memref<72x32xf32, #tpu.memory_space<vmem>>, vector<8x32xf32>
    %cst_358 = arith.constant dense<0.000000e+00> : vector<8x32xf32>
    %499 = tpu.matmul %488, %407, %cst_358 {dimension_numbers = #tpu.dot_dimension_numbers<[1], [0], [0], [1], [0, 0, 1, 1], [], []>} : vector<8x32xf32>, vector<32x32xf32>, vector<8x32xf32> -> vector<8x32xf32>
    %500 = arith.addf %498, %499 : vector<8x32xf32>
    %501 = arith.negf %491 : vector<8x32xf32>
    %502 = math.exp %501 : vector<8x32xf32>
    %cst_359 = arith.constant 1.000000e+00 : f32
    %503 = vector.broadcast %cst_359 : f32 to vector<8x32xf32>
    %504 = arith.addf %503, %502 : vector<8x32xf32>
    %505 = arith.divf %503, %504 : vector<8x32xf32>
    %506 = arith.negf %494 : vector<8x32xf32>
    %507 = math.exp %506 : vector<8x32xf32>
    %cst_360 = arith.constant 1.000000e+00 : f32
    %508 = vector.broadcast %cst_360 : f32 to vector<8x32xf32>
    %509 = arith.addf %508, %507 : vector<8x32xf32>
    %510 = arith.divf %508, %509 : vector<8x32xf32>
    %511 = math.tanh %497 : vector<8x32xf32>
    %512 = arith.negf %500 : vector<8x32xf32>
    %513 = math.exp %512 : vector<8x32xf32>
    %cst_361 = arith.constant 1.000000e+00 : f32
    %514 = vector.broadcast %cst_361 : f32 to vector<8x32xf32>
    %515 = arith.addf %514, %513 : vector<8x32xf32>
    %516 = arith.divf %514, %515 : vector<8x32xf32>
    %c0_362 = arith.constant 0 : index
    %c0_363 = arith.constant 0 : index
    %517 = vector.load %arg19[%c0_362, %c0_363] : memref<8x32xf32, #tpu.memory_space<vmem>>, vector<8x32xf32>
    %518 = arith.mulf %510, %517 : vector<8x32xf32>
    %519 = arith.mulf %505, %511 : vector<8x32xf32>
    %520 = arith.addf %518, %519 : vector<8x32xf32>
    %521 = math.tanh %520 : vector<8x32xf32>
    %522 = arith.mulf %516, %521 : vector<8x32xf32>
    %c0_364 = arith.constant 0 : index
    %c0_365 = arith.constant 0 : index
    %523 = vector.load %arg19[%c0_364, %c0_365] : memref<8x32xf32, #tpu.memory_space<vmem>>, vector<8x32xf32>
    tpu.vector_store %arg19[%c0_364, %c0_365], %520 {strides = array<i32>} : memref<8x32xf32, #tpu.memory_space<vmem>>, vector<8x32xf32>,
    %c0_366 = arith.constant 0 : index
    %c0_367 = arith.constant 0 : index
    %524 = vector.load %arg18[%c0_366, %c0_367] : memref<8x32xf32, #tpu.memory_space<vmem>>, vector<8x32xf32>
    tpu.vector_store %arg18[%c0_366, %c0_367], %522 {strides = array<i32>} : memref<8x32xf32, #tpu.memory_space<vmem>>, vector<8x32xf32>,
    %c16_368 = arith.constant 16 : index
    %c0_369 = arith.constant 0 : index
    %525 = vector.load %arg17[%c16_368, %c0_369] : memref<72x32xf32, #tpu.memory_space<vmem>>, vector<8x32xf32>
    tpu.vector_store %arg17[%c16_368, %c0_369], %522 {strides = array<i32>} : memref<72x32xf32, #tpu.memory_space<vmem>>, vector<8x32xf32>,
    %c0_370 = arith.constant 0 : index
    %c0_371 = arith.constant 0 : index
    %526 = vector.load %arg18[%c0_370, %c0_371] : memref<8x32xf32, #tpu.memory_space<vmem>>, vector<8x32xf32>
    %c24_372 = arith.constant 24 : index
    %c0_373 = arith.constant 0 : index
    %527 = vector.load %arg13[%c24_372, %c0_373] : memref<72x32xf32, #tpu.memory_space<vmem>>, vector<8x32xf32>
    %cst_374 = arith.constant dense<0.000000e+00> : vector<8x32xf32>
    %528 = tpu.matmul %526, %401, %cst_374 {dimension_numbers = #tpu.dot_dimension_numbers<[1], [0], [0], [1], [0, 0, 1, 1], [], []>} : vector<8x32xf32>, vector<32x32xf32>, vector<8x32xf32> -> vector<8x32xf32>
    %529 = arith.addf %527, %528 : vector<8x32xf32>
    %c24_375 = arith.constant 24 : index
    %c0_376 = arith.constant 0 : index
    %530 = vector.load %arg14[%c24_375, %c0_376] : memref<72x32xf32, #tpu.memory_space<vmem>>, vector<8x32xf32>
    %cst_377 = arith.constant dense<0.000000e+00> : vector<8x32xf32>
    %531 = tpu.matmul %526, %403, %cst_377 {dimension_numbers = #tpu.dot_dimension_numbers<[1], [0], [0], [1], [0, 0, 1, 1], [], []>} : vector<8x32xf32>, vector<32x32xf32>, vector<8x32xf32> -> vector<8x32xf32>
    %532 = arith.addf %530, %531 : vector<8x32xf32>
    %c24_378 = arith.constant 24 : index
    %c0_379 = arith.constant 0 : index
    %533 = vector.load %arg15[%c24_378, %c0_379] : memref<72x32xf32, #tpu.memory_space<vmem>>, vector<8x32xf32>
    %cst_380 = arith.constant dense<0.000000e+00> : vector<8x32xf32>
    %534 = tpu.matmul %526, %405, %cst_380 {dimension_numbers = #tpu.dot_dimension_numbers<[1], [0], [0], [1], [0, 0, 1, 1], [], []>} : vector<8x32xf32>, vector<32x32xf32>, vector<8x32xf32> -> vector<8x32xf32>
    %535 = arith.addf %533, %534 : vector<8x32xf32>
    %c24_381 = arith.constant 24 : index
    %c0_382 = arith.constant 0 : index
    %536 = vector.load %arg16[%c24_381, %c0_382] : memref<72x32xf32, #tpu.memory_space<vmem>>, vector<8x32xf32>
    %cst_383 = arith.constant dense<0.000000e+00> : vector<8x32xf32>
    %537 = tpu.matmul %526, %407, %cst_383 {dimension_numbers = #tpu.dot_dimension_numbers<[1], [0], [0], [1], [0, 0, 1, 1], [], []>} : vector<8x32xf32>, vector<32x32xf32>, vector<8x32xf32> -> vector<8x32xf32>
    %538 = arith.addf %536, %537 : vector<8x32xf32>
    %539 = arith.negf %529 : vector<8x32xf32>
    %540 = math.exp %539 : vector<8x32xf32>
    %cst_384 = arith.constant 1.000000e+00 : f32
    %541 = vector.broadcast %cst_384 : f32 to vector<8x32xf32>
    %542 = arith.addf %541, %540 : vector<8x32xf32>
    %543 = arith.divf %541, %542 : vector<8x32xf32>
    %544 = arith.negf %532 : vector<8x32xf32>
    %545 = math.exp %544 : vector<8x32xf32>
    %cst_385 = arith.constant 1.000000e+00 : f32
    %546 = vector.broadcast %cst_385 : f32 to vector<8x32xf32>
    %547 = arith.addf %546, %545 : vector<8x32xf32>
    %548 = arith.divf %546, %547 : vector<8x32xf32>
    %549 = math.tanh %535 : vector<8x32xf32>
    %550 = arith.negf %538 : vector<8x32xf32>
    %551 = math.exp %550 : vector<8x32xf32>
    %cst_386 = arith.constant 1.000000e+00 : f32
    %552 = vector.broadcast %cst_386 : f32 to vector<8x32xf32>
    %553 = arith.addf %552, %551 : vector<8x32xf32>
    %554 = arith.divf %552, %553 : vector<8x32xf32>
    %c0_387 = arith.constant 0 : index
    %c0_388 = arith.constant 0 : index
    %555 = vector.load %arg19[%c0_387, %c0_388] : memref<8x32xf32, #tpu.memory_space<vmem>>, vector<8x32xf32>
    %556 = arith.mulf %548, %555 : vector<8x32xf32>
    %557 = arith.mulf %543, %549 : vector<8x32xf32>
    %558 = arith.addf %556, %557 : vector<8x32xf32>
    %559 = math.tanh %558 : vector<8x32xf32>
    %560 = arith.mulf %554, %559 : vector<8x32xf32>
    %c0_389 = arith.constant 0 : index
    %c0_390 = arith.constant 0 : index
    %561 = vector.load %arg19[%c0_389, %c0_390] : memref<8x32xf32, #tpu.memory_space<vmem>>, vector<8x32xf32>
    tpu.vector_store %arg19[%c0_389, %c0_390], %558 {strides = array<i32>} : memref<8x32xf32, #tpu.memory_space<vmem>>, vector<8x32xf32>,
    %c0_391 = arith.constant 0 : index
    %c0_392 = arith.constant 0 : index
    %562 = vector.load %arg18[%c0_391, %c0_392] : memref<8x32xf32, #tpu.memory_space<vmem>>, vector<8x32xf32>
    tpu.vector_store %arg18[%c0_391, %c0_392], %560 {strides = array<i32>} : memref<8x32xf32, #tpu.memory_space<vmem>>, vector<8x32xf32>,
    %c24_393 = arith.constant 24 : index
    %c0_394 = arith.constant 0 : index
    %563 = vector.load %arg17[%c24_393, %c0_394] : memref<72x32xf32, #tpu.memory_space<vmem>>, vector<8x32xf32>
    tpu.vector_store %arg17[%c24_393, %c0_394], %560 {strides = array<i32>} : memref<72x32xf32, #tpu.memory_space<vmem>>, vector<8x32xf32>,
    %c0_395 = arith.constant 0 : index
    %c0_396 = arith.constant 0 : index
    %564 = vector.load %arg18[%c0_395, %c0_396] : memref<8x32xf32, #tpu.memory_space<vmem>>, vector<8x32xf32>
    %c32_397 = arith.constant 32 : index
    %c0_398 = arith.constant 0 : index
    %565 = vector.load %arg13[%c32_397, %c0_398] : memref<72x32xf32, #tpu.memory_space<vmem>>, vector<8x32xf32>
    %cst_399 = arith.constant dense<0.000000e+00> : vector<8x32xf32>
    %566 = tpu.matmul %564, %401, %cst_399 {dimension_numbers = #tpu.dot_dimension_numbers<[1], [0], [0], [1], [0, 0, 1, 1], [], []>} : vector<8x32xf32>, vector<32x32xf32>, vector<8x32xf32> -> vector<8x32xf32>
    %567 = arith.addf %565, %566 : vector<8x32xf32>
    %c32_400 = arith.constant 32 : index
    %c0_401 = arith.constant 0 : index
    %568 = vector.load %arg14[%c32_400, %c0_401] : memref<72x32xf32, #tpu.memory_space<vmem>>, vector<8x32xf32>
    %cst_402 = arith.constant dense<0.000000e+00> : vector<8x32xf32>
    %569 = tpu.matmul %564, %403, %cst_402 {dimension_numbers = #tpu.dot_dimension_numbers<[1], [0], [0], [1], [0, 0, 1, 1], [], []>} : vector<8x32xf32>, vector<32x32xf32>, vector<8x32xf32> -> vector<8x32xf32>
    %570 = arith.addf %568, %569 : vector<8x32xf32>
    %c32_403 = arith.constant 32 : index
    %c0_404 = arith.constant 0 : index
    %571 = vector.load %arg15[%c32_403, %c0_404] : memref<72x32xf32, #tpu.memory_space<vmem>>, vector<8x32xf32>
    %cst_405 = arith.constant dense<0.000000e+00> : vector<8x32xf32>
    %572 = tpu.matmul %564, %405, %cst_405 {dimension_numbers = #tpu.dot_dimension_numbers<[1], [0], [0], [1], [0, 0, 1, 1], [], []>} : vector<8x32xf32>, vector<32x32xf32>, vector<8x32xf32> -> vector<8x32xf32>
    %573 = arith.addf %571, %572 : vector<8x32xf32>
    %c32_406 = arith.constant 32 : index
    %c0_407 = arith.constant 0 : index
    %574 = vector.load %arg16[%c32_406, %c0_407] : memref<72x32xf32, #tpu.memory_space<vmem>>, vector<8x32xf32>
    %cst_408 = arith.constant dense<0.000000e+00> : vector<8x32xf32>
    %575 = tpu.matmul %564, %407, %cst_408 {dimension_numbers = #tpu.dot_dimension_numbers<[1], [0], [0], [1], [0, 0, 1, 1], [], []>} : vector<8x32xf32>, vector<32x32xf32>, vector<8x32xf32> -> vector<8x32xf32>
    %576 = arith.addf %574, %575 : vector<8x32xf32>
    %577 = arith.negf %567 : vector<8x32xf32>
    %578 = math.exp %577 : vector<8x32xf32>
    %cst_409 = arith.constant 1.000000e+00 : f32
    %579 = vector.broadcast %cst_409 : f32 to vector<8x32xf32>
    %580 = arith.addf %579, %578 : vector<8x32xf32>
    %581 = arith.divf %579, %580 : vector<8x32xf32>
    %582 = arith.negf %570 : vector<8x32xf32>
    %583 = math.exp %582 : vector<8x32xf32>
    %cst_410 = arith.constant 1.000000e+00 : f32
    %584 = vector.broadcast %cst_410 : f32 to vector<8x32xf32>
    %585 = arith.addf %584, %583 : vector<8x32xf32>
    %586 = arith.divf %584, %585 : vector<8x32xf32>
    %587 = math.tanh %573 : vector<8x32xf32>
    %588 = arith.negf %576 : vector<8x32xf32>
    %589 = math.exp %588 : vector<8x32xf32>
    %cst_411 = arith.constant 1.000000e+00 : f32
    %590 = vector.broadcast %cst_411 : f32 to vector<8x32xf32>
    %591 = arith.addf %590, %589 : vector<8x32xf32>
    %592 = arith.divf %590, %591 : vector<8x32xf32>
    %c0_412 = arith.constant 0 : index
    %c0_413 = arith.constant 0 : index
    %593 = vector.load %arg19[%c0_412, %c0_413] : memref<8x32xf32, #tpu.memory_space<vmem>>, vector<8x32xf32>
    %594 = arith.mulf %586, %593 : vector<8x32xf32>
    %595 = arith.mulf %581, %587 : vector<8x32xf32>
    %596 = arith.addf %594, %595 : vector<8x32xf32>
    %597 = math.tanh %596 : vector<8x32xf32>
    %598 = arith.mulf %592, %597 : vector<8x32xf32>
    %c0_414 = arith.constant 0 : index
    %c0_415 = arith.constant 0 : index
    %599 = vector.load %arg19[%c0_414, %c0_415] : memref<8x32xf32, #tpu.memory_space<vmem>>, vector<8x32xf32>
    tpu.vector_store %arg19[%c0_414, %c0_415], %596 {strides = array<i32>} : memref<8x32xf32, #tpu.memory_space<vmem>>, vector<8x32xf32>,
    %c0_416 = arith.constant 0 : index
    %c0_417 = arith.constant 0 : index
    %600 = vector.load %arg18[%c0_416, %c0_417] : memref<8x32xf32, #tpu.memory_space<vmem>>, vector<8x32xf32>
    tpu.vector_store %arg18[%c0_416, %c0_417], %598 {strides = array<i32>} : memref<8x32xf32, #tpu.memory_space<vmem>>, vector<8x32xf32>,
    %c32_418 = arith.constant 32 : index
    %c0_419 = arith.constant 0 : index
    %601 = vector.load %arg17[%c32_418, %c0_419] : memref<72x32xf32, #tpu.memory_space<vmem>>, vector<8x32xf32>
    tpu.vector_store %arg17[%c32_418, %c0_419], %598 {strides = array<i32>} : memref<72x32xf32, #tpu.memory_space<vmem>>, vector<8x32xf32>,
    %c0_420 = arith.constant 0 : index
    %c0_421 = arith.constant 0 : index
    %602 = vector.load %arg18[%c0_420, %c0_421] : memref<8x32xf32, #tpu.memory_space<vmem>>, vector<8x32xf32>
    %c40_422 = arith.constant 40 : index
    %c0_423 = arith.constant 0 : index
    %603 = vector.load %arg13[%c40_422, %c0_423] : memref<72x32xf32, #tpu.memory_space<vmem>>, vector<8x32xf32>
    %cst_424 = arith.constant dense<0.000000e+00> : vector<8x32xf32>
    %604 = tpu.matmul %602, %401, %cst_424 {dimension_numbers = #tpu.dot_dimension_numbers<[1], [0], [0], [1], [0, 0, 1, 1], [], []>} : vector<8x32xf32>, vector<32x32xf32>, vector<8x32xf32> -> vector<8x32xf32>
    %605 = arith.addf %603, %604 : vector<8x32xf32>
    %c40_425 = arith.constant 40 : index
    %c0_426 = arith.constant 0 : index
    %606 = vector.load %arg14[%c40_425, %c0_426] : memref<72x32xf32, #tpu.memory_space<vmem>>, vector<8x32xf32>
    %cst_427 = arith.constant dense<0.000000e+00> : vector<8x32xf32>
    %607 = tpu.matmul %602, %403, %cst_427 {dimension_numbers = #tpu.dot_dimension_numbers<[1], [0], [0], [1], [0, 0, 1, 1], [], []>} : vector<8x32xf32>, vector<32x32xf32>, vector<8x32xf32> -> vector<8x32xf32>
    %608 = arith.addf %606, %607 : vector<8x32xf32>
    %c40_428 = arith.constant 40 : index
    %c0_429 = arith.constant 0 : index
    %609 = vector.load %arg15[%c40_428, %c0_429] : memref<72x32xf32, #tpu.memory_space<vmem>>, vector<8x32xf32>
    %cst_430 = arith.constant dense<0.000000e+00> : vector<8x32xf32>
    %610 = tpu.matmul %602, %405, %cst_430 {dimension_numbers = #tpu.dot_dimension_numbers<[1], [0], [0], [1], [0, 0, 1, 1], [], []>} : vector<8x32xf32>, vector<32x32xf32>, vector<8x32xf32> -> vector<8x32xf32>
    %611 = arith.addf %609, %610 : vector<8x32xf32>
    %c40_431 = arith.constant 40 : index
    %c0_432 = arith.constant 0 : index
    %612 = vector.load %arg16[%c40_431, %c0_432] : memref<72x32xf32, #tpu.memory_space<vmem>>, vector<8x32xf32>
    %cst_433 = arith.constant dense<0.000000e+00> : vector<8x32xf32>
    %613 = tpu.matmul %602, %407, %cst_433 {dimension_numbers = #tpu.dot_dimension_numbers<[1], [0], [0], [1], [0, 0, 1, 1], [], []>} : vector<8x32xf32>, vector<32x32xf32>, vector<8x32xf32> -> vector<8x32xf32>
    %614 = arith.addf %612, %613 : vector<8x32xf32>
    %615 = arith.negf %605 : vector<8x32xf32>
    %616 = math.exp %615 : vector<8x32xf32>
    %cst_434 = arith.constant 1.000000e+00 : f32
    %617 = vector.broadcast %cst_434 : f32 to vector<8x32xf32>
    %618 = arith.addf %617, %616 : vector<8x32xf32>
    %619 = arith.divf %617, %618 : vector<8x32xf32>
    %620 = arith.negf %608 : vector<8x32xf32>
    %621 = math.exp %620 : vector<8x32xf32>
    %cst_435 = arith.constant 1.000000e+00 : f32
    %622 = vector.broadcast %cst_435 : f32 to vector<8x32xf32>
    %623 = arith.addf %622, %621 : vector<8x32xf32>
    %624 = arith.divf %622, %623 : vector<8x32xf32>
    %625 = math.tanh %611 : vector<8x32xf32>
    %626 = arith.negf %614 : vector<8x32xf32>
    %627 = math.exp %626 : vector<8x32xf32>
    %cst_436 = arith.constant 1.000000e+00 : f32
    %628 = vector.broadcast %cst_436 : f32 to vector<8x32xf32>
    %629 = arith.addf %628, %627 : vector<8x32xf32>
    %630 = arith.divf %628, %629 : vector<8x32xf32>
    %c0_437 = arith.constant 0 : index
    %c0_438 = arith.constant 0 : index
    %631 = vector.load %arg19[%c0_437, %c0_438] : memref<8x32xf32, #tpu.memory_space<vmem>>, vector<8x32xf32>
    %632 = arith.mulf %624, %631 : vector<8x32xf32>
    %633 = arith.mulf %619, %625 : vector<8x32xf32>
    %634 = arith.addf %632, %633 : vector<8x32xf32>
    %635 = math.tanh %634 : vector<8x32xf32>
    %636 = arith.mulf %630, %635 : vector<8x32xf32>
    %c0_439 = arith.constant 0 : index
    %c0_440 = arith.constant 0 : index
    %637 = vector.load %arg19[%c0_439, %c0_440] : memref<8x32xf32, #tpu.memory_space<vmem>>, vector<8x32xf32>
    tpu.vector_store %arg19[%c0_439, %c0_440], %634 {strides = array<i32>} : memref<8x32xf32, #tpu.memory_space<vmem>>, vector<8x32xf32>,
    %c0_441 = arith.constant 0 : index
    %c0_442 = arith.constant 0 : index
    %638 = vector.load %arg18[%c0_441, %c0_442] : memref<8x32xf32, #tpu.memory_space<vmem>>, vector<8x32xf32>
    tpu.vector_store %arg18[%c0_441, %c0_442], %636 {strides = array<i32>} : memref<8x32xf32, #tpu.memory_space<vmem>>, vector<8x32xf32>,
    %c40_443 = arith.constant 40 : index
    %c0_444 = arith.constant 0 : index
    %639 = vector.load %arg17[%c40_443, %c0_444] : memref<72x32xf32, #tpu.memory_space<vmem>>, vector<8x32xf32>
    tpu.vector_store %arg17[%c40_443, %c0_444], %636 {strides = array<i32>} : memref<72x32xf32, #tpu.memory_space<vmem>>, vector<8x32xf32>,
    %c0_445 = arith.constant 0 : index
    %c0_446 = arith.constant 0 : index
    %640 = vector.load %arg18[%c0_445, %c0_446] : memref<8x32xf32, #tpu.memory_space<vmem>>, vector<8x32xf32>
    %c48_447 = arith.constant 48 : index
    %c0_448 = arith.constant 0 : index
    %641 = vector.load %arg13[%c48_447, %c0_448] : memref<72x32xf32, #tpu.memory_space<vmem>>, vector<8x32xf32>
    %cst_449 = arith.constant dense<0.000000e+00> : vector<8x32xf32>
    %642 = tpu.matmul %640, %401, %cst_449 {dimension_numbers = #tpu.dot_dimension_numbers<[1], [0], [0], [1], [0, 0, 1, 1], [], []>} : vector<8x32xf32>, vector<32x32xf32>, vector<8x32xf32> -> vector<8x32xf32>
    %643 = arith.addf %641, %642 : vector<8x32xf32>
    %c48_450 = arith.constant 48 : index
    %c0_451 = arith.constant 0 : index
    %644 = vector.load %arg14[%c48_450, %c0_451] : memref<72x32xf32, #tpu.memory_space<vmem>>, vector<8x32xf32>
    %cst_452 = arith.constant dense<0.000000e+00> : vector<8x32xf32>
    %645 = tpu.matmul %640, %403, %cst_452 {dimension_numbers = #tpu.dot_dimension_numbers<[1], [0], [0], [1], [0, 0, 1, 1], [], []>} : vector<8x32xf32>, vector<32x32xf32>, vector<8x32xf32> -> vector<8x32xf32>
    %646 = arith.addf %644, %645 : vector<8x32xf32>
    %c48_453 = arith.constant 48 : index
    %c0_454 = arith.constant 0 : index
    %647 = vector.load %arg15[%c48_453, %c0_454] : memref<72x32xf32, #tpu.memory_space<vmem>>, vector<8x32xf32>
    %cst_455 = arith.constant dense<0.000000e+00> : vector<8x32xf32>
    %648 = tpu.matmul %640, %405, %cst_455 {dimension_numbers = #tpu.dot_dimension_numbers<[1], [0], [0], [1], [0, 0, 1, 1], [], []>} : vector<8x32xf32>, vector<32x32xf32>, vector<8x32xf32> -> vector<8x32xf32>
    %649 = arith.addf %647, %648 : vector<8x32xf32>
    %c48_456 = arith.constant 48 : index
    %c0_457 = arith.constant 0 : index
    %650 = vector.load %arg16[%c48_456, %c0_457] : memref<72x32xf32, #tpu.memory_space<vmem>>, vector<8x32xf32>
    %cst_458 = arith.constant dense<0.000000e+00> : vector<8x32xf32>
    %651 = tpu.matmul %640, %407, %cst_458 {dimension_numbers = #tpu.dot_dimension_numbers<[1], [0], [0], [1], [0, 0, 1, 1], [], []>} : vector<8x32xf32>, vector<32x32xf32>, vector<8x32xf32> -> vector<8x32xf32>
    %652 = arith.addf %650, %651 : vector<8x32xf32>
    %653 = arith.negf %643 : vector<8x32xf32>
    %654 = math.exp %653 : vector<8x32xf32>
    %cst_459 = arith.constant 1.000000e+00 : f32
    %655 = vector.broadcast %cst_459 : f32 to vector<8x32xf32>
    %656 = arith.addf %655, %654 : vector<8x32xf32>
    %657 = arith.divf %655, %656 : vector<8x32xf32>
    %658 = arith.negf %646 : vector<8x32xf32>
    %659 = math.exp %658 : vector<8x32xf32>
    %cst_460 = arith.constant 1.000000e+00 : f32
    %660 = vector.broadcast %cst_460 : f32 to vector<8x32xf32>
    %661 = arith.addf %660, %659 : vector<8x32xf32>
    %662 = arith.divf %660, %661 : vector<8x32xf32>
    %663 = math.tanh %649 : vector<8x32xf32>
    %664 = arith.negf %652 : vector<8x32xf32>
    %665 = math.exp %664 : vector<8x32xf32>
    %cst_461 = arith.constant 1.000000e+00 : f32
    %666 = vector.broadcast %cst_461 : f32 to vector<8x32xf32>
    %667 = arith.addf %666, %665 : vector<8x32xf32>
    %668 = arith.divf %666, %667 : vector<8x32xf32>
    %c0_462 = arith.constant 0 : index
    %c0_463 = arith.constant 0 : index
    %669 = vector.load %arg19[%c0_462, %c0_463] : memref<8x32xf32, #tpu.memory_space<vmem>>, vector<8x32xf32>
    %670 = arith.mulf %662, %669 : vector<8x32xf32>
    %671 = arith.mulf %657, %663 : vector<8x32xf32>
    %672 = arith.addf %670, %671 : vector<8x32xf32>
    %673 = math.tanh %672 : vector<8x32xf32>
    %674 = arith.mulf %668, %673 : vector<8x32xf32>
    %c0_464 = arith.constant 0 : index
    %c0_465 = arith.constant 0 : index
    %675 = vector.load %arg19[%c0_464, %c0_465] : memref<8x32xf32, #tpu.memory_space<vmem>>, vector<8x32xf32>
    tpu.vector_store %arg19[%c0_464, %c0_465], %672 {strides = array<i32>} : memref<8x32xf32, #tpu.memory_space<vmem>>, vector<8x32xf32>,
    %c0_466 = arith.constant 0 : index
    %c0_467 = arith.constant 0 : index
    %676 = vector.load %arg18[%c0_466, %c0_467] : memref<8x32xf32, #tpu.memory_space<vmem>>, vector<8x32xf32>
    tpu.vector_store %arg18[%c0_466, %c0_467], %674 {strides = array<i32>} : memref<8x32xf32, #tpu.memory_space<vmem>>, vector<8x32xf32>,
    %c48_468 = arith.constant 48 : index
    %c0_469 = arith.constant 0 : index
    %677 = vector.load %arg17[%c48_468, %c0_469] : memref<72x32xf32, #tpu.memory_space<vmem>>, vector<8x32xf32>
    tpu.vector_store %arg17[%c48_468, %c0_469], %674 {strides = array<i32>} : memref<72x32xf32, #tpu.memory_space<vmem>>, vector<8x32xf32>,
    %c0_470 = arith.constant 0 : index
    %c0_471 = arith.constant 0 : index
    %678 = vector.load %arg18[%c0_470, %c0_471] : memref<8x32xf32, #tpu.memory_space<vmem>>, vector<8x32xf32>
    %c56_472 = arith.constant 56 : index
    %c0_473 = arith.constant 0 : index
    %679 = vector.load %arg13[%c56_472, %c0_473] : memref<72x32xf32, #tpu.memory_space<vmem>>, vector<8x32xf32>
    %cst_474 = arith.constant dense<0.000000e+00> : vector<8x32xf32>
    %680 = tpu.matmul %678, %401, %cst_474 {dimension_numbers = #tpu.dot_dimension_numbers<[1], [0], [0], [1], [0, 0, 1, 1], [], []>} : vector<8x32xf32>, vector<32x32xf32>, vector<8x32xf32> -> vector<8x32xf32>
    %681 = arith.addf %679, %680 : vector<8x32xf32>
    %c56_475 = arith.constant 56 : index
    %c0_476 = arith.constant 0 : index
    %682 = vector.load %arg14[%c56_475, %c0_476] : memref<72x32xf32, #tpu.memory_space<vmem>>, vector<8x32xf32>
    %cst_477 = arith.constant dense<0.000000e+00> : vector<8x32xf32>
    %683 = tpu.matmul %678, %403, %cst_477 {dimension_numbers = #tpu.dot_dimension_numbers<[1], [0], [0], [1], [0, 0, 1, 1], [], []>} : vector<8x32xf32>, vector<32x32xf32>, vector<8x32xf32> -> vector<8x32xf32>
    %684 = arith.addf %682, %683 : vector<8x32xf32>
    %c56_478 = arith.constant 56 : index
    %c0_479 = arith.constant 0 : index
    %685 = vector.load %arg15[%c56_478, %c0_479] : memref<72x32xf32, #tpu.memory_space<vmem>>, vector<8x32xf32>
    %cst_480 = arith.constant dense<0.000000e+00> : vector<8x32xf32>
    %686 = tpu.matmul %678, %405, %cst_480 {dimension_numbers = #tpu.dot_dimension_numbers<[1], [0], [0], [1], [0, 0, 1, 1], [], []>} : vector<8x32xf32>, vector<32x32xf32>, vector<8x32xf32> -> vector<8x32xf32>
    %687 = arith.addf %685, %686 : vector<8x32xf32>
    %c56_481 = arith.constant 56 : index
    %c0_482 = arith.constant 0 : index
    %688 = vector.load %arg16[%c56_481, %c0_482] : memref<72x32xf32, #tpu.memory_space<vmem>>, vector<8x32xf32>
    %cst_483 = arith.constant dense<0.000000e+00> : vector<8x32xf32>
    %689 = tpu.matmul %678, %407, %cst_483 {dimension_numbers = #tpu.dot_dimension_numbers<[1], [0], [0], [1], [0, 0, 1, 1], [], []>} : vector<8x32xf32>, vector<32x32xf32>, vector<8x32xf32> -> vector<8x32xf32>
    %690 = arith.addf %688, %689 : vector<8x32xf32>
    %691 = arith.negf %681 : vector<8x32xf32>
    %692 = math.exp %691 : vector<8x32xf32>
    %cst_484 = arith.constant 1.000000e+00 : f32
    %693 = vector.broadcast %cst_484 : f32 to vector<8x32xf32>
    %694 = arith.addf %693, %692 : vector<8x32xf32>
    %695 = arith.divf %693, %694 : vector<8x32xf32>
    %696 = arith.negf %684 : vector<8x32xf32>
    %697 = math.exp %696 : vector<8x32xf32>
    %cst_485 = arith.constant 1.000000e+00 : f32
    %698 = vector.broadcast %cst_485 : f32 to vector<8x32xf32>
    %699 = arith.addf %698, %697 : vector<8x32xf32>
    %700 = arith.divf %698, %699 : vector<8x32xf32>
    %701 = math.tanh %687 : vector<8x32xf32>
    %702 = arith.negf %690 : vector<8x32xf32>
    %703 = math.exp %702 : vector<8x32xf32>
    %cst_486 = arith.constant 1.000000e+00 : f32
    %704 = vector.broadcast %cst_486 : f32 to vector<8x32xf32>
    %705 = arith.addf %704, %703 : vector<8x32xf32>
    %706 = arith.divf %704, %705 : vector<8x32xf32>
    %c0_487 = arith.constant 0 : index
    %c0_488 = arith.constant 0 : index
    %707 = vector.load %arg19[%c0_487, %c0_488] : memref<8x32xf32, #tpu.memory_space<vmem>>, vector<8x32xf32>
    %708 = arith.mulf %700, %707 : vector<8x32xf32>
    %709 = arith.mulf %695, %701 : vector<8x32xf32>
    %710 = arith.addf %708, %709 : vector<8x32xf32>
    %711 = math.tanh %710 : vector<8x32xf32>
    %712 = arith.mulf %706, %711 : vector<8x32xf32>
    %c0_489 = arith.constant 0 : index
    %c0_490 = arith.constant 0 : index
    %713 = vector.load %arg19[%c0_489, %c0_490] : memref<8x32xf32, #tpu.memory_space<vmem>>, vector<8x32xf32>
    tpu.vector_store %arg19[%c0_489, %c0_490], %710 {strides = array<i32>} : memref<8x32xf32, #tpu.memory_space<vmem>>, vector<8x32xf32>,
    %c0_491 = arith.constant 0 : index
    %c0_492 = arith.constant 0 : index
    %714 = vector.load %arg18[%c0_491, %c0_492] : memref<8x32xf32, #tpu.memory_space<vmem>>, vector<8x32xf32>
    tpu.vector_store %arg18[%c0_491, %c0_492], %712 {strides = array<i32>} : memref<8x32xf32, #tpu.memory_space<vmem>>, vector<8x32xf32>,
    %c56_493 = arith.constant 56 : index
    %c0_494 = arith.constant 0 : index
    %715 = vector.load %arg17[%c56_493, %c0_494] : memref<72x32xf32, #tpu.memory_space<vmem>>, vector<8x32xf32>
    tpu.vector_store %arg17[%c56_493, %c0_494], %712 {strides = array<i32>} : memref<72x32xf32, #tpu.memory_space<vmem>>, vector<8x32xf32>,
    %c0_495 = arith.constant 0 : index
    %c0_496 = arith.constant 0 : index
    %716 = vector.load %arg18[%c0_495, %c0_496] : memref<8x32xf32, #tpu.memory_space<vmem>>, vector<8x32xf32>
    %c64_497 = arith.constant 64 : index
    %c0_498 = arith.constant 0 : index
    %717 = vector.load %arg13[%c64_497, %c0_498] : memref<72x32xf32, #tpu.memory_space<vmem>>, vector<8x32xf32>
    %cst_499 = arith.constant dense<0.000000e+00> : vector<8x32xf32>
    %718 = tpu.matmul %716, %401, %cst_499 {dimension_numbers = #tpu.dot_dimension_numbers<[1], [0], [0], [1], [0, 0, 1, 1], [], []>} : vector<8x32xf32>, vector<32x32xf32>, vector<8x32xf32> -> vector<8x32xf32>
    %719 = arith.addf %717, %718 : vector<8x32xf32>
    %c64_500 = arith.constant 64 : index
    %c0_501 = arith.constant 0 : index
    %720 = vector.load %arg14[%c64_500, %c0_501] : memref<72x32xf32, #tpu.memory_space<vmem>>, vector<8x32xf32>
    %cst_502 = arith.constant dense<0.000000e+00> : vector<8x32xf32>
    %721 = tpu.matmul %716, %403, %cst_502 {dimension_numbers = #tpu.dot_dimension_numbers<[1], [0], [0], [1], [0, 0, 1, 1], [], []>} : vector<8x32xf32>, vector<32x32xf32>, vector<8x32xf32> -> vector<8x32xf32>
    %722 = arith.addf %720, %721 : vector<8x32xf32>
    %c64_503 = arith.constant 64 : index
    %c0_504 = arith.constant 0 : index
    %723 = vector.load %arg15[%c64_503, %c0_504] : memref<72x32xf32, #tpu.memory_space<vmem>>, vector<8x32xf32>
    %cst_505 = arith.constant dense<0.000000e+00> : vector<8x32xf32>
    %724 = tpu.matmul %716, %405, %cst_505 {dimension_numbers = #tpu.dot_dimension_numbers<[1], [0], [0], [1], [0, 0, 1, 1], [], []>} : vector<8x32xf32>, vector<32x32xf32>, vector<8x32xf32> -> vector<8x32xf32>
    %725 = arith.addf %723, %724 : vector<8x32xf32>
    %c64_506 = arith.constant 64 : index
    %c0_507 = arith.constant 0 : index
    %726 = vector.load %arg16[%c64_506, %c0_507] : memref<72x32xf32, #tpu.memory_space<vmem>>, vector<8x32xf32>
    %cst_508 = arith.constant dense<0.000000e+00> : vector<8x32xf32>
    %727 = tpu.matmul %716, %407, %cst_508 {dimension_numbers = #tpu.dot_dimension_numbers<[1], [0], [0], [1], [0, 0, 1, 1], [], []>} : vector<8x32xf32>, vector<32x32xf32>, vector<8x32xf32> -> vector<8x32xf32>
    %728 = arith.addf %726, %727 : vector<8x32xf32>
    %729 = arith.negf %719 : vector<8x32xf32>
    %730 = math.exp %729 : vector<8x32xf32>
    %cst_509 = arith.constant 1.000000e+00 : f32
    %731 = vector.broadcast %cst_509 : f32 to vector<8x32xf32>
    %732 = arith.addf %731, %730 : vector<8x32xf32>
    %733 = arith.divf %731, %732 : vector<8x32xf32>
    %734 = arith.negf %722 : vector<8x32xf32>
    %735 = math.exp %734 : vector<8x32xf32>
    %cst_510 = arith.constant 1.000000e+00 : f32
    %736 = vector.broadcast %cst_510 : f32 to vector<8x32xf32>
    %737 = arith.addf %736, %735 : vector<8x32xf32>
    %738 = arith.divf %736, %737 : vector<8x32xf32>
    %739 = math.tanh %725 : vector<8x32xf32>
    %740 = arith.negf %728 : vector<8x32xf32>
    %741 = math.exp %740 : vector<8x32xf32>
    %cst_511 = arith.constant 1.000000e+00 : f32
    %742 = vector.broadcast %cst_511 : f32 to vector<8x32xf32>
    %743 = arith.addf %742, %741 : vector<8x32xf32>
    %744 = arith.divf %742, %743 : vector<8x32xf32>
    %c0_512 = arith.constant 0 : index
    %c0_513 = arith.constant 0 : index
    %745 = vector.load %arg19[%c0_512, %c0_513] : memref<8x32xf32, #tpu.memory_space<vmem>>, vector<8x32xf32>
    %746 = arith.mulf %738, %745 : vector<8x32xf32>
    %747 = arith.mulf %733, %739 : vector<8x32xf32>
    %748 = arith.addf %746, %747 : vector<8x32xf32>
    %749 = math.tanh %748 : vector<8x32xf32>
    %750 = arith.mulf %744, %749 : vector<8x32xf32>
    %c0_514 = arith.constant 0 : index
    %c0_515 = arith.constant 0 : index
    %751 = vector.load %arg19[%c0_514, %c0_515] : memref<8x32xf32, #tpu.memory_space<vmem>>, vector<8x32xf32>
    tpu.vector_store %arg19[%c0_514, %c0_515], %748 {strides = array<i32>} : memref<8x32xf32, #tpu.memory_space<vmem>>, vector<8x32xf32>,
    %c0_516 = arith.constant 0 : index
    %c0_517 = arith.constant 0 : index
    %752 = vector.load %arg18[%c0_516, %c0_517] : memref<8x32xf32, #tpu.memory_space<vmem>>, vector<8x32xf32>
    tpu.vector_store %arg18[%c0_516, %c0_517], %750 {strides = array<i32>} : memref<8x32xf32, #tpu.memory_space<vmem>>, vector<8x32xf32>,
    %c64_518 = arith.constant 64 : index
    %c0_519 = arith.constant 0 : index
    %753 = vector.load %arg17[%c64_518, %c0_519] : memref<72x32xf32, #tpu.memory_space<vmem>>, vector<8x32xf32>
    tpu.vector_store %arg17[%c64_518, %c0_519], %750 {strides = array<i32>} : memref<72x32xf32, #tpu.memory_space<vmem>>, vector<8x32xf32>,
    %c0_520 = arith.constant 0 : index
    %c0_521 = arith.constant 0 : index
    %754 = vector.load %arg17[%c0_520, %c0_521] : memref<72x32xf32, #tpu.memory_space<vmem>>, vector<72x32xf32>
    %c0_522 = arith.constant 0 : index
    %c0_523 = arith.constant 0 : index
    %755 = vector.load %arg11[%c0_522, %c0_523] : memref<72x32xf32, #tpu.memory_space<vmem>>, vector<72x32xf32>
    tpu.vector_store %arg11[%c0_522, %c0_523], %754 {strides = array<i32>} : memref<72x32xf32, #tpu.memory_space<vmem>>, vector<72x32xf32>,
    return
  }
}

</mosaic_0001>

<bundles_post_ra>
// kernel: cnn_to_rnn_forward.1
= control target key start
LH: loop header
LB: loop body
LE: loop exit
PB: predicated region body
PF: predicated region fallthrough
CT: control target
= control target key end

     0   :  { %v9562_v3 = vmov 0   ;;  %vm530_vm0 = vcmask 523264   ;;  %vm462_vm7 = vcmask 261120   ;;  %vm9565_vm8 = vmmov 0   ;;  %s9566_s23 = smov 64   ;;  %s9567_s24 = smov 96   ;;  %s11083_s1 = inlined_call_operand.vmem [shape: f32[1024,32], index: 1, kind: input, shape index: {}]   ;;  %s11084_s3 = inlined_call_operand.vmem [shape: s32[64,1], index: 3, kind: input, shape index: {}]   ;;  %s11085_s0 = inlined_call_operand.vmem [shape: f32[8,1024], index: 0, kind: input, shape index: {}]   ;;  %s11086_s4 = inlined_call_operand.vmem [shape: f32[64,32], index: 4, kind: input, shape index: {}]   ;;  %s11087_s5 = inlined_call_operand.vmem [shape: f32[32,128], index: 5, kind: input, shape index: {}]   ;;  %s11088_s6 = inlined_call_operand.vmem [shape: f32[4,32,32], index: 6, kind: input, shape index: {}]   ;;  %s11089_s2 = inlined_call_operand.vmem [shape: f32[1,32], index: 2, kind: input, shape index: {}]   ;;  %s11090_s7 = inlined_call_operand.vmem [shape: f32[1,128], index: 7, kind: input, shape index: {}]   ;;  %s11091_s8 = inlined_call_operand.vmem [shape: f32[32,128], index: 8, kind: input, shape index: {}]   ;;  %s11092_s9 = inlined_call_operand.vmem [shape: f32[4,32,32], index: 9, kind: input, shape index: {}]   ;;  %s11093_s10 = inlined_call_operand.vmem [shape: f32[1,128], index: 10, kind: input, shape index: {}]   ;;  %s11094_s11 = inlined_call_operand.vmem [shape: f32[72,32], index: 11, kind: output, shape index: {}]  }
   0x1   :  { %v62_v0 = vld [vmem:[%s11083_s1 + $0x80] sm:$0xff]  ;;  %v63_v1 = vld [vmem:[%s11083_s1 + $0x88] sm:$0xff]  ;;  %9272 = vset.pattern.permute.xlu0 %v9562_v3  ;;  %9273 = vset.pattern.permute.xlu1 %v9562_v3  ;;  %v64_v12 = vld [vmem:[%s11083_s1 + $0x90] sm:$0xff]  ;;  %s9568_s25 = smov 32  }
   0x2   :  { %v46_v2 = vld [vmem:[%s11083_s1] sm:$0xff]  ;;  %v8677_v4 = vpack.c.bf16 %v63_v1, %v62_v0  ;;  %v47_v5 = vld [vmem:[%s11083_s1 + $0x8] sm:$0xff]  ;;  %v65_v14 = vld [vmem:[%s11083_s1 + $0x98] sm:$0xff] }
   0x3   :  { %v94_v6 = vld [vmem:[%s11083_s1 + $0x180] sm:$0xff]  ;;  %v95_v7 = vld [vmem:[%s11083_s1 + $0x188] sm:$0xff]  ;;  %v8679_v8 = vpack.c.bf16 %v47_v5, %v46_v2  ;;  %v48_v16 = vld [vmem:[%s11083_s1 + $0x10] sm:$0xff]  ;;  %v8681_v17 = vpack.c.bf16 %v65_v14, %v64_v12 }
   0x4   :  { %v8709_v9 = vpack.c.bf16 %v95_v7, %v94_v6  ;;  %v78_v10 = vld [vmem:[%s11083_s1 + $0x100] sm:$0xff]  ;;  %v79_v11 = vld [vmem:[%s11083_s1 + $0x108] sm:$0xff]  ;;  %8678 = vmatprep.subr.bf16.mxu0 %v8677_v4  ;;  %v49_v18 = vld [vmem:[%s11083_s1 + $0x18] sm:$0xff] }
   0x5   :  { %v8711_v13 = vpack.c.bf16 %v79_v11, %v78_v10  ;;  %v464_v15 = vld [vmem:[%s11084_s3] sm:$0xff]  ;;  %8680 = vmatpush3.bf16.msra.mxu0 %v8679_v8  ;;  %v96_v19 = vld [vmem:[%s11083_s1 + $0x190] sm:$0xff]  ;;  %v97_v20 = vld [vmem:[%s11083_s1 + $0x198] sm:$0xff]  ;;  %v8683_v21 = vpack.c.bf16 %v49_v18, %v48_v16 }
   0x6   :  { %8710 = vmatprep.subr.bf16.mxu1 %v8709_v9  ;;  %475 = vperm.xlu0 %9272, %v464_v15   ;;  %v8713_v22 = vpack.c.bf16 %v97_v20, %v96_v19  ;;  %v80_v23 = vld [vmem:[%s11083_s1 + $0x110] sm:$0xff]  ;;  %v81_v24 = vld [vmem:[%s11083_s1 + $0x118] sm:$0xff]  ;;  %v66_v25 = vld [vmem:[%s11083_s1 + $0xa0] sm:$0xff] }
   0x7   :  { %8712 = vmatpush3.bf16.msra.mxu1 %v8711_v13  ;;  %8682 = vmatprep.subr.bf16.mxu0 %v8681_v17  ;;  %v8715_v26 = vpack.c.bf16 %v81_v24, %v80_v23  ;;  %v67_v27 = vld [vmem:[%s11083_s1 + $0xa8] sm:$0xff]  ;;  %v50_v29 = vld [vmem:[%s11083_s1 + $0x20] sm:$0xff]  ;;  %v68_v38 = vld [vmem:[%s11083_s1 + $0xb0] sm:$0xff] }
   0x8   :  { %v465_v28 = vld [vmem:[%s11084_s3 + $0x8] sm:$0xff]  ;;  %8714 = vmatprep.subr.bf16.mxu1 %v8713_v22  ;;  %v8685_v30 = vpack.c.bf16 %v67_v27, %v66_v25  ;;  %v98_v32 = vld [vmem:[%s11083_s1 + $0x1a0] sm:$0xff]  ;;  %v69_v40 = vld [vmem:[%s11083_s1 + $0xb8] sm:$0xff] }
   0x9   :  { %v51_v31 = vld [vmem:[%s11083_s1 + $0x28] sm:$0xff]  ;;  %8684 = vmatpush3.bf16.msra.mxu0 %v8683_v21  ;;  %v82_v36 = vld [vmem:[%s11083_s1 + $0x120] sm:$0xff]  ;;  %v52_v41 = vld [vmem:[%s11083_s1 + $0x30] sm:$0xff]  ;;  %v8689_v43 = vpack.c.bf16 %v69_v40, %v68_v38 }
   0xa   :  { %v99_v33 = vld [vmem:[%s11083_s1 + $0x1a8] sm:$0xff]  ;;  %v8687_v34 = vpack.c.bf16 %v51_v31, %v50_v29  ;;  %8686 = vmatprep.subr.bf16.mxu0 %v8685_v30  ;;  %v53_v42 = vld [vmem:[%s11083_s1 + $0x38] sm:$0xff]  ;;  %478 = vperm.xlu0 %9272, %v465_v28   ;;  %v100_v44 = vld [vmem:[%s11083_s1 + $0x1b0] sm:$0xff] }
   0xb   :  { %v8717_v35 = vpack.c.bf16 %v99_v33, %v98_v32  ;;  %v83_v37 = vld [vmem:[%s11083_s1 + $0x128] sm:$0xff]  ;;  %8716 = vmatpush3.bf16.msra.mxu1 %v8715_v26  ;;  %v101_v45 = vld [vmem:[%s11083_s1 + $0x1b8] sm:$0xff]  ;;  %v84_v46 = vld [vmem:[%s11083_s1 + $0x130] sm:$0xff]  ;;  %v8691_v51 = vpack.c.bf16 %v53_v42, %v52_v41 }
   0xc   :  { %v8719_v39 = vpack.c.bf16 %v83_v37, %v82_v36  ;;  %v8721_v47 = vpack.c.bf16 %v101_v45, %v100_v44  ;;  %v85_v48 = vld [vmem:[%s11083_s1 + $0x138] sm:$0xff]  ;;  %v70_v49 = vld [vmem:[%s11083_s1 + $0xc0] sm:$0xff]  ;;  %v71_v50 = vld [vmem:[%s11083_s1 + $0xc8] sm:$0xff] }
   0xd   :  { %8718 = vmatprep.subr.bf16.mxu1 %v8717_v35  ;;  %8688 = vmatpush3.bf16.msra.mxu0 %v8687_v34  ;;  %v466_v52 = vld [vmem:[%s11084_s3 + $0x10] sm:$0xff]  ;;  %v54_v53 = vld [vmem:[%s11083_s1 + $0x40] sm:$0xff]  ;;  %v55_v54 = vld [vmem:[%s11083_s1 + $0x48] sm:$0xff]  ;;  %v8723_v55 = vpack.c.bf16 %v85_v48, %v84_v46  ;;  %v8693_v56 = vpack.c.bf16 %v71_v50, %v70_v49 }
   0xe   :  { %8690 = vmatprep.subr.bf16.mxu0 %v8689_v43  ;;  %v102_v57 = vld [vmem:[%s11083_s1 + $0x1c0] sm:$0xff]  ;;  %v103_v58 = vld [vmem:[%s11083_s1 + $0x1c8] sm:$0xff]  ;;  %481 = vperm.xlu1 %9273, %v466_v52   ;;  %v72_v62 = vld [vmem:[%s11083_s1 + $0xd0] sm:$0xff]  ;;  %v8695_v1 = vpack.c.bf16 %v55_v54, %v54_v53 }
   0xf   :  { %8720 = vmatpush3.bf16.msra.mxu1 %v8719_v39  ;;  %v86_v59 = vld [vmem:[%s11083_s1 + $0x140] sm:$0xff]  ;;  %v8725_v60 = vpack.c.bf16 %v103_v58, %v102_v57  ;;  %v87_v61 = vld [vmem:[%s11083_s1 + $0x148] sm:$0xff]  ;;  %v73_v63 = vld [vmem:[%s11083_s1 + $0xd8] sm:$0xff] }
  0x10   :  { %8722 = vmatprep.subr.bf16.mxu1 %v8721_v47  ;;  %v467_v0 = vld [vmem:[%s11084_s3 + $0x18] sm:$0xff]  ;;  %v104_v2 = vld [vmem:[%s11083_s1 + $0x1d0] sm:$0xff]  ;;  %v8727_v4 = vpack.c.bf16 %v87_v61, %v86_v59  ;;  %v8697_v5 = vpack.c.bf16 %v73_v63, %v72_v62  ;;  %v74_v11 = vld [vmem:[%s11083_s1 + $0xe0] sm:$0xff] }
  0x11   :  { %8692 = vmatpush3.bf16.msra.mxu0 %v8691_v51  ;;  %v105_v3 = vld [vmem:[%s11083_s1 + $0x1d8] sm:$0xff]  ;;  %v56_v6 = vld [vmem:[%s11083_s1 + $0x50] sm:$0xff]  ;;  %v75_v12 = vld [vmem:[%s11083_s1 + $0xe8] sm:$0xff] }
  0x12   :  { %8694 = vmatprep.subr.bf16.mxu0 %v8693_v56  ;;  %v57_v7 = vld [vmem:[%s11083_s1 + $0x58] sm:$0xff]  ;;  %v88_v8 = vld [vmem:[%s11083_s1 + $0x150] sm:$0xff]  ;;  %484 = vperm.xlu1 %9273, %v467_v0   ;;  %v8729_v9 = vpack.c.bf16 %v105_v3, %v104_v2  ;;  %v106_v13 = vld [vmem:[%s11083_s1 + $0x1e0] sm:$0xff]  ;;  %v8701_v18 = vpack.c.bf16 %v75_v12, %v74_v11 }
  0x13   :  { %8724 = vmatpush3.bf16.msra.mxu1 %v8723_v55  ;;  %v89_v10 = vld [vmem:[%s11083_s1 + $0x158] sm:$0xff]  ;;  %v107_v14 = vld [vmem:[%s11083_s1 + $0x1e8] sm:$0xff]  ;;  %v8699_v15 = vpack.c.bf16 %v57_v7, %v56_v6  ;;  %v58_v16 = vld [vmem:[%s11083_s1 + $0x60] sm:$0xff] }
  0x14   :  { %8726 = vmatprep.subr.bf16.mxu1 %v8725_v60  ;;  %v8731_v17 = vpack.c.bf16 %v89_v10, %v88_v8  ;;  %v59_v19 = vld [vmem:[%s11083_s1 + $0x68] sm:$0xff]  ;;  %v90_v20 = vld [vmem:[%s11083_s1 + $0x160] sm:$0xff]  ;;  %v8733_v22 = vpack.c.bf16 %v107_v14, %v106_v13  ;;  %v76_v23 = vld [vmem:[%s11083_s1 + $0xf0] sm:$0xff] }
  0x15   :  { %8696 = vmatpush3.bf16.msra.mxu0 %v8695_v1  ;;  %v91_v21 = vld [vmem:[%s11083_s1 + $0x168] sm:$0xff]  ;;  %v77_v24 = vld [vmem:[%s11083_s1 + $0xf8] sm:$0xff]  ;;  %v108_v26 = vld [vmem:[%s11083_s1 + $0x1f0] sm:$0xff]  ;;  %v8703_v29 = vpack.c.bf16 %v59_v19, %v58_v16 }
  0x16   :  { %8698 = vmatprep.subr.bf16.mxu0 %v8697_v5  ;;  %v39_v25 = vld [vmem:[%s11085_s0 + $0x8] sm:$0xff]  ;;  %v109_v27 = vld [vmem:[%s11083_s1 + $0x1f8] sm:$0xff]  ;;  %v468_v28 = vld [vmem:[%s11084_s3 + $0x20] sm:$0xff]  ;;  %v8735_v32 = vpack.c.bf16 %v91_v21, %v90_v20  ;;  %v8705_v33 = vpack.c.bf16 %v77_v24, %v76_v23 }
  0x17   :  { %8728 = vmatpush3.bf16.msra.mxu1 %v8727_v4  ;;  %245 = vmatprep.mubr.f32.mxu0 %v39_v25  ;;  %v469_v30 = vld [vmem:[%s11084_s3 + $0x28] sm:$0xff]  ;;  %v41_v31 = vld [vmem:[%s11085_s0 + $0x18] sm:$0xff]  ;;  %v60_v34 = vld [vmem:[%s11083_s1 + $0x70] sm:$0xff]  ;;  %v8737_v37 = vpack.c.bf16 %v109_v27, %v108_v26 }
  0x18   :  { %8730 = vmatprep.subr.bf16.mxu1 %v8729_v9  ;;  %487 = vperm.xlu0 %9272, %v468_v28   ;;  %v61_v35 = vld [vmem:[%s11083_s1 + $0x78] sm:$0xff]  ;;  %v92_v36 = vld [vmem:[%s11083_s1 + $0x170] sm:$0xff]  ;;  %v126_v39 = vld [vmem:[%s11083_s1 + $0x280] sm:$0xff] }
  0x19   :  { %8700 = vmatpush3.bf16.msra.mxu0 %v8699_v15  ;;  %v93_v38 = vld [vmem:[%s11083_s1 + $0x178] sm:$0xff]  ;;  %v127_v40 = vld [vmem:[%s11083_s1 + $0x288] sm:$0xff]  ;;  %490 = vperm.xlu1 %9273, %v469_v30   ;;  %v158_v41 = vld [vmem:[%s11083_s1 + $0x380] sm:$0xff]  ;;  %v8707_v43 = vpack.c.bf16 %v61_v35, %v60_v34 }
  0x1a   :  { %8702 = vmatprep.subr.bf16.mxu0 %v8701_v18  ;;  %315 = vmatprep.mubr.f32.mxu1 %v41_v31  ;;  %v159_v42 = vld [vmem:[%s11083_s1 + $0x388] sm:$0xff]  ;;  %v8739_v44 = vpack.c.bf16 %v93_v38, %v92_v36  ;;  %v8741_v45 = vpack.c.bf16 %v127_v40, %v126_v39  ;;  %v110_v46 = vld [vmem:[%s11083_s1 + $0x200] sm:$0xff]  ;;  %v128_v51 = vld [vmem:[%s11083_s1 + $0x290] sm:$0xff] }
  0x1b   :  { %8732 = vmatpush3.bf16.msra.mxu1 %v8731_v17  ;;  %v111_v47 = vld [vmem:[%s11083_s1 + $0x208] sm:$0xff]  ;;  %v142_v48 = vld [vmem:[%s11083_s1 + $0x300] sm:$0xff]  ;;  %v8773_v49 = vpack.c.bf16 %v159_v42, %v158_v41  ;;  %v129_v52 = vld [vmem:[%s11083_s1 + $0x298] sm:$0xff] }
  0x1c   :  { %8734 = vmatprep.subr.bf16.mxu1 %v8733_v22  ;;  %v143_v50 = vld [vmem:[%s11083_s1 + $0x308] sm:$0xff]  ;;  %v38_v53 = vld [vmem:[%s11085_s0] sm:$0xff]  ;;  %v160_v54 = vld [vmem:[%s11083_s1 + $0x390] sm:$0xff]  ;;  %v8743_v56 = vpack.c.bf16 %v111_v47, %v110_v46  ;;  %v8745_v61 = vpack.c.bf16 %v129_v52, %v128_v51 }
  0x1d   :  { %8704 = vmatpush3.bf16.msra.mxu0 %v8703_v29  ;;  %v161_v55 = vld [vmem:[%s11083_s1 + $0x398] sm:$0xff]  ;;  %v40_v57 = vld [vmem:[%s11085_s0 + $0x10] sm:$0xff]  ;;  %v8775_v60 = vpack.c.bf16 %v143_v50, %v142_v48  ;;  %v130_v3 = vld [vmem:[%s11083_s1 + $0x2a0] sm:$0xff] }
  0x1e   :  { %8706 = vmatprep.subr.bf16.mxu0 %v8705_v33  ;;  %v112_v58 = vld [vmem:[%s11083_s1 + $0x210] sm:$0xff]  ;;  %v113_v62 = vld [vmem:[%s11083_s1 + $0x218] sm:$0xff]  ;;  %v8777_v1 = vpack.c.bf16 %v161_v55, %v160_v54  ;;  %v131_v4 = vld [vmem:[%s11083_s1 + $0x2a8] sm:$0xff] }
  0x1f   :  { %8736 = vmatpush3.bf16.msra.mxu1 %v8735_v32  ;;  %v470_v59 = vld [vmem:[%s11084_s3 + $0x30] sm:$0xff]  ;;  %v471_v0 = vld [vmem:[%s11084_s3 + $0x38] sm:$0xff]  ;;  %v162_v5 = vld [vmem:[%s11083_s1 + $0x3a0] sm:$0xff]  ;;  %v8747_v7 = vpack.c.bf16 %v113_v62, %v112_v58  ;;  %v8749_v9 = vpack.c.bf16 %v131_v4, %v130_v3 }
  0x20   :  { %8738 = vmatprep.subr.bf16.mxu1 %v8737_v37  ;;  %v144_v63 = vld [vmem:[%s11083_s1 + $0x310] sm:$0xff]  ;;  %v145_v2 = vld [vmem:[%s11083_s1 + $0x318] sm:$0xff]  ;;  %493 = vperm.xlu0 %9272, %v470_v59   ;;  %v163_v6 = vld [vmem:[%s11083_s1 + $0x3a8] sm:$0xff] }
  0x21   :  { %8708 = vmatpush3.bf16.msra.mxu0 %v8707_v43  ;;  %496 = vperm.xlu1 %9273, %v471_v0   ;;  %v8779_v8 = vpack.c.bf16 %v145_v2, %v144_v63  ;;  %v114_v10 = vld [vmem:[%s11083_s1 + $0x220] sm:$0xff]  ;;  %v115_v11 = vld [vmem:[%s11083_s1 + $0x228] sm:$0xff]  ;;  %v8781_v13 = vpack.c.bf16 %v163_v6, %v162_v5  ;;  %v132_v15 = vld [vmem:[%s11083_s1 + $0x2b0] sm:$0xff] }
  0x22   :  { %8742 = vmatprep.subr.bf16.mxu0 %v8741_v45  ;;  %v146_v12 = vld [vmem:[%s11083_s1 + $0x320] sm:$0xff]  ;;  %v147_v14 = vld [vmem:[%s11083_s1 + $0x328] sm:$0xff]  ;;  %v133_v16 = vld [vmem:[%s11083_s1 + $0x2b8] sm:$0xff]  ;;  %v8751_v19 = vpack.c.bf16 %v115_v11, %v114_v10 }
  0x23   :  { %8740 = vmatpush3.bf16.msra.mxu1 %v8739_v44  ;;  %v164_v17 = vld [vmem:[%s11083_s1 + $0x3b0] sm:$0xff]  ;;  %v165_v18 = vld [vmem:[%s11083_s1 + $0x3b8] sm:$0xff]  ;;  %v8783_v20 = vpack.c.bf16 %v147_v14, %v146_v12  ;;  %v8753_v21 = vpack.c.bf16 %v133_v16, %v132_v15  ;;  %v134_v27 = vld [vmem:[%s11083_s1 + $0x2c0] sm:$0xff] }
  0x24   :  { %8774 = vmatprep.subr.bf16.mxu1 %v8773_v49  ;;  %246 = vmatmul.mubr.f32.vlgmr.msra.gmra.mrb[0].mxu0 %v38_v53  ;;  %v116_v22 = vld [vmem:[%s11083_s1 + $0x230] sm:$0xff]  ;;  %v117_v23 = vld [vmem:[%s11083_s1 + $0x238] sm:$0xff]  ;;  %v8785_v25 = vpack.c.bf16 %v165_v18, %v164_v17  ;;  %v135_v28 = vld [vmem:[%s11083_s1 + $0x2c8] sm:$0xff] }
  0x25   :  { %8744 = vmatpush3.bf16.msra.mxu0 %v8743_v56  ;;  %v148_v24 = vld [vmem:[%s11083_s1 + $0x330] sm:$0xff]  ;;  %v149_v26 = vld [vmem:[%s11083_s1 + $0x338] sm:$0xff]  ;;  %v166_v29 = vld [vmem:[%s11083_s1 + $0x3c0] sm:$0xff]  ;;  %v8755_v31 = vpack.c.bf16 %v117_v23, %v116_v22  ;;  %v8757_v34 = vpack.c.bf16 %v135_v28, %v134_v27 }
  0x26   :  { %316 = vmatmul.mubr.f32.vlgmr.msra.gmra.mrb[0].mxu1 %v40_v57  ;;  %8746 = vmatprep.subr.bf16.mxu0 %v8745_v61  ;;  %v167_v30 = vld [vmem:[%s11083_s1 + $0x3c8] sm:$0xff]  ;;  %v118_v32 = vld [vmem:[%s11083_s1 + $0x240] sm:$0xff]  ;;  %v8787_v33 = vpack.c.bf16 %v149_v26, %v148_v24  ;;  %v136_v39 = vld [vmem:[%s11083_s1 + $0x2d0] sm:$0xff] }
  0x27   :  { %8776 = vmatpush3.bf16.msra.mxu1 %v8775_v60  ;;  %v119_v35 = vld [vmem:[%s11083_s1 + $0x248] sm:$0xff]  ;;  %v150_v36 = vld [vmem:[%s11083_s1 + $0x340] sm:$0xff]  ;;  %v8789_v38 = vpack.c.bf16 %v167_v30, %v166_v29  ;;  %v137_v40 = vld [vmem:[%s11083_s1 + $0x2d8] sm:$0xff]  ;;  %v472_v29 = vlaneseq }
  0x28   :  { %8778 = vmatprep.subr.bf16.mxu1 %v8777_v1  ;;  %v151_v37 = vld [vmem:[%s11083_s1 + $0x348] sm:$0xff]  ;;  %v168_v42 = vld [vmem:[%s11083_s1 + $0x3d0] sm:$0xff]  ;;  %v169_v43 = vld [vmem:[%s11083_s1 + $0x3d8] sm:$0xff]  ;;  %v8759_v45 = vpack.c.bf16 %v119_v35, %v118_v32  ;;  %v8761_v47 = vpack.c.bf16 %v137_v40, %v136_v39  ;;  %v9563_v32 = vmov 0.0  }
  0x29   :  { %8748 = vmatpush3.bf16.msra.mxu0 %v8747_v7  ;;  %v43_v41 = vld [vmem:[%s11085_s0 + $0x28] sm:$0xff]  ;;  %v45_v44 = vld [vmem:[%s11085_s0 + $0x38] sm:$0xff]  ;;  %v8791_v46 = vpack.c.bf16 %v151_v37, %v150_v36  ;;  %v120_v48 = vld [vmem:[%s11083_s1 + $0x250] sm:$0xff]  ;;  %v8793_v51 = vpack.c.bf16 %v169_v43, %v168_v42  ;;  %v473_v30 = vand.u32 127, %v472_v29  ;;  %970 = vst.msk [vmem:[#allocation8] sm:$0xff] %vm462_vm7, %v9563_v32 }
  0x2a   :  { %8750 = vmatprep.subr.bf16.mxu0 %v8749_v9  ;;  %385 = vmatprep.mubr.f32.mxu0 %v43_v41  ;;  %v121_v49 = vld [vmem:[%s11083_s1 + $0x258] sm:$0xff]  ;;  %v152_v50 = vld [vmem:[%s11083_s1 + $0x350] sm:$0xff]  ;;  %v138_v53 = vld [vmem:[%s11083_s1 + $0x2e0] sm:$0xff]  ;;  %971 = vst.msk [vmem:[#allocation9] sm:$0xff] %vm462_vm7, %v9563_v32 }
  0x2b   :  { %8780 = vmatpush3.bf16.msra.mxu1 %v8779_v8  ;;  %455 = vmatprep.mubr.f32.mxu1 %v45_v44  ;;  %v153_v52 = vld [vmem:[%s11083_s1 + $0x358] sm:$0xff]  ;;  %v139_v54 = vld [vmem:[%s11083_s1 + $0x2e8] sm:$0xff]  ;;  %v170_v55 = vld [vmem:[%s11083_s1 + $0x3e0] sm:$0xff]  ;;  %v8763_v57 = vpack.c.bf16 %v121_v49, %v120_v48 }
  0x2c   :  { %8782 = vmatprep.subr.bf16.mxu1 %v8781_v13  ;;  %v171_v56 = vld [vmem:[%s11083_s1 + $0x3e8] sm:$0xff]  ;;  %v8795_v58 = vpack.c.bf16 %v153_v52, %v152_v50  ;;  %v8765_v59 = vpack.c.bf16 %v139_v54, %v138_v53  ;;  %v122_v60 = vld [vmem:[%s11083_s1 + $0x260] sm:$0xff]  ;;  %v140_v1 = vld [vmem:[%s11083_s1 + $0x2f0] sm:$0xff] }
  0x2d   :  { %8752 = vmatpush3.bf16.msra.mxu0 %v8751_v19  ;;  %v123_v61 = vld [vmem:[%s11083_s1 + $0x268] sm:$0xff]  ;;  %v154_v62 = vld [vmem:[%s11083_s1 + $0x360] sm:$0xff]  ;;  %v8797_v63 = vpack.c.bf16 %v171_v56, %v170_v55  ;;  %v141_v2 = vld [vmem:[%s11083_s1 + $0x2f8] sm:$0xff] }
  0x2e   :  { %8754 = vmatprep.subr.bf16.mxu0 %v8753_v21  ;;  %v155_v0 = vld [vmem:[%s11083_s1 + $0x368] sm:$0xff]  ;;  %v172_v3 = vld [vmem:[%s11083_s1 + $0x3f0] sm:$0xff]  ;;  %v173_v4 = vld [vmem:[%s11083_s1 + $0x3f8] sm:$0xff]  ;;  %v8767_v5 = vpack.c.bf16 %v123_v61, %v122_v60  ;;  %v8769_v7 = vpack.c.bf16 %v141_v2, %v140_v1 }
  0x2f   :  { %8784 = vmatpush3.bf16.msra.mxu1 %v8783_v20  ;;  %v8799_v6 = vpack.c.bf16 %v155_v0, %v154_v62  ;;  %v124_v8 = vld [vmem:[%s11083_s1 + $0x270] sm:$0xff]  ;;  %v125_v9 = vld [vmem:[%s11083_s1 + $0x278] sm:$0xff]  ;;  %v8801_v11 = vpack.c.bf16 %v173_v4, %v172_v3  ;;  %v522_v13 = vld [vmem:[%s11086_s4] sm:$0xff] }
  0x30   :  { %8786 = vmatprep.subr.bf16.mxu1 %v8785_v25  ;;  %v156_v10 = vld [vmem:[%s11083_s1 + $0x370] sm:$0xff]  ;;  %v157_v12 = vld [vmem:[%s11083_s1 + $0x378] sm:$0xff]  ;;  %v523_v14 = vld [vmem:[%s11086_s4 + $0x8] sm:$0xff]  ;;  %v8771_v15 = vpack.c.bf16 %v125_v9, %v124_v8 }
  0x31   :  { %8756 = vmatpush3.bf16.msra.mxu0 %v8755_v31  ;;  %v8803_v16 = vpack.c.bf16 %v157_v12, %v156_v10  ;;  %v8805_v17 = vpack.c.bf16 %v523_v14, %v522_v13  ;;  %v524_v18 = vld [vmem:[%s11086_s4 + $0x10] sm:$0xff]  ;;  %v525_v19 = vld [vmem:[%s11086_s4 + $0x18] sm:$0xff]  ;;  %v42_v20 = vld [vmem:[%s11085_s0 + $0x20] sm:$0xff] }
  0x32   :  { %8758 = vmatprep.subr.bf16.mxu0 %v8757_v34  ;;  %v44_v21 = vld [vmem:[%s11085_s0 + $0x30] sm:$0xff]  ;;  %v8809_v22 = vpack.c.bf16 %v525_v19, %v524_v18  ;;  %v526_v23 = vld [vmem:[%s11086_s4 + $0x20] sm:$0xff]  ;;  %v527_v24 = vld [vmem:[%s11086_s4 + $0x28] sm:$0xff] }
  0x33   :  { %8788 = vmatpush3.bf16.msra.mxu1 %v8787_v33  ;;  %v8813_v25 = vpack.c.bf16 %v527_v24, %v526_v23  ;;  %v528_v26 = vld [vmem:[%s11086_s4 + $0x30] sm:$0xff]  ;;  %v529_v27 = vld [vmem:[%s11086_s4 + $0x38] sm:$0xff]  ;;  %v677_v44 = vld [vmem:[%s11087_s5] sm:$0xff] }
  0x34   :  { %8790 = vmatprep.subr.bf16.mxu1 %v8789_v38  ;;  %v8817_v28 = vpack.c.bf16 %v529_v27, %v528_v26  ;;  %v679_v48 = vld [vmem:[%s11087_s5 + $0x10] sm:$0xff]  ;;  %v680_v49 = vld [vmem:[%s11087_s5 + $0x18] sm:$0xff]  ;;  %v951_v55 = vld [vmem:[%s11088_s6] sm:$0xff] }
  0x35   :  { %8760 = vmatpush3.bf16.msra.mxu0 %v8759_v45  ;;  %v678_v45 = vld [vmem:[%s11087_s5 + $0x8] sm:$0xff]  ;;  %v10144_v61 = vld [vmem:[#allocation8] sm:$0xff]  ;;  %v7093_v13 = vld [vmem:[%s11088_s6 + $0x60] sm:$0xff] }
  0x36   :  { %8762 = vmatprep.subr.bf16.mxu0 %v8761_v47  ;;  %v9564_v47 = vmov 0.0|0.0   ;;  %v952_v56 = vld [vmem:[%s11088_s6 + $0x8] sm:$0xff]  ;;  %v7087_v9 = vld [vmem:[%s11088_s6 + $0x30] sm:$0xff] }
  0x37   :  { %8792 = vmatpush3.bf16.msra.mxu1 %v8791_v46  ;;  %v8822_v46 = vpack.c.bf16 %v678_v45, %v677_v44  ;;  %v7086_v8 = vld [vmem:[%s11088_s6 + $0x28] sm:$0xff] }
  0x38   :  { %8794 = vmatprep.subr.bf16.mxu1 %v8793_v51  ;;  %v8825_v51 = vpack.c.bf16 %v680_v49, %v679_v48  ;;  %v7094_v14 = vld [vmem:[%s11088_s6 + $0x68] sm:$0xff] }
  0x39   :  { %8764 = vmatpush3.bf16.msra.mxu0 %v8763_v57  ;;  %v953_v57 = vld [vmem:[%s11088_s6 + $0x10] sm:$0xff]  ;;  %v7090_v29 = vld [vmem:[%s11088_s6 + $0x48] sm:$0xff] }
  0x3a   :  { %8766 = vmatprep.subr.bf16.mxu0 %v8765_v59  ;;  %v954_v59 = vld [vmem:[%s11088_s6 + $0x18] sm:$0xff] }
  0x3b   :  { %8796 = vmatpush3.bf16.msra.mxu1 %v8795_v58  ;;  %v10134_v58 = vpack.c.bf16 %v952_v56, %v951_v55  ;;  %v10140_v60 = vpack.c.bf16 %v954_v59, %v953_v57  ;;  %v7075_v57 = vld [vmem:[%s11090_s7] ss:$0 sm:$0xff] }
  0x3c   :  { %8798 = vmatprep.subr.bf16.mxu1 %v8797_v63  ;;  %v7058_v63 = vld [vmem:[%s11089_s2] ss:$0 sm:$0xff] }
  0x3d   :  { %8768 = vmatpush3.bf16.msra.mxu0 %v8767_v5 }
  0x3e   :  { %8770 = vmatprep.subr.bf16.mxu0 %v8769_v7  ;;  %v7085_v7 = vld [vmem:[%s11088_s6 + $0x20] sm:$0xff] }
  0x3f   :  { %8800 = vmatpush3.bf16.msra.mxu1 %v8799_v6  ;;  %v10163_v10 = vpack.c.bf16 %v7086_v8, %v7085_v7 }
  0x40   :  { %8802 = vmatprep.subr.bf16.mxu1 %v8801_v11  ;;  %v7088_v11 = vld [vmem:[%s11088_s6 + $0x38] sm:$0xff] }
  0x41   :  { %8772 = vmatpush3.bf16.msra.mxu0 %v8771_v15  ;;  %v10169_v12 = vpack.c.bf16 %v7088_v11, %v7087_v9  ;;  %v10179_v15 = vpack.c.bf16 %v7094_v14, %v7093_v13 }
  0x42   :  { %8806 = vmatprep.subr.bf16.mxu0 %v8805_v17 }
  0x43   :  { %8804 = vmatpush3.bf16.msra.mxu1 %v8803_v16  ;;  %v7095_v16 = vld [vmem:[%s11088_s6 + $0x70] sm:$0xff] }
  0x44   :  { %386 = vmatmul.mubr.f32.vlgmr.msra.gmra.mrb[2].mxu0 %v42_v20  ;;  %8821 = vmatprep.subr.bf16.mxu1 %v9564_v47 }
  0x45   :  { %8808 = vmatpush3.bf16.msra.mxu0 %v8805_v17  ;;  %v7096_v17 = vld [vmem:[%s11088_s6 + $0x78] sm:$0xff] }
  0x46   :  { %456 = vmatmul.mubr.f32.vlgmr.msra.gmra.mrb[2].mxu1 %v44_v21  ;;  %8810 = vmatprep.subr.bf16.mxu0 %v8809_v22  ;;  %v10191_v18 = vpack.c.bf16 %v7096_v17, %v7095_v16 }
  0x47   :  { %8823 = vmatpush3.bf16.msra.mxu1 %v8822_v46  ;;  %7823 = vmatprep.mubr.msk.f32.mxu1 %vm9565_vm8, %v9563_v32 }
  0x48   :  { %8824 = vmatprep.subr.bf16.mxu1 %v9564_v47 }
  0x49   :  { %8812 = vmatpush3.bf16.msra.mxu0 %v8809_v22 }
  0x4a   :  { %8814 = vmatprep.subr.bf16.mxu0 %v8813_v25 }
  0x4b   :  { %8826 = vmatpush3.bf16.msra.mxu1 %v8825_v51 }
  0x4c   :  { %8839 = vmatprep.subr.bf16.mxu1 %v9564_v47 }
  0x4d   :  { %8816 = vmatpush3.bf16.msra.mxu0 %v8813_v25 }
  0x4e   :  { %8818 = vmatprep.subr.bf16.mxu0 %v8817_v28 }
  0x51   :  { %8820 = vmatpush3.bf16.msra.mxu0 %v8817_v28  ;;  %v7089_v28 = vld [vmem:[%s11088_s6 + $0x40] sm:$0xff] }
  0x52   :  { %8827 = vmatprep.subr.bf16.mxu0 %v9564_v47 }
  0x85   :  { %v476_v31 = vpop.permute.xlu0 %475 }
  0x86   :  { %vm498_vm1 = vcmp.eq.s32.totalorder %v476_v31, %v473_v30  ;;  %v7091_v31 = vld [vmem:[%s11088_s6 + $0x50] sm:$0xff] }
  0x87   :  { %v7059_v33 = vsel %vm498_vm1, 1.0, %v9563_v32 }
  0x88   :  { %7803 = vmatprep.mubr.msk.f32.mxu0 %vm530_vm0, %v7059_v33  ;;  %v7092_v33 = vld [vmem:[%s11088_s6 + $0x58] sm:$0xff] }
  0x89   :  { %v479_v34 = vpop.permute.xlu0 %478 }
  0x8a   :  { %vm499_vm2 = vcmp.eq.s32.totalorder %v479_v34, %v473_v30 }
  0x8b   :  { %v7060_v35 = vsel %vm499_vm2, 1.0, %v9563_v32 }
  0x8c   :  { %7804 = vmatmul.mubr.msk.f32.vlgmr.msra.gmra.mrb[4].mxu0 %vm530_vm0, %v7060_v35  ;;  %v10225_v35 = vpack.c.bf16 %v7092_v33, %v7091_v31 }
  0x8d   :  { %v482_v36 = vpop.permute.xlu1 %481  ;;  %8829 = vmatpush3.bf16.msra.mxu0 %v10134_v58 }
  0x8e   :  { %vm500_vm3 = vcmp.eq.s32.totalorder %v482_v36, %v473_v30  ;;  %8830 = vmatprep.subr.bf16.mxu0 %v9564_v47 }
  0x8f   :  { %v7061_v37 = vsel %vm500_vm3, 1.0, %v9563_v32 }
  0x90   :  { %7806 = vmatprep.mubr.msk.f32.mxu0 %vm530_vm0, %v7061_v37 }
  0x91   :  { %v485_v38 = vpop.permute.xlu1 %484  ;;  %8832 = vmatpush3.bf16.msra.mxu0 %v10140_v60 }
  0x92   :  { %vm501_vm4 = vcmp.eq.s32.totalorder %v485_v38, %v473_v30  ;;  %8833 = vmatprep.subr.bf16.mxu0 %v9564_v47 }
  0x93   :  { %v7062_v39 = vsel %vm501_vm4, 1.0, %v9563_v32 }
  0x94   :  { %7807 = vmatmul.mubr.msk.f32.gmra.mrb[6].mxu0 %vm530_vm0, %v7062_v39 }
  0x97   :  { %v488_v40 = vpop.permute.xlu0 %487 }
  0x98   :  { %vm502_vm5 = vcmp.eq.s32.totalorder %v488_v40, %v473_v30  ;;  %v491_v42 = vpop.permute.xlu1 %490 }
  0x99   :  { %v7063_v41 = vsel %vm502_vm5, 1.0, %v9563_v32  ;;  %vm503_vm6 = vcmp.eq.s32.totalorder %v491_v42, %v473_v30 }
  0x9a   :  { %7809 = vmatprep.mubr.msk.f32.mxu0 %vm530_vm0, %v7063_v41  ;;  %v7064_v43 = vsel %vm503_vm6, 1.0, %v9563_v32 }
  0x9b   :  { %7810 = vmatmul.mubr.msk.f32.gmra.mrb[8].mxu0 %vm530_vm0, %v7064_v43 }
  0x9f   :  { %v494_v50 = vpop.permute.xlu0 %493 }
  0xa0   :  { %vm504_vm9 = vcmp.eq.s32.totalorder %v494_v50, %v473_v30  ;;  %v497_v52 = vpop.permute.xlu1 %496 }
  0xa1   :  { %v7065_v53 = vsel %vm504_vm9, 1.0, %v9563_v32  ;;  %vm505_vm10 = vcmp.eq.s32.totalorder %v497_v52, %v473_v30  ;;  %v10213_v30 = vpack.c.bf16 %v7090_v29, %v7089_v28 }
  0xa2   :  { %v7066_v54 = vsel %vm505_vm10, 1.0, %v9563_v32  ;;  %7812 = vmatprep.mubr.msk.f32.mxu0 %vm530_vm0, %v7065_v53 }
  0xa3   :  { %7813 = vmatmul.mubr.msk.f32.gmra.mrb[10].mxu0 %vm530_vm0, %v7066_v54 }
  0xa4   :  { %7858 = vmatprep.mubr.msk.f32.mxu0 %vm9565_vm8, %v9563_v32 }
  0xa7   :  { %7859 = vmatmul.mubr.msk.f32.vlgmr.msra.gmra.mrb[12].mxu0 %vm462_vm7, %v10144_v61 }
  0xa8   :  { %7869 = vmatprep.mubr.msk.f32.mxu0 %vm9565_vm8, %v9563_v32  ;;  %8835 = vmatpush3.bf16.msra.mxu0 %v10163_v10 }
  0xa9   :  { %8836 = vmatprep.subr.bf16.mxu0 %v9564_v47 }
  0xac   :  { %8838 = vmatpush3.bf16.msra.mxu0 %v10169_v12 }
  0xad   :  { %8845 = vmatprep.subr.bf16.mxu0 %v9564_v47 }
  0xaf   :  { %7870 = vmatmul.mubr.msk.f32.vlgmr.msra.gmra.mrb[14].mxu0 %vm462_vm7, %v10144_v61 }
  0xb0   :  { %8847 = vmatpush3.bf16.msra.mxu0 %v10179_v15  ;;  %7891 = vmatprep.mubr.msk.f32.mxu0 %vm9565_vm8, %v9563_v32 }
  0xb1   :  { %8848 = vmatprep.subr.bf16.mxu0 %v9564_v47 }
  0xb4   :  { %8850 = vmatpush3.bf16.msra.mxu0 %v10191_v18 }
  0xb5   :  { %8857 = vmatprep.subr.bf16.mxu0 %v9564_v47 }
  0xb7   :  { %7892 = vmatmul.mubr.msk.f32.vlgmr.msra.gmra.mrb[16].mxu0 %vm462_vm7, %v10144_v61 }
  0xb8   :  { %8859 = vmatpush3.bf16.msra.mxu0 %v10163_v10  ;;  %7913 = vmatprep.mubr.msk.f32.mxu0 %vm9565_vm8, %v9563_v32 }
  0xb9   :  { %8860 = vmatprep.subr.bf16.mxu0 %v9564_v47 }
  0xbc   :  { %8862 = vmatpush3.bf16.msra.mxu0 %v10169_v12 }
  0xbd   :  { %8869 = vmatprep.subr.bf16.mxu0 %v9564_v47 }
  0xf7   :  { %v7277_v62 = vpop.f32.mrb[0].mxu0 }
  0xf8   :  { %v7278_v0 = vpop.f32.mrb[1].mxu0 }
  0xf9   :  { %v7312_v1 = vpop.f32.mrb[0].mxu1  ;;  %v7279_v2 = vadd.f32 %v7278_v0, %v7277_v62 }
  0xfa   :  { %v7313_v3 = vpop.f32.mrb[1].mxu1 }
  0xfb   :  { %v7314_v4 = vadd.f32 %v7313_v3, %v7312_v1  ;;  %v248_v5 = vadd.f32 %v7279_v2, %v7058_v63 }
  0xfd   :  { %v318_v6 = vadd.f32 %v7314_v4, %v248_v5 }
 0x117   :  { %v7347_v19 = vpop.f32.mrb[2].mxu0 }
 0x118   :  { %v7348_v20 = vpop.f32.mrb[3].mxu0 }
 0x119   :  { %v7382_v21 = vpop.f32.mrb[2].mxu1  ;;  %v7349_v22 = vadd.f32 %v7348_v20, %v7347_v19 }
 0x11a   :  { %v7383_v23 = vpop.f32.mrb[3].mxu1 }
 0x11b   :  { %v7384_v24 = vadd.f32 %v7383_v23, %v7382_v21  ;;  %v388_v25 = vadd.f32 %v7349_v22, %v318_v6 }
 0x11d   :  { %v458_v26 = vadd.f32 %v7384_v24, %v388_v25 }
 0x11f   :  { %v461_v27 = vmax.f32 %v458_v26, 0.0 }
 0x121   :  { %463 = vst.msk [vmem:[#allocation2] sm:$0xff] %vm462_vm7, %v461_v27 }
 0x128   :  { %v668_v34 = vld [vmem:[#allocation2] sm:$0xff] }
 0x129   :  { %7824 = vmatmul.mubr.msk.f32.vlgmr.msra.gmra.mrb[4].mxu1 %vm462_vm7, %v668_v34 }
 0x12a   :  { %7826 = vmatprep.mubr.msk.f32.mxu1 %vm9565_vm8, %v9563_v32  ;;  %8841 = vmatpush3.bf16.msra.mxu1 %v10213_v30 }
 0x12b   :  { %8842 = vmatprep.subr.bf16.mxu1 %v9564_v47 }
 0x12e   :  { %8844 = vmatpush3.bf16.msra.mxu1 %v10225_v35 }
 0x12f   :  { %8851 = vmatprep.subr.bf16.mxu1 %v9564_v47 }
 0x15f   :  { %v7805_v36 = vpop.f32.mrb[4].mxu0 }
 0x160   :  { %661 = vst.msk [vmem:[#allocation2 + $0x10] sm:$0xff] %vm462_vm7, %v7805_v36  ;;  %v621_v37 = vpop.f32.mrb[5].mxu0 }
 0x161   :  { %660 = vst.msk [vmem:[#allocation2 + $0x8] sm:$0xff] %vm462_vm7, %v621_v37 }
 0x167   :  { %v7808_v38 = vpop.f32.mrb[6].mxu0  ;;  %v670_v41 = vld [vmem:[#allocation2 + $0x10] sm:$0xff] }
 0x168   :  { %v669_v39 = vld [vmem:[#allocation2 + $0x8] sm:$0xff]  ;;  %663 = vst.msk [vmem:[#allocation2 + $0x20] sm:$0xff] %vm462_vm7, %v7808_v38  ;;  %v631_v40 = vpop.f32.mrb[7].mxu0 }
 0x169   :  { %7827 = vmatmul.mubr.msk.f32.gmra.mrb[6].mxu1 %vm462_vm7, %v669_v39  ;;  %662 = vst.msk [vmem:[#allocation2 + $0x18] sm:$0xff] %vm462_vm7, %v631_v40 }
 0x16a   :  { %7829 = vmatprep.mubr.msk.f32.mxu1 %vm9565_vm8, %v9563_v32 }
 0x16d   :  { %7830 = vmatmul.mubr.msk.f32.gmra.mrb[8].mxu1 %vm462_vm7, %v670_v41 }
 0x16e   :  { %7832 = vmatprep.mubr.msk.f32.mxu1 %vm9565_vm8, %v9563_v32  ;;  %v7811_v42 = vpop.f32.mrb[8].mxu0 }
 0x16f   :  { %665 = vst.msk [vmem:[#allocation2 + $0x30] sm:$0xff] %vm462_vm7, %v7811_v42  ;;  %v641_v44 = vpop.f32.mrb[9].mxu0  ;;  %v672_v45 = vld [vmem:[#allocation2 + $0x20] sm:$0xff] }
 0x170   :  { %v671_v43 = vld [vmem:[#allocation2 + $0x18] sm:$0xff]  ;;  %664 = vst.msk [vmem:[#allocation2 + $0x28] sm:$0xff] %vm462_vm7, %v641_v44 }
 0x171   :  { %7833 = vmatmul.mubr.msk.f32.gmra.mrb[10].mxu1 %vm462_vm7, %v671_v43 }
 0x172   :  { %7835 = vmatprep.mubr.msk.f32.mxu1 %vm9565_vm8, %v9563_v32 }
 0x175   :  { %7836 = vmatmul.mubr.msk.f32.gmra.mrb[12].mxu1 %vm462_vm7, %v672_v45 }
 0x176   :  { %7838 = vmatprep.mubr.msk.f32.mxu1 %vm9565_vm8, %v9563_v32  ;;  %v7814_v48 = vpop.f32.mrb[10].mxu0  ;;  %v674_v50 = vld [vmem:[#allocation2 + $0x30] sm:$0xff] }
 0x177   :  { %v673_v46 = vld [vmem:[#allocation2 + $0x28] sm:$0xff]  ;;  %667 = vst.msk [vmem:[#allocation2 + $0x40] sm:$0xff] %vm462_vm7, %v7814_v48  ;;  %v651_v49 = vpop.f32.mrb[11].mxu0 }
 0x178   :  { %666 = vst.msk [vmem:[#allocation2 + $0x38] sm:$0xff] %vm462_vm7, %v651_v49 }
 0x179   :  { %7839 = vmatmul.mubr.msk.f32.gmra.mrb[14].mxu1 %vm462_vm7, %v673_v46 }
 0x17a   :  { %7841 = vmatprep.mubr.msk.f32.mxu1 %vm9565_vm8, %v9563_v32  ;;  %v10259_v53 = vpop.f32.mrb[12].mxu0 }
 0x17b   :  { %v7860_v54 = vpop.f32.mrb[13].mxu0 }
 0x17d   :  { %7842 = vmatmul.mubr.msk.f32.gmra.mrb[16].mxu1 %vm462_vm7, %v674_v50 }
 0x17e   :  { %7844 = vmatprep.mubr.msk.f32.mxu1 %vm9565_vm8, %v9563_v32  ;;  %v676_v52 = vld [vmem:[#allocation2 + $0x40] sm:$0xff] }
 0x17f   :  { %v675_v51 = vld [vmem:[#allocation2 + $0x38] sm:$0xff] }
 0x181   :  { %7845 = vmatmul.mubr.msk.f32.gmra.mrb[18].mxu1 %vm462_vm7, %v675_v51 }
 0x182   :  { %7847 = vmatprep.mubr.msk.f32.mxu1 %vm9565_vm8, %v9563_v32  ;;  %v10272_v55 = vpop.f32.mrb[14].mxu0 }
 0x183   :  { %v7871_v56 = vpop.f32.mrb[15].mxu0 }
 0x185   :  { %7848 = vmatmul.mubr.msk.f32.gmra.mrb[20].mxu1 %vm462_vm7, %v676_v52 }
 0x186   :  { %7880 = vmatprep.mubr.msk.f32.mxu1 %vm9565_vm8, %v9563_v32 }
 0x189   :  { %7881 = vmatmul.mubr.msk.f32.vlgmr.msra.gmra.mrb[22].mxu1 %vm462_vm7, %v10144_v61 }
 0x18a   :  { %8853 = vmatpush3.bf16.msra.mxu1 %v10134_v58  ;;  %7902 = vmatprep.mubr.msk.f32.mxu1 %vm9565_vm8, %v9563_v32  ;;  %v10277_v63 = vpop.f32.mrb[16].mxu0 }
 0x18b   :  { %8854 = vmatprep.subr.bf16.mxu1 %v9564_v47  ;;  %v7893_v0 = vpop.f32.mrb[17].mxu0 }
 0x18e   :  { %8856 = vmatpush3.bf16.msra.mxu1 %v10140_v60 }
 0x18f   :  { %8863 = vmatprep.subr.bf16.mxu1 %v9564_v47 }
 0x1fc   :  { %v781_v59 = vpop.f32.mrb[4].mxu1 }
 0x1fd   :  { %v782_v61 = vadd.f32 %v7075_v57, %v781_v59  ;;  %v7825_v62 = vpop.f32.mrb[5].mxu1  ;;  %v1283_v59 = vld [vmem:[#allocation9] sm:$0xff] }
 0x1ff   :  { %825 = vst.msk [vmem:[#allocation3] sm:$0xff] %vm462_vm7, %v782_v61  ;;  %879 = vrot.lane.b32.xlu1 %v782_v61, %s9566_s23  ;;  %843 = vrot.lane.b32.xlu0 %v782_v61, %s9567_s24 }
 0x203   :  { %915 = vrot.lane.b32.xlu0 %v782_v61, %s9568_s25 }
 0x206   :  { %v973_v31 = vld [vmem:[#allocation3] sm:$0xff] }
 0x207   :  { %v1047_v34 = vadd.f32 %v10259_v53, %v973_v31 }
 0x209   :  { %v7101_v36 = vmul.f32 -1.442695, %v1047_v34 }
 0x20b   :  { %9274 = vpow2.f32 %v7101_v36 }
 0x215   :  { %v9275_v39 = vpop.eup %9274 }
 0x216   :  { %v1267_v41 = vadd.f32 1.0, %v9275_v39 }
 0x218   :  { %9276 = vrcp.f32 %v1267_v41 }
 0x222   :  { %v9277_v51 = vpop.eup %9276 }
 0x23c   :  { %v786_v1 = vpop.f32.mrb[6].mxu1 }
 0x23d   :  { %v787_v2 = vadd.f32 %v7075_v57, %v786_v1  ;;  %v7828_v3 = vpop.f32.mrb[7].mxu1 }
 0x23f   :  { %826 = vst.msk [vmem:[#allocation3 + $0x8] sm:$0xff] %vm462_vm7, %v787_v2  ;;  %881 = vrot.lane.b32.xlu0 %v787_v2, %s9566_s23  ;;  %845 = vrot.lane.b32.xlu1 %v787_v2, %s9567_s24 }
 0x240   :  { %v791_v4 = vpop.f32.mrb[8].mxu1 }
 0x241   :  { %v792_v5 = vadd.f32 %v7075_v57, %v791_v4  ;;  %v7831_v6 = vpop.f32.mrb[9].mxu1 }
 0x243   :  { %827 = vst.msk [vmem:[#allocation3 + $0x10] sm:$0xff] %vm462_vm7, %v792_v5  ;;  %917 = vrot.lane.b32.xlu1 %v787_v2, %s9568_s25  ;;  %847 = vrot.lane.b32.xlu0 %v792_v5, %s9567_s24 }
 0x244   :  { %v796_v7 = vpop.f32.mrb[10].mxu1 }
 0x245   :  { %v797_v8 = vadd.f32 %v7075_v57, %v796_v7  ;;  %v7834_v9 = vpop.f32.mrb[11].mxu1 }
 0x246   :  { %v1293_v34 = vld [vmem:[#allocation3 + $0x8] sm:$0xff] }
 0x247   :  { %883 = vrot.lane.b32.xlu1 %v792_v5, %s9566_s23  ;;  %919 = vrot.lane.b32.xlu0 %v792_v5, %s9568_s25  ;;  %828 = vst.msk [vmem:[#allocation3 + $0x18] sm:$0xff] %vm462_vm7, %v797_v8 }
 0x248   :  { %v801_v11 = vpop.f32.mrb[12].mxu1 }
 0x249   :  { %v802_v13 = vadd.f32 %v7075_v57, %v801_v11  ;;  %v7837_v14 = vpop.f32.mrb[13].mxu1 }
 0x24b   :  { %885 = vrot.lane.b32.xlu0 %v797_v8, %s9566_s23  ;;  %849 = vrot.lane.b32.xlu1 %v797_v8, %s9567_s24  ;;  %829 = vst.msk [vmem:[#allocation3 + $0x20] sm:$0xff] %vm462_vm7, %v802_v13 }
 0x24c   :  { %v806_v16 = vpop.f32.mrb[14].mxu1 }
 0x24d   :  { %v807_v17 = vadd.f32 %v7075_v57, %v806_v16  ;;  %v7840_v19 = vpop.f32.mrb[15].mxu1 }
 0x24f   :  { %921 = vrot.lane.b32.xlu1 %v797_v8, %s9568_s25  ;;  %851 = vrot.lane.b32.xlu0 %v802_v13, %s9567_s24  ;;  %830 = vst.msk [vmem:[#allocation3 + $0x28] sm:$0xff] %vm462_vm7, %v807_v17 }
 0x250   :  { %v811_v20 = vpop.f32.mrb[16].mxu1 }
 0x251   :  { %v812_v21 = vadd.f32 %v7075_v57, %v811_v20  ;;  %v7843_v22 = vpop.f32.mrb[17].mxu1 }
 0x253   :  { %887 = vrot.lane.b32.xlu1 %v802_v13, %s9566_s23  ;;  %923 = vrot.lane.b32.xlu0 %v802_v13, %s9568_s25  ;;  %831 = vst.msk [vmem:[#allocation3 + $0x30] sm:$0xff] %vm462_vm7, %v812_v21 }
 0x254   :  { %v816_v23 = vpop.f32.mrb[18].mxu1 }
 0x255   :  { %v817_v24 = vadd.f32 %v7075_v57, %v816_v23  ;;  %v7846_v25 = vpop.f32.mrb[19].mxu1 }
 0x257   :  { %889 = vrot.lane.b32.xlu0 %v807_v17, %s9566_s23  ;;  %853 = vrot.lane.b32.xlu1 %v807_v17, %s9567_s24  ;;  %832 = vst.msk [vmem:[#allocation3 + $0x38] sm:$0xff] %vm462_vm7, %v817_v24 }
 0x258   :  { %v821_v26 = vpop.f32.mrb[20].mxu1 }
 0x259   :  { %v822_v27 = vadd.f32 %v7075_v57, %v821_v26  ;;  %v7849_v28 = vpop.f32.mrb[21].mxu1 }
 0x25b   :  { %925 = vrot.lane.b32.xlu1 %v807_v17, %s9568_s25  ;;  %855 = vrot.lane.b32.xlu0 %v812_v21, %s9567_s24  ;;  %833 = vst.msk [vmem:[#allocation3 + $0x40] sm:$0xff] %vm462_vm7, %v822_v27 }
 0x25c   :  { %v1187_v29 = vpop.f32.mrb[22].mxu1 }
 0x25d   :  { %v7882_v33 = vpop.f32.mrb[23].mxu1 }
 0x25f   :  { %891 = vrot.lane.b32.xlu1 %v812_v21, %s9566_s23  ;;  %927 = vrot.lane.b32.xlu0 %v812_v21, %s9568_s25 }
 0x263   :  { %893 = vrot.lane.b32.xlu0 %v817_v24, %s9566_s23  ;;  %857 = vrot.lane.b32.xlu1 %v817_v24, %s9567_s24 }
 0x267   :  { %929 = vrot.lane.b32.xlu1 %v817_v24, %s9568_s25  ;;  %859 = vrot.lane.b32.xlu0 %v822_v27, %s9567_s24 }
 0x26b   :  { %895 = vrot.lane.b32.xlu1 %v822_v27, %s9566_s23  ;;  %931 = vrot.lane.b32.xlu0 %v822_v27, %s9568_s25 }
 0x271   :  { %v880_v37 = vpop.permute.xlu1 %879  ;;  %v844_v38 = vpop.permute.xlu0 %843 }
 0x272   :  { %906 = vst.msk [vmem:[#allocation5] sm:$0xff] %vm462_vm7, %v880_v37  ;;  %870 = vst.msk [vmem:[#allocation4] sm:$0xff] %vm462_vm7, %v844_v38 }
 0x275   :  { %v916_v40 = vpop.permute.xlu0 %915 }
 0x276   :  { %942 = vst.msk [vmem:[#allocation6] sm:$0xff] %vm462_vm7, %v916_v40 }
 0x279   :  { %v1048_v42 = vld [vmem:[#allocation4] sm:$0xff]  ;;  %v1120_v43 = vld [vmem:[#allocation5] sm:$0xff] }
 0x27a   :  { %v1119_v44 = vadd.f32 %v10272_v55, %v1048_v42  ;;  %v1191_v45 = vadd.f32 %v1187_v29, %v1120_v43 }
 0x27c   :  { %v7102_v46 = vmul.f32 -1.442695, %v1119_v44  ;;  %9278 = vtanh.f32 %v1191_v45 }
 0x27d   :  { %v1192_v48 = vld [vmem:[#allocation6] sm:$0xff] }
 0x27e   :  { %9280 = vpow2.f32 %v7102_v46  ;;  %v1263_v49 = vadd.f32 %v10277_v63, %v1192_v48 }
 0x280   :  { %v7103_v50 = vmul.f32 -1.442695, %v1263_v49 }
 0x282   :  { %9282 = vpow2.f32 %v7103_v50 }
 0x286   :  { %v9279_v52 = vpop.eup %9278 }
 0x287   :  { %v1285_v53 = vmul.f32 %v9279_v52, %v9277_v51 }
 0x288   :  { %v9281_v54 = vpop.eup %9280 }
 0x289   :  { %v1273_v56 = vadd.f32 1.0, %v9281_v54 }
 0x28b   :  { %9284 = vrcp.f32 %v1273_v56 }
 0x28c   :  { %v9283_v57 = vpop.eup %9282 }
 0x28d   :  { %v1280_v55 = vadd.f32 1.0, %v9283_v57 }
 0x28f   :  { %9286 = vrcp.f32 %v1280_v55 }
 0x295   :  { %v9285_v61 = vpop.eup %9284 }
 0x296   :  { %v1284_v62 = vmul.f32 %v9285_v61, %v1283_v59 }
 0x298   :  { %v1286_v0 = vadd.f32 %v1285_v53, %v1284_v62 }
 0x299   :  { %v9287_v1 = vpop.eup %9286 }
 0x29a   :  { %9288 = vtanh.f32 %v1286_v0  ;;  %1289 = vst.msk [vmem:[#allocation9] sm:$0xff] %vm462_vm7, %v1286_v0 }
 0x2a4   :  { %v9289_v63 = vpop.eup %9288 }
 0x2a5   :  { %v1288_v2 = vmul.f32 %v9289_v63, %v9287_v1  ;;  %v1603_v63 = vld [vmem:[#allocation9] sm:$0xff] }
 0x2a7   :  { %1290 = vst.msk [vmem:[#allocation8] sm:$0xff] %vm462_vm7, %v1288_v2  ;;  %1291 = vst.msk [vmem:[#allocation7] sm:$0xff] %vm462_vm7, %v1288_v2 }
 0x2ae   :  { %v1292_v3 = vld [vmem:[#allocation8] sm:$0xff] }
 0x2af   :  { %7903 = vmatmul.mubr.msk.f32.vlgmr.msra.gmra.mrb[24].mxu1 %vm462_vm7, %v1292_v3  ;;  %7914 = vmatmul.mubr.msk.f32.vlgmr.msra.gmra.mrb[18].mxu0 %vm462_vm7, %v1292_v3 }
 0x2b0   :  { %8865 = vmatpush3.bf16.msra.mxu1 %v10213_v30  ;;  %8871 = vmatpush3.bf16.msra.mxu0 %v10179_v15 }
 0x2b1   :  { %8866 = vmatprep.subr.bf16.mxu1 %v9564_v47  ;;  %8872 = vmatprep.subr.bf16.mxu0 %v9564_v47  ;;  %v882_v4 = vpop.permute.xlu0 %881  ;;  %v846_v5 = vpop.permute.xlu1 %845 }
 0x2b2   :  { %7924 = vmatprep.mubr.msk.f32.mxu1 %vm9565_vm8, %v9563_v32  ;;  %7935 = vmatprep.mubr.msk.f32.mxu0 %vm9565_vm8, %v9563_v32  ;;  %907 = vst.msk [vmem:[#allocation5 + $0x8] sm:$0xff] %vm462_vm7, %v882_v4  ;;  %871 = vst.msk [vmem:[#allocation4 + $0x8] sm:$0xff] %vm462_vm7, %v846_v5 }
 0x2b4   :  { %8868 = vmatpush3.bf16.msra.mxu1 %v10225_v35  ;;  %8874 = vmatpush3.bf16.msra.mxu0 %v10191_v18 }
 0x2b5   :  { %8875 = vmatprep.subr.bf16.mxu1 %v9564_v47  ;;  %8881 = vmatprep.subr.bf16.mxu0 %v9564_v47  ;;  %v918_v6 = vpop.permute.xlu1 %917  ;;  %v848_v7 = vpop.permute.xlu0 %847 }
 0x2b6   :  { %943 = vst.msk [vmem:[#allocation6 + $0x8] sm:$0xff] %vm462_vm7, %v918_v6  ;;  %872 = vst.msk [vmem:[#allocation4 + $0x10] sm:$0xff] %vm462_vm7, %v848_v7 }
 0x2b7   :  { %7925 = vmatmul.mubr.msk.f32.vlgmr.msra.gmra.mrb[26].mxu1 %vm462_vm7, %v1292_v3  ;;  %7936 = vmatmul.mubr.msk.f32.vlgmr.msra.gmra.mrb[20].mxu0 %vm462_vm7, %v1292_v3 }
 0x2b8   :  { %8877 = vmatpush3.bf16.msra.mxu1 %v10134_v58  ;;  %8883 = vmatpush3.bf16.msra.mxu0 %v10163_v10 }
 0x2b9   :  { %8878 = vmatprep.subr.bf16.mxu1 %v9564_v47  ;;  %8884 = vmatprep.subr.bf16.mxu0 %v9564_v47  ;;  %v884_v8 = vpop.permute.xlu1 %883  ;;  %v920_v9 = vpop.permute.xlu0 %919  ;;  %v1368_v37 = vld [vmem:[#allocation4 + $0x8] sm:$0xff]  ;;  %v1440_v52 = vld [vmem:[#allocation5 + $0x8] sm:$0xff] }
 0x2ba   :  { %7946 = vmatprep.mubr.msk.f32.mxu1 %vm9565_vm8, %v9563_v32  ;;  %7957 = vmatprep.mubr.msk.f32.mxu0 %vm9565_vm8, %v9563_v32  ;;  %908 = vst.msk [vmem:[#allocation5 + $0x10] sm:$0xff] %vm462_vm7, %v884_v8  ;;  %944 = vst.msk [vmem:[#allocation6 + $0x10] sm:$0xff] %vm462_vm7, %v920_v9 }
 0x2bc   :  { %8880 = vmatpush3.bf16.msra.mxu1 %v10140_v60  ;;  %8886 = vmatpush3.bf16.msra.mxu0 %v10169_v12 }
 0x2bd   :  { %8887 = vmatprep.subr.bf16.mxu1 %v9564_v47  ;;  %8893 = vmatprep.subr.bf16.mxu0 %v9564_v47  ;;  %v886_v11 = vpop.permute.xlu0 %885  ;;  %v850_v13 = vpop.permute.xlu1 %849  ;;  %v1512_v46 = vld [vmem:[#allocation6 + $0x8] sm:$0xff] }
 0x2be   :  { %909 = vst.msk [vmem:[#allocation5 + $0x18] sm:$0xff] %vm462_vm7, %v886_v11  ;;  %873 = vst.msk [vmem:[#allocation4 + $0x18] sm:$0xff] %vm462_vm7, %v850_v13  ;;  %v1613_v11 = vld [vmem:[#allocation3 + $0x10] sm:$0xff] }
 0x2c1   :  { %v922_v14 = vpop.permute.xlu1 %921  ;;  %v852_v16 = vpop.permute.xlu0 %851 }
 0x2c2   :  { %945 = vst.msk [vmem:[#allocation6 + $0x18] sm:$0xff] %vm462_vm7, %v922_v14  ;;  %874 = vst.msk [vmem:[#allocation4 + $0x20] sm:$0xff] %vm462_vm7, %v852_v16  ;;  %v1688_v14 = vld [vmem:[#allocation4 + $0x10] sm:$0xff] }
 0x2c5   :  { %v888_v17 = vpop.permute.xlu1 %887  ;;  %v924_v19 = vpop.permute.xlu0 %923 }
 0x2c6   :  { %910 = vst.msk [vmem:[#allocation5 + $0x20] sm:$0xff] %vm462_vm7, %v888_v17  ;;  %946 = vst.msk [vmem:[#allocation6 + $0x20] sm:$0xff] %vm462_vm7, %v924_v19 }
 0x2c9   :  { %v890_v20 = vpop.permute.xlu0 %889  ;;  %v854_v21 = vpop.permute.xlu1 %853 }
 0x2ca   :  { %911 = vst.msk [vmem:[#allocation5 + $0x28] sm:$0xff] %vm462_vm7, %v890_v20  ;;  %875 = vst.msk [vmem:[#allocation4 + $0x28] sm:$0xff] %vm462_vm7, %v854_v21 }
 0x2cd   :  { %v926_v22 = vpop.permute.xlu1 %925  ;;  %v856_v23 = vpop.permute.xlu0 %855 }
 0x2ce   :  { %947 = vst.msk [vmem:[#allocation6 + $0x28] sm:$0xff] %vm462_vm7, %v926_v22  ;;  %876 = vst.msk [vmem:[#allocation4 + $0x30] sm:$0xff] %vm462_vm7, %v856_v23 }
 0x2d1   :  { %v892_v24 = vpop.permute.xlu1 %891  ;;  %v928_v25 = vpop.permute.xlu0 %927 }
 0x2d2   :  { %912 = vst.msk [vmem:[#allocation5 + $0x30] sm:$0xff] %vm462_vm7, %v892_v24  ;;  %948 = vst.msk [vmem:[#allocation6 + $0x30] sm:$0xff] %vm462_vm7, %v928_v25  ;;  %v1832_v25 = vld [vmem:[#allocation6 + $0x10] sm:$0xff] }
 0x2d5   :  { %v894_v26 = vpop.permute.xlu0 %893  ;;  %v858_v27 = vpop.permute.xlu1 %857 }
 0x2d6   :  { %913 = vst.msk [vmem:[#allocation5 + $0x38] sm:$0xff] %vm462_vm7, %v894_v26  ;;  %877 = vst.msk [vmem:[#allocation4 + $0x38] sm:$0xff] %vm462_vm7, %v858_v27 }
 0x2d9   :  { %v930_v28 = vpop.permute.xlu1 %929  ;;  %v860_v29 = vpop.permute.xlu0 %859 }
 0x2da   :  { %949 = vst.msk [vmem:[#allocation6 + $0x38] sm:$0xff] %vm462_vm7, %v930_v28  ;;  %878 = vst.msk [vmem:[#allocation4 + $0x40] sm:$0xff] %vm462_vm7, %v860_v29 }
 0x2dd   :  { %v896_v31 = vpop.permute.xlu1 %895  ;;  %v932_v33 = vpop.permute.xlu0 %931 }
 0x2de   :  { %914 = vst.msk [vmem:[#allocation5 + $0x40] sm:$0xff] %vm462_vm7, %v896_v31  ;;  %950 = vst.msk [vmem:[#allocation6 + $0x40] sm:$0xff] %vm462_vm7, %v932_v33  ;;  %v1760_v31 = vld [vmem:[#allocation5 + $0x10] sm:$0xff] }
 0x382   :  { %v1363_v36 = vpop.f32.mrb[24].mxu1  ;;  %v1435_v38 = vpop.f32.mrb[18].mxu0 }
 0x383   :  { %v1367_v39 = vadd.f32 %v1363_v36, %v1293_v34  ;;  %v1439_v40 = vadd.f32 %v1435_v38, %v1368_v37  ;;  %v7904_v41 = vpop.f32.mrb[25].mxu1  ;;  %v7915_v42 = vpop.f32.mrb[19].mxu0 }
 0x385   :  { %v7108_v43 = vmul.f32 -1.442695, %v1367_v39  ;;  %v7109_v44 = vmul.f32 -1.442695, %v1439_v40 }
 0x387   :  { %9290 = vpow2.f32 %v7108_v43 }
 0x388   :  { %9292 = vpow2.f32 %v7109_v44 }
 0x38a   :  { %v1507_v45 = vpop.f32.mrb[26].mxu1  ;;  %v1579_v48 = vpop.f32.mrb[20].mxu0 }
 0x38b   :  { %v1583_v49 = vadd.f32 %v1579_v48, %v1512_v46  ;;  %v7926_v50 = vpop.f32.mrb[27].mxu1  ;;  %v7937_v51 = vpop.f32.mrb[21].mxu0  ;;  %v1511_v54 = vadd.f32 %v1507_v45, %v1440_v52 }
 0x38d   :  { %v7110_v53 = vmul.f32 -1.442695, %v1583_v49 }
 0x38f   :  { %9294 = vpow2.f32 %v7110_v53 }
 0x390   :  { %9296 = vtanh.f32 %v1511_v54  ;;  %v1933_v54 = vld [vmem:[#allocation3 + $0x18] sm:$0xff] }
 0x391   :  { %v9291_v56 = vpop.eup %9290 }
 0x392   :  { %v9293_v57 = vpop.eup %9292  ;;  %v1587_v59 = vadd.f32 1.0, %v9291_v56 }
 0x393   :  { %v1593_v61 = vadd.f32 1.0, %v9293_v57  ;;  %v2008_v57 = vld [vmem:[#allocation4 + $0x18] sm:$0xff] }
 0x394   :  { %9298 = vrcp.f32 %v1587_v59 }
 0x395   :  { %9300 = vrcp.f32 %v1593_v61 }
 0x399   :  { %v9295_v55 = vpop.eup %9294 }
 0x39a   :  { %v9297_v62 = vpop.eup %9296  ;;  %v1600_v3 = vadd.f32 1.0, %v9295_v55 }
 0x39c   :  { %9302 = vrcp.f32 %v1600_v3  ;;  %v2152_v3 = vld [vmem:[#allocation6 + $0x18] sm:$0xff] }
 0x39e   :  { %v9299_v0 = vpop.eup %9298 }
 0x39f   :  { %v9301_v1 = vpop.eup %9300  ;;  %v1605_v2 = vmul.f32 %v9299_v0, %v9297_v62 }
 0x3a0   :  { %v1604_v4 = vmul.f32 %v9301_v1, %v1603_v63 }
 0x3a2   :  { %v1606_v5 = vadd.f32 %v1605_v2, %v1604_v4 }
 0x3a4   :  { %9304 = vtanh.f32 %v1606_v5  ;;  %1609 = vst.msk [vmem:[#allocation9] sm:$0xff] %vm462_vm7, %v1606_v5 }
 0x3a6   :  { %v9303_v6 = vpop.eup %9302 }
 0x3ab   :  { %v1923_v44 = vld [vmem:[#allocation9] sm:$0xff] }
 0x3ae   :  { %v9305_v7 = vpop.eup %9304 }
 0x3af   :  { %v1608_v8 = vmul.f32 %v9305_v7, %v9303_v6 }
 0x3b1   :  { %1610 = vst.msk [vmem:[#allocation8] sm:$0xff] %vm462_vm7, %v1608_v8  ;;  %1611 = vst.msk [vmem:[#allocation7 + $0x8] sm:$0xff] %vm462_vm7, %v1608_v8  ;;  %v2080_v8 = vld [vmem:[#allocation5 + $0x18] sm:$0xff] }
 0x3b8   :  { %v1612_v9 = vld [vmem:[#allocation8] sm:$0xff] }
 0x3b9   :  { %7947 = vmatmul.mubr.msk.f32.vlgmr.msra.gmra.mrb[28].mxu1 %vm462_vm7, %v1612_v9  ;;  %7958 = vmatmul.mubr.msk.f32.vlgmr.msra.gmra.mrb[22].mxu0 %vm462_vm7, %v1612_v9 }
 0x3ba   :  { %8889 = vmatpush3.bf16.msra.mxu1 %v10213_v30  ;;  %8895 = vmatpush3.bf16.msra.mxu0 %v10179_v15 }
 0x3bb   :  { %8890 = vmatprep.subr.bf16.mxu1 %v9564_v47  ;;  %8896 = vmatprep.subr.bf16.mxu0 %v9564_v47 }
 0x3bc   :  { %7968 = vmatprep.mubr.msk.f32.mxu1 %vm9565_vm8, %v9563_v32  ;;  %7979 = vmatprep.mubr.msk.f32.mxu0 %vm9565_vm8, %v9563_v32 }
 0x3be   :  { %8892 = vmatpush3.bf16.msra.mxu1 %v10225_v35  ;;  %8898 = vmatpush3.bf16.msra.mxu0 %v10191_v18 }
 0x3bf   :  { %8899 = vmatprep.subr.bf16.mxu1 %v9564_v47  ;;  %8905 = vmatprep.subr.bf16.mxu0 %v9564_v47 }
 0x3c1   :  { %7969 = vmatmul.mubr.msk.f32.vlgmr.msra.gmra.mrb[30].mxu1 %vm462_vm7, %v1612_v9  ;;  %7980 = vmatmul.mubr.msk.f32.vlgmr.msra.gmra.mrb[24].mxu0 %vm462_vm7, %v1612_v9 }
 0x3c2   :  { %8901 = vmatpush3.bf16.msra.mxu1 %v10134_v58  ;;  %8907 = vmatpush3.bf16.msra.mxu0 %v10163_v10 }
 0x3c3   :  { %8902 = vmatprep.subr.bf16.mxu1 %v9564_v47  ;;  %8908 = vmatprep.subr.bf16.mxu0 %v9564_v47 }
 0x3c4   :  { %7990 = vmatprep.mubr.msk.f32.mxu1 %vm9565_vm8, %v9563_v32  ;;  %8001 = vmatprep.mubr.msk.f32.mxu0 %vm9565_vm8, %v9563_v32 }
 0x3c6   :  { %8904 = vmatpush3.bf16.msra.mxu1 %v10140_v60  ;;  %8910 = vmatpush3.bf16.msra.mxu0 %v10169_v12 }
 0x3c7   :  { %8911 = vmatprep.subr.bf16.mxu1 %v9564_v47  ;;  %8917 = vmatprep.subr.bf16.mxu0 %v9564_v47 }
 0x48c   :  { %v1683_v13 = vpop.f32.mrb[28].mxu1  ;;  %v1755_v16 = vpop.f32.mrb[22].mxu0 }
 0x48d   :  { %v1687_v17 = vadd.f32 %v1683_v13, %v1613_v11  ;;  %v1759_v19 = vadd.f32 %v1755_v16, %v1688_v14  ;;  %v7948_v20 = vpop.f32.mrb[29].mxu1  ;;  %v7959_v21 = vpop.f32.mrb[23].mxu0 }
 0x48f   :  { %v7115_v22 = vmul.f32 -1.442695, %v1687_v17  ;;  %v7116_v23 = vmul.f32 -1.442695, %v1759_v19 }
 0x491   :  { %9306 = vpow2.f32 %v7115_v22 }
 0x492   :  { %9308 = vpow2.f32 %v7116_v23 }
 0x494   :  { %v1827_v24 = vpop.f32.mrb[30].mxu1  ;;  %v1899_v26 = vpop.f32.mrb[24].mxu0 }
 0x495   :  { %v1903_v27 = vadd.f32 %v1899_v26, %v1832_v25  ;;  %v7970_v28 = vpop.f32.mrb[31].mxu1  ;;  %v7981_v29 = vpop.f32.mrb[25].mxu0  ;;  %v1831_v34 = vadd.f32 %v1827_v24, %v1760_v31 }
 0x497   :  { %v7117_v33 = vmul.f32 -1.442695, %v1903_v27 }
 0x499   :  { %9310 = vpow2.f32 %v7117_v33 }
 0x49a   :  { %9312 = vtanh.f32 %v1831_v34  ;;  %v2253_v34 = vld [vmem:[#allocation3 + $0x20] sm:$0xff] }
 0x49b   :  { %v9307_v36 = vpop.eup %9306 }
 0x49c   :  { %v9309_v37 = vpop.eup %9308  ;;  %v1907_v38 = vadd.f32 1.0, %v9307_v36 }
 0x49d   :  { %v1913_v39 = vadd.f32 1.0, %v9309_v37  ;;  %v2328_v37 = vld [vmem:[#allocation4 + $0x20] sm:$0xff] }
 0x49e   :  { %9314 = vrcp.f32 %v1907_v38 }
 0x49f   :  { %9316 = vrcp.f32 %v1913_v39 }
 0x4a3   :  { %v9311_v40 = vpop.eup %9310 }
 0x4a4   :  { %v9313_v41 = vpop.eup %9312  ;;  %v1920_v46 = vadd.f32 1.0, %v9311_v40 }
 0x4a6   :  { %9318 = vrcp.f32 %v1920_v46  ;;  %v2472_v46 = vld [vmem:[#allocation6 + $0x20] sm:$0xff] }
 0x4a8   :  { %v9315_v42 = vpop.eup %9314 }
 0x4a9   :  { %v9317_v43 = vpop.eup %9316  ;;  %v1925_v45 = vmul.f32 %v9315_v42, %v9313_v41 }
 0x4aa   :  { %v1924_v48 = vmul.f32 %v9317_v43, %v1923_v44 }
 0x4ac   :  { %v1926_v49 = vadd.f32 %v1925_v45, %v1924_v48 }
 0x4ae   :  { %9320 = vtanh.f32 %v1926_v49  ;;  %1929 = vst.msk [vmem:[#allocation9] sm:$0xff] %vm462_vm7, %v1926_v49 }
 0x4b0   :  { %v9319_v50 = vpop.eup %9318 }
 0x4b5   :  { %v2243_v23 = vld [vmem:[#allocation9] sm:$0xff] }
 0x4b8   :  { %v9321_v51 = vpop.eup %9320 }
 0x4b9   :  { %v1928_v52 = vmul.f32 %v9321_v51, %v9319_v50 }
 0x4bb   :  { %1930 = vst.msk [vmem:[#allocation8] sm:$0xff] %vm462_vm7, %v1928_v52  ;;  %1931 = vst.msk [vmem:[#allocation7 + $0x10] sm:$0xff] %vm462_vm7, %v1928_v52  ;;  %v2400_v52 = vld [vmem:[#allocation5 + $0x20] sm:$0xff] }
 0x4c2   :  { %v1932_v53 = vld [vmem:[#allocation8] sm:$0xff] }
 0x4c3   :  { %7991 = vmatmul.mubr.msk.f32.vlgmr.msra.gmra.mrb[32].mxu1 %vm462_vm7, %v1932_v53  ;;  %8002 = vmatmul.mubr.msk.f32.vlgmr.msra.gmra.mrb[26].mxu0 %vm462_vm7, %v1932_v53 }
 0x4c4   :  { %8913 = vmatpush3.bf16.msra.mxu1 %v10213_v30  ;;  %8919 = vmatpush3.bf16.msra.mxu0 %v10179_v15 }
 0x4c5   :  { %8914 = vmatprep.subr.bf16.mxu1 %v9564_v47  ;;  %8920 = vmatprep.subr.bf16.mxu0 %v9564_v47 }
 0x4c6   :  { %8012 = vmatprep.mubr.msk.f32.mxu1 %vm9565_vm8, %v9563_v32  ;;  %8023 = vmatprep.mubr.msk.f32.mxu0 %vm9565_vm8, %v9563_v32 }
 0x4c8   :  { %8916 = vmatpush3.bf16.msra.mxu1 %v10225_v35  ;;  %8922 = vmatpush3.bf16.msra.mxu0 %v10191_v18 }
 0x4c9   :  { %8923 = vmatprep.subr.bf16.mxu1 %v9564_v47  ;;  %8929 = vmatprep.subr.bf16.mxu0 %v9564_v47 }
 0x4cb   :  { %8013 = vmatmul.mubr.msk.f32.vlgmr.msra.gmra.mrb[34].mxu1 %vm462_vm7, %v1932_v53  ;;  %8024 = vmatmul.mubr.msk.f32.vlgmr.msra.gmra.mrb[28].mxu0 %vm462_vm7, %v1932_v53 }
 0x4cc   :  { %8925 = vmatpush3.bf16.msra.mxu1 %v10134_v58  ;;  %8931 = vmatpush3.bf16.msra.mxu0 %v10163_v10 }
 0x4cd   :  { %8926 = vmatprep.subr.bf16.mxu1 %v9564_v47  ;;  %8932 = vmatprep.subr.bf16.mxu0 %v9564_v47 }
 0x4ce   :  { %8034 = vmatprep.mubr.msk.f32.mxu1 %vm9565_vm8, %v9563_v32  ;;  %8045 = vmatprep.mubr.msk.f32.mxu0 %vm9565_vm8, %v9563_v32 }
 0x4d0   :  { %8928 = vmatpush3.bf16.msra.mxu1 %v10140_v60  ;;  %8934 = vmatpush3.bf16.msra.mxu0 %v10169_v12 }
 0x4d1   :  { %8935 = vmatprep.subr.bf16.mxu1 %v9564_v47  ;;  %8941 = vmatprep.subr.bf16.mxu0 %v9564_v47 }
 0x596   :  { %v2003_v56 = vpop.f32.mrb[32].mxu1  ;;  %v2075_v59 = vpop.f32.mrb[26].mxu0 }
 0x597   :  { %v2007_v61 = vadd.f32 %v2003_v56, %v1933_v54  ;;  %v2079_v55 = vadd.f32 %v2075_v59, %v2008_v57  ;;  %v7992_v62 = vpop.f32.mrb[33].mxu1  ;;  %v8003_v0 = vpop.f32.mrb[27].mxu0 }
 0x599   :  { %v7122_v1 = vmul.f32 -1.442695, %v2007_v61  ;;  %v7123_v63 = vmul.f32 -1.442695, %v2079_v55 }
 0x59b   :  { %9322 = vpow2.f32 %v7122_v1 }
 0x59c   :  { %9324 = vpow2.f32 %v7123_v63 }
 0x59e   :  { %v2147_v2 = vpop.f32.mrb[34].mxu1  ;;  %v2219_v4 = vpop.f32.mrb[28].mxu0 }
 0x59f   :  { %v2223_v5 = vadd.f32 %v2219_v4, %v2152_v3  ;;  %v8014_v6 = vpop.f32.mrb[35].mxu1  ;;  %v8025_v7 = vpop.f32.mrb[29].mxu0  ;;  %v2151_v11 = vadd.f32 %v2147_v2, %v2080_v8 }
 0x5a1   :  { %v7124_v9 = vmul.f32 -1.442695, %v2223_v5 }
 0x5a3   :  { %9326 = vpow2.f32 %v7124_v9 }
 0x5a4   :  { %9328 = vtanh.f32 %v2151_v11  ;;  %v2573_v11 = vld [vmem:[#allocation3 + $0x28] sm:$0xff] }
 0x5a5   :  { %v9323_v13 = vpop.eup %9322 }
 0x5a6   :  { %v9325_v14 = vpop.eup %9324  ;;  %v2227_v16 = vadd.f32 1.0, %v9323_v13 }
 0x5a7   :  { %v2233_v17 = vadd.f32 1.0, %v9325_v14  ;;  %v2648_v14 = vld [vmem:[#allocation4 + $0x28] sm:$0xff] }
 0x5a8   :  { %9330 = vrcp.f32 %v2227_v16 }
 0x5a9   :  { %9332 = vrcp.f32 %v2233_v17 }
 0x5ad   :  { %v9327_v19 = vpop.eup %9326 }
 0x5ae   :  { %v9329_v20 = vpop.eup %9328  ;;  %v2240_v25 = vadd.f32 1.0, %v9327_v19 }
 0x5b0   :  { %9334 = vrcp.f32 %v2240_v25  ;;  %v2792_v25 = vld [vmem:[#allocation6 + $0x28] sm:$0xff] }
 0x5b2   :  { %v9331_v21 = vpop.eup %9330 }
 0x5b3   :  { %v9333_v22 = vpop.eup %9332  ;;  %v2245_v24 = vmul.f32 %v9331_v21, %v9329_v20 }
 0x5b4   :  { %v2244_v26 = vmul.f32 %v9333_v22, %v2243_v23 }
 0x5b6   :  { %v2246_v27 = vadd.f32 %v2245_v24, %v2244_v26 }
 0x5b8   :  { %9336 = vtanh.f32 %v2246_v27  ;;  %2249 = vst.msk [vmem:[#allocation9] sm:$0xff] %vm462_vm7, %v2246_v27 }
 0x5ba   :  { %v9335_v28 = vpop.eup %9334 }
 0x5bf   :  { %v2563_v63 = vld [vmem:[#allocation9] sm:$0xff] }
 0x5c2   :  { %v9337_v29 = vpop.eup %9336 }
 0x5c3   :  { %v2248_v31 = vmul.f32 %v9337_v29, %v9335_v28 }
 0x5c5   :  { %2250 = vst.msk [vmem:[#allocation8] sm:$0xff] %vm462_vm7, %v2248_v31  ;;  %2251 = vst.msk [vmem:[#allocation7 + $0x18] sm:$0xff] %vm462_vm7, %v2248_v31  ;;  %v2720_v31 = vld [vmem:[#allocation5 + $0x28] sm:$0xff] }
 0x5cc   :  { %v2252_v33 = vld [vmem:[#allocation8] sm:$0xff] }
 0x5cd   :  { %8035 = vmatmul.mubr.msk.f32.vlgmr.msra.gmra.mrb[36].mxu1 %vm462_vm7, %v2252_v33  ;;  %8046 = vmatmul.mubr.msk.f32.vlgmr.msra.gmra.mrb[30].mxu0 %vm462_vm7, %v2252_v33 }
 0x5ce   :  { %8937 = vmatpush3.bf16.msra.mxu1 %v10213_v30  ;;  %8943 = vmatpush3.bf16.msra.mxu0 %v10179_v15 }
 0x5cf   :  { %8938 = vmatprep.subr.bf16.mxu1 %v9564_v47  ;;  %8944 = vmatprep.subr.bf16.mxu0 %v9564_v47 }
 0x5d0   :  { %8056 = vmatprep.mubr.msk.f32.mxu1 %vm9565_vm8, %v9563_v32  ;;  %8067 = vmatprep.mubr.msk.f32.mxu0 %vm9565_vm8, %v9563_v32 }
 0x5d2   :  { %8940 = vmatpush3.bf16.msra.mxu1 %v10225_v35  ;;  %8946 = vmatpush3.bf16.msra.mxu0 %v10191_v18 }
 0x5d3   :  { %8947 = vmatprep.subr.bf16.mxu1 %v9564_v47  ;;  %8953 = vmatprep.subr.bf16.mxu0 %v9564_v47 }
 0x5d5   :  { %8057 = vmatmul.mubr.msk.f32.vlgmr.msra.gmra.mrb[38].mxu1 %vm462_vm7, %v2252_v33  ;;  %8068 = vmatmul.mubr.msk.f32.vlgmr.msra.gmra.mrb[32].mxu0 %vm462_vm7, %v2252_v33 }
 0x5d6   :  { %8949 = vmatpush3.bf16.msra.mxu1 %v10134_v58  ;;  %8955 = vmatpush3.bf16.msra.mxu0 %v10163_v10 }
 0x5d7   :  { %8950 = vmatprep.subr.bf16.mxu1 %v9564_v47  ;;  %8956 = vmatprep.subr.bf16.mxu0 %v9564_v47 }
 0x5d8   :  { %8078 = vmatprep.mubr.msk.f32.mxu1 %vm9565_vm8, %v9563_v32  ;;  %8089 = vmatprep.mubr.msk.f32.mxu0 %vm9565_vm8, %v9563_v32 }
 0x5da   :  { %8952 = vmatpush3.bf16.msra.mxu1 %v10140_v60  ;;  %8958 = vmatpush3.bf16.msra.mxu0 %v10169_v12 }
 0x5db   :  { %8959 = vmatprep.subr.bf16.mxu1 %v9564_v47  ;;  %8965 = vmatprep.subr.bf16.mxu0 %v9564_v47 }
 0x6a0   :  { %v2323_v36 = vpop.f32.mrb[36].mxu1  ;;  %v2395_v38 = vpop.f32.mrb[30].mxu0 }
 0x6a1   :  { %v2327_v39 = vadd.f32 %v2323_v36, %v2253_v34  ;;  %v2399_v40 = vadd.f32 %v2395_v38, %v2328_v37  ;;  %v8036_v41 = vpop.f32.mrb[37].mxu1  ;;  %v8047_v42 = vpop.f32.mrb[31].mxu0 }
 0x6a3   :  { %v7129_v43 = vmul.f32 -1.442695, %v2327_v39  ;;  %v7130_v44 = vmul.f32 -1.442695, %v2399_v40 }
 0x6a5   :  { %9338 = vpow2.f32 %v7129_v43 }
 0x6a6   :  { %9340 = vpow2.f32 %v7130_v44 }
 0x6a8   :  { %v2467_v45 = vpop.f32.mrb[38].mxu1  ;;  %v2539_v48 = vpop.f32.mrb[32].mxu0 }
 0x6a9   :  { %v2543_v49 = vadd.f32 %v2539_v48, %v2472_v46  ;;  %v8058_v50 = vpop.f32.mrb[39].mxu1  ;;  %v8069_v51 = vpop.f32.mrb[33].mxu0  ;;  %v2471_v54 = vadd.f32 %v2467_v45, %v2400_v52 }
 0x6ab   :  { %v7131_v53 = vmul.f32 -1.442695, %v2543_v49 }
 0x6ad   :  { %9342 = vpow2.f32 %v7131_v53 }
 0x6ae   :  { %9344 = vtanh.f32 %v2471_v54  ;;  %v2893_v54 = vld [vmem:[#allocation3 + $0x30] sm:$0xff] }
 0x6af   :  { %v9339_v56 = vpop.eup %9338 }
 0x6b0   :  { %v9341_v57 = vpop.eup %9340  ;;  %v2547_v59 = vadd.f32 1.0, %v9339_v56 }
 0x6b1   :  { %v2553_v61 = vadd.f32 1.0, %v9341_v57  ;;  %v2968_v57 = vld [vmem:[#allocation4 + $0x30] sm:$0xff] }
 0x6b2   :  { %9346 = vrcp.f32 %v2547_v59 }
 0x6b3   :  { %9348 = vrcp.f32 %v2553_v61 }
 0x6b7   :  { %v9343_v55 = vpop.eup %9342 }
 0x6b8   :  { %v9345_v62 = vpop.eup %9344  ;;  %v2560_v3 = vadd.f32 1.0, %v9343_v55 }
 0x6ba   :  { %9350 = vrcp.f32 %v2560_v3  ;;  %v3112_v3 = vld [vmem:[#allocation6 + $0x30] sm:$0xff] }
 0x6bc   :  { %v9347_v0 = vpop.eup %9346 }
 0x6bd   :  { %v9349_v1 = vpop.eup %9348  ;;  %v2565_v2 = vmul.f32 %v9347_v0, %v9345_v62 }
 0x6be   :  { %v2564_v4 = vmul.f32 %v9349_v1, %v2563_v63 }
 0x6c0   :  { %v2566_v5 = vadd.f32 %v2565_v2, %v2564_v4 }
 0x6c2   :  { %9352 = vtanh.f32 %v2566_v5  ;;  %2569 = vst.msk [vmem:[#allocation9] sm:$0xff] %vm462_vm7, %v2566_v5 }
 0x6c4   :  { %v9351_v6 = vpop.eup %9350 }
 0x6c9   :  { %v2883_v44 = vld [vmem:[#allocation9] sm:$0xff] }
 0x6cc   :  { %v9353_v7 = vpop.eup %9352 }
 0x6cd   :  { %v2568_v8 = vmul.f32 %v9353_v7, %v9351_v6 }
 0x6cf   :  { %2570 = vst.msk [vmem:[#allocation8] sm:$0xff] %vm462_vm7, %v2568_v8  ;;  %2571 = vst.msk [vmem:[#allocation7 + $0x20] sm:$0xff] %vm462_vm7, %v2568_v8  ;;  %v3040_v8 = vld [vmem:[#allocation5 + $0x30] sm:$0xff] }
 0x6d6   :  { %v2572_v9 = vld [vmem:[#allocation8] sm:$0xff] }
 0x6d7   :  { %8079 = vmatmul.mubr.msk.f32.vlgmr.msra.gmra.mrb[40].mxu1 %vm462_vm7, %v2572_v9  ;;  %8090 = vmatmul.mubr.msk.f32.vlgmr.msra.gmra.mrb[34].mxu0 %vm462_vm7, %v2572_v9 }
 0x6d8   :  { %8961 = vmatpush3.bf16.msra.mxu1 %v10213_v30  ;;  %8967 = vmatpush3.bf16.msra.mxu0 %v10179_v15 }
 0x6d9   :  { %8962 = vmatprep.subr.bf16.mxu1 %v9564_v47  ;;  %8968 = vmatprep.subr.bf16.mxu0 %v9564_v47 }
 0x6da   :  { %8100 = vmatprep.mubr.msk.f32.mxu1 %vm9565_vm8, %v9563_v32  ;;  %8111 = vmatprep.mubr.msk.f32.mxu0 %vm9565_vm8, %v9563_v32 }
 0x6dc   :  { %8964 = vmatpush3.bf16.msra.mxu1 %v10225_v35  ;;  %8970 = vmatpush3.bf16.msra.mxu0 %v10191_v18 }
 0x6dd   :  { %8971 = vmatprep.subr.bf16.mxu1 %v9564_v47  ;;  %8977 = vmatprep.subr.bf16.mxu0 %v9564_v47 }
 0x6df   :  { %8101 = vmatmul.mubr.msk.f32.vlgmr.msra.gmra.mrb[42].mxu1 %vm462_vm7, %v2572_v9  ;;  %8112 = vmatmul.mubr.msk.f32.vlgmr.msra.gmra.mrb[36].mxu0 %vm462_vm7, %v2572_v9 }
 0x6e0   :  { %8973 = vmatpush3.bf16.msra.mxu1 %v10134_v58  ;;  %8979 = vmatpush3.bf16.msra.mxu0 %v10163_v10 }
 0x6e1   :  { %8974 = vmatprep.subr.bf16.mxu1 %v9564_v47  ;;  %8980 = vmatprep.subr.bf16.mxu0 %v9564_v47 }
 0x6e2   :  { %8122 = vmatprep.mubr.msk.f32.mxu1 %vm9565_vm8, %v9563_v32  ;;  %8133 = vmatprep.mubr.msk.f32.mxu0 %vm9565_vm8, %v9563_v32 }
 0x6e4   :  { %8976 = vmatpush3.bf16.msra.mxu1 %v10140_v60  ;;  %8982 = vmatpush3.bf16.msra.mxu0 %v10169_v12 }
 0x6e5   :  { %8983 = vmatprep.subr.bf16.mxu1 %v9564_v47  ;;  %8989 = vmatprep.subr.bf16.mxu0 %v9564_v47 }
 0x7aa   :  { %v2643_v13 = vpop.f32.mrb[40].mxu1  ;;  %v2715_v16 = vpop.f32.mrb[34].mxu0 }
 0x7ab   :  { %v2647_v17 = vadd.f32 %v2643_v13, %v2573_v11  ;;  %v2719_v19 = vadd.f32 %v2715_v16, %v2648_v14  ;;  %v8080_v20 = vpop.f32.mrb[41].mxu1  ;;  %v8091_v21 = vpop.f32.mrb[35].mxu0 }
 0x7ad   :  { %v7136_v22 = vmul.f32 -1.442695, %v2647_v17  ;;  %v7137_v23 = vmul.f32 -1.442695, %v2719_v19 }
 0x7af   :  { %9354 = vpow2.f32 %v7136_v22 }
 0x7b0   :  { %9356 = vpow2.f32 %v7137_v23 }
 0x7b2   :  { %v2787_v24 = vpop.f32.mrb[42].mxu1  ;;  %v2859_v26 = vpop.f32.mrb[36].mxu0 }
 0x7b3   :  { %v2863_v27 = vadd.f32 %v2859_v26, %v2792_v25  ;;  %v8102_v28 = vpop.f32.mrb[43].mxu1  ;;  %v8113_v29 = vpop.f32.mrb[37].mxu0  ;;  %v2791_v34 = vadd.f32 %v2787_v24, %v2720_v31 }
 0x7b5   :  { %v7138_v33 = vmul.f32 -1.442695, %v2863_v27 }
 0x7b7   :  { %9358 = vpow2.f32 %v7138_v33 }
 0x7b8   :  { %9360 = vtanh.f32 %v2791_v34  ;;  %v3288_v34 = vld [vmem:[#allocation4 + $0x38] sm:$0xff] }
 0x7b9   :  { %v9355_v36 = vpop.eup %9354 }
 0x7ba   :  { %v9357_v37 = vpop.eup %9356  ;;  %v2867_v38 = vadd.f32 1.0, %v9355_v36 }
 0x7bb   :  { %v2873_v39 = vadd.f32 1.0, %v9357_v37 }
 0x7bc   :  { %9362 = vrcp.f32 %v2867_v38 }
 0x7bd   :  { %9364 = vrcp.f32 %v2873_v39 }
 0x7c1   :  { %v9359_v40 = vpop.eup %9358 }
 0x7c2   :  { %v9361_v41 = vpop.eup %9360  ;;  %v2880_v46 = vadd.f32 1.0, %v9359_v40 }
 0x7c4   :  { %9366 = vrcp.f32 %v2880_v46 }
 0x7c6   :  { %v9363_v42 = vpop.eup %9362 }
 0x7c7   :  { %v9365_v43 = vpop.eup %9364  ;;  %v2885_v45 = vmul.f32 %v9363_v42, %v9361_v41 }
 0x7c8   :  { %v2884_v48 = vmul.f32 %v9365_v43, %v2883_v44 }
 0x7ca   :  { %v2886_v49 = vadd.f32 %v2885_v45, %v2884_v48  ;;  %v3360_v48 = vld [vmem:[#allocation5 + $0x38] sm:$0xff] }
 0x7cc   :  { %9368 = vtanh.f32 %v2886_v49  ;;  %2889 = vst.msk [vmem:[#allocation9] sm:$0xff] %vm462_vm7, %v2886_v49 }
 0x7ce   :  { %v9367_v50 = vpop.eup %9366 }
 0x7d3   :  { %v3203_v23 = vld [vmem:[#allocation9] sm:$0xff] }
 0x7d6   :  { %v9369_v51 = vpop.eup %9368 }
 0x7d7   :  { %v2888_v52 = vmul.f32 %v9369_v51, %v9367_v50 }
 0x7d9   :  { %2890 = vst.msk [vmem:[#allocation8] sm:$0xff] %vm462_vm7, %v2888_v52  ;;  %2891 = vst.msk [vmem:[#allocation7 + $0x28] sm:$0xff] %vm462_vm7, %v2888_v52 }
 0x7e0   :  { %v2892_v53 = vld [vmem:[#allocation8] sm:$0xff] }
 0x7e1   :  { %8123 = vmatmul.mubr.msk.f32.vlgmr.msra.gmra.mrb[44].mxu1 %vm462_vm7, %v2892_v53  ;;  %8134 = vmatmul.mubr.msk.f32.vlgmr.msra.gmra.mrb[38].mxu0 %vm462_vm7, %v2892_v53 }
 0x7e2   :  { %8985 = vmatpush3.bf16.msra.mxu1 %v10213_v30  ;;  %8991 = vmatpush3.bf16.msra.mxu0 %v10179_v15 }
 0x7e3   :  { %8986 = vmatprep.subr.bf16.mxu1 %v9564_v47  ;;  %8992 = vmatprep.subr.bf16.mxu0 %v9564_v47 }
 0x7e4   :  { %8144 = vmatprep.mubr.msk.f32.mxu1 %vm9565_vm8, %v9563_v32  ;;  %8155 = vmatprep.mubr.msk.f32.mxu0 %vm9565_vm8, %v9563_v32 }
 0x7e6   :  { %8988 = vmatpush3.bf16.msra.mxu1 %v10225_v35  ;;  %8994 = vmatpush3.bf16.msra.mxu0 %v10191_v18 }
 0x7e7   :  { %8995 = vmatprep.subr.bf16.mxu1 %v9564_v47  ;;  %9001 = vmatprep.subr.bf16.mxu0 %v9564_v47 }
 0x7e9   :  { %8145 = vmatmul.mubr.msk.f32.vlgmr.msra.gmra.mrb[46].mxu1 %vm462_vm7, %v2892_v53  ;;  %8156 = vmatmul.mubr.msk.f32.vlgmr.msra.gmra.mrb[40].mxu0 %vm462_vm7, %v2892_v53 }
 0x7ea   :  { %8997 = vmatpush3.bf16.msra.mxu1 %v10134_v58  ;;  %9003 = vmatpush3.bf16.msra.mxu0 %v10163_v10 }
 0x7eb   :  { %8998 = vmatprep.subr.bf16.mxu1 %v9564_v47  ;;  %9004 = vmatprep.subr.bf16.mxu0 %v9564_v47 }
 0x7ec   :  { %8166 = vmatprep.mubr.msk.f32.mxu1 %vm9565_vm8, %v9563_v32  ;;  %8177 = vmatprep.mubr.msk.f32.mxu0 %vm9565_vm8, %v9563_v32 }
 0x7ee   :  { %9000 = vmatpush3.bf16.msra.mxu1 %v10140_v60  ;;  %9006 = vmatpush3.bf16.msra.mxu0 %v10169_v12 }
 0x7ef   :  { %9007 = vmatprep.subr.bf16.mxu1 %v9564_v47  ;;  %9013 = vmatprep.subr.bf16.mxu0 %v9564_v47 }
 0x8b4   :  { %v2963_v56 = vpop.f32.mrb[44].mxu1  ;;  %v3035_v59 = vpop.f32.mrb[38].mxu0 }
 0x8b5   :  { %v2967_v61 = vadd.f32 %v2963_v56, %v2893_v54  ;;  %v3039_v55 = vadd.f32 %v3035_v59, %v2968_v57  ;;  %v8124_v62 = vpop.f32.mrb[45].mxu1  ;;  %v8135_v0 = vpop.f32.mrb[39].mxu0 }
 0x8b7   :  { %v7143_v1 = vmul.f32 -1.442695, %v2967_v61  ;;  %v7144_v63 = vmul.f32 -1.442695, %v3039_v55 }
 0x8b9   :  { %9370 = vpow2.f32 %v7143_v1 }
 0x8ba   :  { %9372 = vpow2.f32 %v7144_v63 }
 0x8bc   :  { %v3107_v2 = vpop.f32.mrb[46].mxu1  ;;  %v3179_v4 = vpop.f32.mrb[40].mxu0 }
 0x8bd   :  { %v3183_v5 = vadd.f32 %v3179_v4, %v3112_v3  ;;  %v8146_v6 = vpop.f32.mrb[47].mxu1  ;;  %v8157_v7 = vpop.f32.mrb[41].mxu0  ;;  %v3111_v11 = vadd.f32 %v3107_v2, %v3040_v8  ;;  %v3864_v8 = vld [vmem:[%s11091_s8 + $0x18] sm:$0xff] }
 0x8be   :  { %v3861_v6 = vld [vmem:[%s11091_s8] sm:$0xff]  ;;  %v3862_v7 = vld [vmem:[%s11091_s8 + $0x8] sm:$0xff] }
 0x8bf   :  { %v7145_v9 = vmul.f32 -1.442695, %v3183_v5 }
 0x8c1   :  { %9374 = vpow2.f32 %v7145_v9  ;;  %v3853_v9 = vld [vmem:[#allocation7 + $0x8] sm:$0xff] }
 0x8c2   :  { %9376 = vtanh.f32 %v3111_v11  ;;  %v3854_v11 = vld [vmem:[#allocation7 + $0x10] sm:$0xff] }
 0x8c3   :  { %v9371_v13 = vpop.eup %9370 }
 0x8c4   :  { %v9373_v14 = vpop.eup %9372  ;;  %v3187_v16 = vadd.f32 1.0, %v9371_v13  ;;  %v3855_v13 = vld [vmem:[#allocation7 + $0x18] sm:$0xff] }
 0x8c5   :  { %v3193_v17 = vadd.f32 1.0, %v9373_v14  ;;  %v3856_v14 = vld [vmem:[#allocation7 + $0x20] sm:$0xff] }
 0x8c6   :  { %9378 = vrcp.f32 %v3187_v16  ;;  %v3857_v16 = vld [vmem:[#allocation7 + $0x28] sm:$0xff] }
 0x8c7   :  { %9380 = vrcp.f32 %v3193_v17 }
 0x8cb   :  { %v9375_v19 = vpop.eup %9374 }
 0x8cc   :  { %v9377_v20 = vpop.eup %9376  ;;  %v3200_v25 = vadd.f32 1.0, %v9375_v19 }
 0x8ce   :  { %9382 = vrcp.f32 %v3200_v25 }
 0x8d0   :  { %v9379_v21 = vpop.eup %9378 }
 0x8d1   :  { %v9381_v22 = vpop.eup %9380  ;;  %v3205_v24 = vmul.f32 %v9379_v21, %v9377_v20  ;;  %v4135_v20 = vld [vmem:[%s11092_s9] sm:$0xff]  ;;  %v4136_v21 = vld [vmem:[%s11092_s9 + $0x8] sm:$0xff] }
 0x8d2   :  { %v3204_v26 = vmul.f32 %v9381_v22, %v3203_v23  ;;  %v10629_v22 = vpack.c.bf16 %v4136_v21, %v4135_v20  ;;  %v4137_v23 = vld [vmem:[%s11092_s9 + $0x10] sm:$0xff] }
 0x8d4   :  { %v3206_v27 = vadd.f32 %v3205_v24, %v3204_v26  ;;  %v4138_v24 = vld [vmem:[%s11092_s9 + $0x18] sm:$0xff]  ;;  %v7170_v26 = vld [vmem:[%s11092_s9 + $0x20] sm:$0xff] }
 0x8d5   :  { %v10639_v25 = vpack.c.bf16 %v4138_v24, %v4137_v23 }
 0x8d6   :  { %9384 = vtanh.f32 %v3206_v27  ;;  %3209 = vst.msk [vmem:[#allocation9] sm:$0xff] %vm462_vm7, %v3206_v27  ;;  %v7171_v27 = vld [vmem:[%s11092_s9 + $0x28] sm:$0xff] }
 0x8d8   :  { %v9383_v28 = vpop.eup %9382 }
 0x8dd   :  { %v3523_v55 = vld [vmem:[#allocation9] sm:$0xff] }
 0x8e0   :  { %v9385_v29 = vpop.eup %9384 }
 0x8e1   :  { %v3208_v31 = vmul.f32 %v9385_v29, %v9383_v28  ;;  %v10649_v28 = vpack.c.bf16 %v7171_v27, %v7170_v26  ;;  %v7172_v29 = vld [vmem:[%s11092_s9 + $0x30] sm:$0xff] }
 0x8e3   :  { %3210 = vst.msk [vmem:[#allocation8] sm:$0xff] %vm462_vm7, %v3208_v31  ;;  %3211 = vst.msk [vmem:[#allocation7 + $0x30] sm:$0xff] %vm462_vm7, %v3208_v31  ;;  %v7173_v31 = vld [vmem:[%s11092_s9 + $0x38] sm:$0xff] }
 0x8ea   :  { %v3212_v33 = vld [vmem:[#allocation8] sm:$0xff]  ;;  %v3858_v17 = vld [vmem:[#allocation7 + $0x30] sm:$0xff] }
 0x8eb   :  { %8167 = vmatmul.mubr.msk.f32.vlgmr.msra.gmra.mrb[48].mxu1 %vm462_vm7, %v3212_v33  ;;  %8178 = vmatmul.mubr.msk.f32.vlgmr.msra.gmra.mrb[42].mxu0 %vm462_vm7, %v3212_v33 }
 0x8ec   :  { %9009 = vmatpush3.bf16.msra.mxu1 %v10213_v30  ;;  %9015 = vmatpush3.bf16.msra.mxu0 %v10179_v15 }
 0x8ed   :  { %9010 = vmatprep.subr.bf16.mxu1 %v9564_v47  ;;  %9016 = vmatprep.subr.bf16.mxu0 %v9564_v47 }
 0x8ee   :  { %8188 = vmatprep.mubr.msk.f32.mxu1 %vm9565_vm8, %v9563_v32  ;;  %8199 = vmatprep.mubr.msk.f32.mxu0 %vm9565_vm8, %v9563_v32 }
 0x8f0   :  { %9012 = vmatpush3.bf16.msra.mxu1 %v10225_v35  ;;  %9018 = vmatpush3.bf16.msra.mxu0 %v10191_v18 }
 0x8f1   :  { %9019 = vmatprep.subr.bf16.mxu1 %v9564_v47  ;;  %9025 = vmatprep.subr.bf16.mxu0 %v9564_v47 }
 0x8f3   :  { %8189 = vmatmul.mubr.msk.f32.vlgmr.msra.gmra.mrb[50].mxu1 %vm462_vm7, %v3212_v33  ;;  %8200 = vmatmul.mubr.msk.f32.vlgmr.msra.gmra.mrb[44].mxu0 %vm462_vm7, %v3212_v33  ;;  %v10659_v33 = vpack.c.bf16 %v7173_v31, %v7172_v29 }
 0x8f4   :  { %9021 = vmatpush3.bf16.msra.mxu1 %v10134_v58  ;;  %9027 = vmatpush3.bf16.msra.mxu0 %v10163_v10  ;;  %v3213_v58 = vld [vmem:[#allocation3 + $0x38] sm:$0xff] }
 0x8f5   :  { %9022 = vmatprep.subr.bf16.mxu1 %v9564_v47  ;;  %9028 = vmatprep.subr.bf16.mxu0 %v9564_v47 }
 0x8f6   :  { %8210 = vmatprep.mubr.msk.f32.mxu1 %vm9565_vm8, %v9563_v32  ;;  %8221 = vmatprep.mubr.msk.f32.mxu0 %vm9565_vm8, %v9563_v32 }
 0x8f8   :  { %9024 = vmatpush3.bf16.msra.mxu1 %v10140_v60  ;;  %9030 = vmatpush3.bf16.msra.mxu0 %v10169_v12  ;;  %v3432_v60 = vld [vmem:[#allocation6 + $0x38] sm:$0xff] }
 0x8f9   :  { %9031 = vmatprep.subr.bf16.mxu1 %v9564_v47  ;;  %9037 = vmatprep.subr.bf16.mxu0 %v9564_v47 }
 0x9be   :  { %v3283_v10 = vpop.f32.mrb[48].mxu1  ;;  %v3355_v36 = vpop.f32.mrb[42].mxu0 }
 0x9bf   :  { %v3287_v37 = vadd.f32 %v3283_v10, %v3213_v58  ;;  %v3359_v38 = vadd.f32 %v3355_v36, %v3288_v34  ;;  %v8168_v39 = vpop.f32.mrb[49].mxu1  ;;  %v8179_v40 = vpop.f32.mrb[43].mxu0  ;;  %v3533_v58 = vld [vmem:[#allocation3 + $0x40] sm:$0xff]  ;;  %v3608_v34 = vld [vmem:[#allocation4 + $0x40] sm:$0xff] }
 0x9c1   :  { %v7150_v41 = vmul.f32 -1.442695, %v3287_v37  ;;  %v7151_v42 = vmul.f32 -1.442695, %v3359_v38 }
 0x9c3   :  { %9386 = vpow2.f32 %v7150_v41 }
 0x9c4   :  { %9388 = vpow2.f32 %v7151_v42 }
 0x9c6   :  { %v3427_v43 = vpop.f32.mrb[50].mxu1  ;;  %v3499_v44 = vpop.f32.mrb[44].mxu0 }
 0x9c7   :  { %v3503_v12 = vadd.f32 %v3499_v44, %v3432_v60  ;;  %v8190_v45 = vpop.f32.mrb[51].mxu1  ;;  %v8201_v46 = vpop.f32.mrb[45].mxu0  ;;  %v3431_v50 = vadd.f32 %v3427_v43, %v3360_v48  ;;  %v3752_v60 = vld [vmem:[#allocation6 + $0x40] sm:$0xff]  ;;  %v3680_v48 = vld [vmem:[#allocation5 + $0x40] sm:$0xff] }
 0x9c9   :  { %v7152_v49 = vmul.f32 -1.442695, %v3503_v12 }
 0x9cb   :  { %9390 = vpow2.f32 %v7152_v49 }
 0x9cc   :  { %9392 = vtanh.f32 %v3431_v50 }
 0x9cd   :  { %v9387_v51 = vpop.eup %9386 }
 0x9ce   :  { %v9389_v52 = vpop.eup %9388  ;;  %v3507_v53 = vadd.f32 1.0, %v9387_v51  ;;  %v10666_v51 = vld [vmem:[%s11093_s10] ss:$0 sm:$0xff] }
 0x9cf   :  { %v3513_v54 = vadd.f32 1.0, %v9389_v52 }
 0x9d0   :  { %9394 = vrcp.f32 %v3507_v53 }
 0x9d1   :  { %9396 = vrcp.f32 %v3513_v54 }
 0x9d5   :  { %v9391_v56 = vpop.eup %9390 }
 0x9d6   :  { %v9393_v57 = vpop.eup %9392  ;;  %v3520_v0 = vadd.f32 1.0, %v9391_v56 }
 0x9d8   :  { %9398 = vrcp.f32 %v3520_v0 }
 0x9da   :  { %v9395_v59 = vpop.eup %9394 }
 0x9db   :  { %v9397_v61 = vpop.eup %9396  ;;  %v3525_v62 = vmul.f32 %v9395_v59, %v9393_v57 }
 0x9dc   :  { %v3524_v1 = vmul.f32 %v9397_v61, %v3523_v55 }
 0x9de   :  { %v3526_v63 = vadd.f32 %v3525_v62, %v3524_v1 }
 0x9e0   :  { %9400 = vtanh.f32 %v3526_v63  ;;  %3529 = vst.msk [vmem:[#allocation9] sm:$0xff] %vm462_vm7, %v3526_v63 }
 0x9e2   :  { %v9399_v2 = vpop.eup %9398 }
 0x9ea   :  { %v9401_v3 = vpop.eup %9400 }
 0x9eb   :  { %v3528_v4 = vmul.f32 %v9401_v3, %v9399_v2 }
 0x9ed   :  { %3530 = vst.msk [vmem:[#allocation8] sm:$0xff] %vm462_vm7, %v3528_v4  ;;  %3531 = vst.msk [vmem:[#allocation7 + $0x38] sm:$0xff] %vm462_vm7, %v3528_v4 }
 0x9f4   :  { %v3532_v5 = vld [vmem:[#allocation8] sm:$0xff]  ;;  %v3859_v19 = vld [vmem:[#allocation7 + $0x38] sm:$0xff] }
 0x9f5   :  { %8211 = vmatmul.mubr.msk.f32.vlgmr.msra.gmra.mrb[52].mxu1 %vm462_vm7, %v3532_v5  ;;  %8222 = vmatmul.mubr.msk.f32.vlgmr.msra.gmra.mrb[46].mxu0 %vm462_vm7, %v3532_v5 }
 0x9f6   :  { %9033 = vmatpush3.bf16.msra.mxu1 %v10213_v30  ;;  %9039 = vmatpush3.bf16.msra.mxu0 %v10179_v15  ;;  %v9044_v15 = vpack.c.bf16 %v3862_v7, %v3861_v6  ;;  %v3863_v30 = vld [vmem:[%s11091_s8 + $0x10] sm:$0xff] }
 0x9f7   :  { %9034 = vmatprep.subr.bf16.mxu1 %v9564_v47  ;;  %9040 = vmatprep.subr.bf16.mxu0 %v9564_v47 }
 0x9f8   :  { %8232 = vmatprep.mubr.msk.f32.mxu1 %vm9565_vm8, %v9563_v32  ;;  %8243 = vmatprep.mubr.msk.f32.mxu0 %vm9565_vm8, %v9563_v32 }
 0x9fa   :  { %9036 = vmatpush3.bf16.msra.mxu1 %v10225_v35  ;;  %9042 = vmatpush3.bf16.msra.mxu0 %v10191_v18  ;;  %v9047_v35 = vpack.c.bf16 %v3864_v8, %v3863_v30  ;;  %v3852_v18 = vld [vmem:[#allocation7] sm:$0xff] }
 0x9fb   :  { %9043 = vmatprep.subr.bf16.mxu1 %v9564_v47  ;;  %9049 = vmatprep.subr.bf16.mxu0 %v9564_v47 }
 0x9fd   :  { %8233 = vmatmul.mubr.msk.f32.vlgmr.msra.gmra.mrb[54].mxu1 %vm462_vm7, %v3532_v5  ;;  %8244 = vmatmul.mubr.msk.f32.vlgmr.msra.gmra.mrb[48].mxu0 %vm462_vm7, %v3532_v5 }
 0x9fe   :  { %9045 = vmatpush3.bf16.msra.mxu1 %v9044_v15  ;;  %8254 = vmatprep.mubr.msk.f32.mxu1 %vm9565_vm8, %v9563_v32  ;;  %v3843_v15 = vld [vmem:[#allocation9] sm:$0xff] }
 0x9ff   :  { %9046 = vmatprep.subr.bf16.mxu1 %v9564_v47  ;;  %8289 = vmatprep.mubr.msk.f32.mxu0 %vm9565_vm8, %v9563_v32 }
 0xa00   :  { %9051 = vmatpush3.bf16.msra.mxu0 %v10629_v22 }
 0xa01   :  { %9052 = vmatprep.subr.bf16.mxu0 %v9564_v47 }
 0xa02   :  { %9048 = vmatpush3.bf16.msra.mxu1 %v9047_v35 }
 0xa03   :  { %9079 = vmatprep.subr.bf16.mxu1 %v9564_v47 }
 0xa04   :  { %9054 = vmatpush3.bf16.msra.mxu0 %v10639_v25 }
 0xa05   :  { %8255 = vmatmul.mubr.msk.f32.vlgmr.msra.gmra.mrb[56].mxu1 %vm462_vm7, %v3852_v18  ;;  %9055 = vmatprep.subr.bf16.mxu0 %v9564_v47 }
 0xa06   :  { %8257 = vmatprep.mubr.msk.f32.mxu1 %vm9565_vm8, %v9563_v32  ;;  %9081 = vmatpush3.bf16.msra.mxu1 %v10649_v28 }
 0xa07   :  { %9082 = vmatprep.subr.bf16.mxu1 %v9564_v47 }
 0xa09   :  { %8258 = vmatmul.mubr.msk.f32.gmra.mrb[58].mxu1 %vm462_vm7, %v3853_v9 }
 0xa0a   :  { %8260 = vmatprep.mubr.msk.f32.mxu1 %vm9565_vm8, %v9563_v32  ;;  %9084 = vmatpush3.bf16.msra.mxu1 %v10659_v33 }
 0xa0b   :  { %9091 = vmatprep.subr.bf16.mxu1 %v9564_v47 }
 0xa0d   :  { %8261 = vmatmul.mubr.msk.f32.gmra.mrb[60].mxu1 %vm462_vm7, %v3854_v11 }
 0xa0e   :  { %8263 = vmatprep.mubr.msk.f32.mxu1 %vm9565_vm8, %v9563_v32 }
 0xa11   :  { %8264 = vmatmul.mubr.msk.f32.gmra.mrb[62].mxu1 %vm462_vm7, %v3855_v13 }
 0xa12   :  { %8266 = vmatprep.mubr.msk.f32.mxu1 %vm9565_vm8, %v9563_v32 }
 0xa15   :  { %8267 = vmatmul.mubr.msk.f32.gmra.mrb[64].mxu1 %vm462_vm7, %v3856_v14 }
 0xa16   :  { %8269 = vmatprep.mubr.msk.f32.mxu1 %vm9565_vm8, %v9563_v32 }
 0xa19   :  { %8270 = vmatmul.mubr.msk.f32.gmra.mrb[66].mxu1 %vm462_vm7, %v3857_v16 }
 0xa1a   :  { %8272 = vmatprep.mubr.msk.f32.mxu1 %vm9565_vm8, %v9563_v32 }
 0xa1d   :  { %8273 = vmatmul.mubr.msk.f32.gmra.mrb[68].mxu1 %vm462_vm7, %v3858_v17 }
 0xa1e   :  { %8275 = vmatprep.mubr.msk.f32.mxu1 %vm9565_vm8, %v9563_v32 }
 0xa21   :  { %8276 = vmatmul.mubr.msk.f32.gmra.mrb[70].mxu1 %vm462_vm7, %v3859_v19 }
 0xa22   :  { %8278 = vmatprep.mubr.msk.f32.mxu1 %vm9565_vm8, %v9563_v32 }
 0xac8   :  { %v3603_v10 = vpop.f32.mrb[52].mxu1  ;;  %v3675_v36 = vpop.f32.mrb[46].mxu0 }
 0xac9   :  { %v3607_v37 = vadd.f32 %v3603_v10, %v3533_v58  ;;  %v3679_v38 = vadd.f32 %v3675_v36, %v3608_v34  ;;  %v8212_v39 = vpop.f32.mrb[53].mxu1  ;;  %v8223_v40 = vpop.f32.mrb[47].mxu0 }
 0xaca   :  { %v7176_v40 = vld [vmem:[%s11092_s9 + $0x50] sm:$0xff] }
 0xacb   :  { %v7157_v41 = vmul.f32 -1.442695, %v3607_v37  ;;  %v7158_v42 = vmul.f32 -1.442695, %v3679_v38  ;;  %v7174_v37 = vld [vmem:[%s11092_s9 + $0x40] sm:$0xff]  ;;  %v7175_v38 = vld [vmem:[%s11092_s9 + $0x48] sm:$0xff] }
 0xacc   :  { %v10728_v39 = vpack.c.bf16 %v7175_v38, %v7174_v37 }
 0xacd   :  { %9402 = vpow2.f32 %v7157_v41  ;;  %v7177_v41 = vld [vmem:[%s11092_s9 + $0x58] sm:$0xff] }
 0xace   :  { %9404 = vpow2.f32 %v7158_v42  ;;  %v10741_v42 = vpack.c.bf16 %v7177_v41, %v7176_v40 }
 0xad0   :  { %v3747_v43 = vpop.f32.mrb[54].mxu1  ;;  %v3819_v44 = vpop.f32.mrb[48].mxu0 }
 0xad1   :  { %v3823_v12 = vadd.f32 %v3819_v44, %v3752_v60  ;;  %v8234_v45 = vpop.f32.mrb[55].mxu1  ;;  %v8245_v46 = vpop.f32.mrb[49].mxu0  ;;  %v3751_v50 = vadd.f32 %v3747_v43, %v3680_v48  ;;  %v7178_v43 = vld [vmem:[%s11092_s9 + $0x60] sm:$0xff]  ;;  %v7179_v60 = vld [vmem:[%s11092_s9 + $0x68] sm:$0xff] }
 0xad2   :  { %v10753_v44 = vpack.c.bf16 %v7179_v60, %v7178_v43  ;;  %v7181_v45 = vld [vmem:[%s11092_s9 + $0x78] sm:$0xff] }
 0xad3   :  { %v7159_v49 = vmul.f32 -1.442695, %v3823_v12  ;;  %v7180_v12 = vld [vmem:[%s11092_s9 + $0x70] sm:$0xff] }
 0xad4   :  { %v10764_v46 = vpack.c.bf16 %v7181_v45, %v7180_v12 }
 0xad5   :  { %9406 = vpow2.f32 %v7159_v49 }
 0xad6   :  { %9408 = vtanh.f32 %v3751_v50 }
 0xad7   :  { %v9403_v52 = vpop.eup %9402 }
 0xad8   :  { %v9405_v53 = vpop.eup %9404  ;;  %v3827_v54 = vadd.f32 1.0, %v9403_v52  ;;  %v3965_v56 = vpop.f32.mrb[56].mxu1 }
 0xad9   :  { %v3833_v57 = vadd.f32 1.0, %v9405_v53  ;;  %v3966_v59 = vadd.f32 %v10666_v51, %v3965_v56  ;;  %v8256_v61 = vpop.f32.mrb[57].mxu1 }
 0xada   :  { %9410 = vrcp.f32 %v3827_v54 }
 0xadb   :  { %9412 = vrcp.f32 %v3833_v57  ;;  %4009 = vst.msk [vmem:[#allocation3] sm:$0xff] %vm462_vm7, %v3966_v59  ;;  %4063 = vrot.lane.b32.xlu0 %v3966_v59, %s9566_s23  ;;  %4027 = vrot.lane.b32.xlu1 %v3966_v59, %s9567_s24 }
 0xadc   :  { %v3970_v55 = vpop.f32.mrb[58].mxu1 }
 0xadd   :  { %v3971_v62 = vadd.f32 %v10666_v51, %v3970_v55  ;;  %v8259_v0 = vpop.f32.mrb[59].mxu1 }
 0xadf   :  { %4010 = vst.msk [vmem:[#allocation3 + $0x8] sm:$0xff] %vm462_vm7, %v3971_v62  ;;  %4099 = vrot.lane.b32.xlu1 %v3966_v59, %s9568_s25  ;;  %4029 = vrot.lane.b32.xlu0 %v3971_v62, %s9567_s24  ;;  %v9407_v3 = vpop.eup %9406 }
 0xae0   :  { %v3975_v1 = vpop.f32.mrb[60].mxu1  ;;  %v9409_v4 = vpop.eup %9408  ;;  %v3840_v8 = vadd.f32 1.0, %v9407_v3 }
 0xae1   :  { %v3976_v63 = vadd.f32 %v10666_v51, %v3975_v1  ;;  %v8262_v2 = vpop.f32.mrb[61].mxu1 }
 0xae2   :  { %9414 = vrcp.f32 %v3840_v8 }
 0xae3   :  { %4011 = vst.msk [vmem:[#allocation3 + $0x10] sm:$0xff] %vm462_vm7, %v3976_v63  ;;  %4065 = vrot.lane.b32.xlu1 %v3971_v62, %s9566_s23  ;;  %4101 = vrot.lane.b32.xlu0 %v3971_v62, %s9568_s25 }
 0xae4   :  { %v9411_v5 = vpop.eup %9410  ;;  %v3980_v6 = vpop.f32.mrb[62].mxu1 }
 0xae5   :  { %v9413_v7 = vpop.eup %9412  ;;  %v3845_v30 = vmul.f32 %v9411_v5, %v9409_v4  ;;  %v3981_v35 = vadd.f32 %v10666_v51, %v3980_v6  ;;  %v8265_v18 = vpop.f32.mrb[63].mxu1 }
 0xae6   :  { %v3844_v9 = vmul.f32 %v9413_v7, %v3843_v15 }
 0xae7   :  { %4012 = vst.msk [vmem:[#allocation3 + $0x18] sm:$0xff] %vm462_vm7, %v3981_v35  ;;  %4067 = vrot.lane.b32.xlu0 %v3976_v63, %s9566_s23  ;;  %4031 = vrot.lane.b32.xlu1 %v3976_v63, %s9567_s24 }
 0xae8   :  { %v3846_v11 = vadd.f32 %v3845_v30, %v3844_v9  ;;  %v3985_v13 = vpop.f32.mrb[64].mxu1 }
 0xae9   :  { %v3986_v14 = vadd.f32 %v10666_v51, %v3985_v13  ;;  %v8268_v16 = vpop.f32.mrb[65].mxu1 }
 0xaea   :  { %9416 = vtanh.f32 %v3846_v11  ;;  %3849 = vst.msk [vmem:[#allocation9] sm:$0xff] %vm462_vm7, %v3846_v11  ;;  %v4157_v11 = vld [vmem:[#allocation3] sm:$0xff] }
 0xaeb   :  { %4155 = vst.msk [vmem:[#allocation9] sm:$0xff] %vm462_vm7, %v9563_v32  ;;  %4013 = vst.msk [vmem:[#allocation3 + $0x20] sm:$0xff] %vm462_vm7, %v3986_v14  ;;  %4103 = vrot.lane.b32.xlu1 %v3976_v63, %s9568_s25  ;;  %4033 = vrot.lane.b32.xlu0 %v3981_v35, %s9567_s24 }
 0xaec   :  { %v3990_v17 = vpop.f32.mrb[66].mxu1  ;;  %v9415_v26 = vpop.eup %9414 }
 0xaed   :  { %v3991_v19 = vadd.f32 %v10666_v51, %v3990_v17  ;;  %v8271_v20 = vpop.f32.mrb[67].mxu1 }
 0xaef   :  { %4014 = vst.msk [vmem:[#allocation3 + $0x28] sm:$0xff] %vm462_vm7, %v3991_v19  ;;  %4069 = vrot.lane.b32.xlu1 %v3981_v35, %s9566_s23  ;;  %4105 = vrot.lane.b32.xlu0 %v3981_v35, %s9568_s25 }
 0xaf0   :  { %v3995_v21 = vpop.f32.mrb[68].mxu1 }
 0xaf1   :  { %v3996_v23 = vadd.f32 %v10666_v51, %v3995_v21  ;;  %v8274_v24 = vpop.f32.mrb[69].mxu1 }
 0xaf2   :  { %v4467_v45 = vld [vmem:[#allocation9] sm:$0xff] }
 0xaf3   :  { %4015 = vst.msk [vmem:[#allocation3 + $0x30] sm:$0xff] %vm462_vm7, %v3996_v23  ;;  %4071 = vrot.lane.b32.xlu0 %v3986_v14, %s9566_s23  ;;  %4035 = vrot.lane.b32.xlu1 %v3986_v14, %s9567_s24 }
 0xaf4   :  { %v9417_v27 = vpop.eup %9416  ;;  %v4000_v29 = vpop.f32.mrb[70].mxu1 }
 0xaf5   :  { %v3848_v31 = vmul.f32 %v9417_v27, %v9415_v26  ;;  %v4001_v58 = vadd.f32 %v10666_v51, %v4000_v29  ;;  %v8277_v10 = vpop.f32.mrb[71].mxu1 }
 0xaf7   :  { %3850 = vst.msk [vmem:[#allocation8] sm:$0xff] %vm462_vm7, %v3848_v31  ;;  %3851 = vst.msk [vmem:[#allocation7 + $0x40] sm:$0xff] %vm462_vm7, %v3848_v31  ;;  %4107 = vrot.lane.b32.xlu1 %v3986_v14, %s9568_s25  ;;  %4037 = vrot.lane.b32.xlu0 %v3991_v19, %s9567_s24 }
 0xaf8   :  { %4016 = vst.msk [vmem:[#allocation3 + $0x38] sm:$0xff] %vm462_vm7, %v4001_v58  ;;  %4154 = vst.msk [vmem:[#allocation8] sm:$0xff] %vm462_vm7, %v9563_v32 }
 0xafb   :  { %4073 = vrot.lane.b32.xlu1 %v3991_v19, %s9566_s23  ;;  %4109 = vrot.lane.b32.xlu0 %v3991_v19, %s9568_s25 }
 0xafe   :  { %v3860_v34 = vld [vmem:[#allocation7 + $0x40] sm:$0xff] }
 0xaff   :  { %8279 = vmatmul.mubr.msk.f32.gmra.mrb[72].mxu1 %vm462_vm7, %v3860_v34  ;;  %4075 = vrot.lane.b32.xlu0 %v3996_v23, %s9566_s23  ;;  %v4156_v36 = vld [vmem:[#allocation8] sm:$0xff] }
 0xb00   :  { %4039 = vrot.lane.b32.xlu1 %v3996_v23, %s9567_s24  ;;  %8290 = vmatmul.mubr.msk.f32.vlgmr.msra.gmra.mrb[50].mxu0 %vm462_vm7, %v4156_v36 }
 0xb01   :  { %9057 = vmatpush3.bf16.msra.mxu0 %v10649_v28  ;;  %8300 = vmatprep.mubr.msk.f32.mxu0 %vm9565_vm8, %v9563_v32 }
 0xb02   :  { %9058 = vmatprep.subr.bf16.mxu0 %v9564_v47  ;;  %8344 = vmatprep.mubr.msk.f32.mxu1 %vm9565_vm8, %v9563_v32 }
 0xb03   :  { %4041 = vrot.lane.b32.xlu0 %v4001_v58, %s9567_s24 }
 0xb04   :  { %4111 = vrot.lane.b32.xlu1 %v3996_v23, %s9568_s25 }
 0xb05   :  { %9060 = vmatpush3.bf16.msra.mxu0 %v10659_v33 }
 0xb06   :  { %9061 = vmatprep.subr.bf16.mxu0 %v9564_v47 }
 0xb07   :  { %4113 = vrot.lane.b32.xlu0 %v4001_v58, %s9568_s25 }
 0xb08   :  { %8301 = vmatmul.mubr.msk.f32.vlgmr.msra.gmra.mrb[52].mxu0 %vm462_vm7, %v4156_v36  ;;  %4077 = vrot.lane.b32.xlu1 %v4001_v58, %s9566_s23 }
 0xb09   :  { %9063 = vmatpush3.bf16.msra.mxu0 %v10728_v39  ;;  %8311 = vmatprep.mubr.msk.f32.mxu0 %vm9565_vm8, %v9563_v32 }
 0xb0a   :  { %9064 = vmatprep.subr.bf16.mxu0 %v9564_v47 }
 0xb0d   :  { %9066 = vmatpush3.bf16.msra.mxu0 %v10741_v42 }
 0xb0e   :  { %9067 = vmatprep.subr.bf16.mxu0 %v9564_v47 }
 0xb10   :  { %8312 = vmatmul.mubr.msk.f32.vlgmr.msra.gmra.mrb[54].mxu0 %vm462_vm7, %v4156_v36 }
 0xb11   :  { %9069 = vmatpush3.bf16.msra.mxu0 %v10753_v44  ;;  %8322 = vmatprep.mubr.msk.f32.mxu0 %vm9565_vm8, %v9563_v32 }
 0xb12   :  { %9070 = vmatprep.subr.bf16.mxu0 %v9564_v47 }
 0xb15   :  { %9072 = vmatpush3.bf16.msra.mxu0 %v10764_v46 }
 0xb16   :  { %9073 = vmatprep.subr.bf16.mxu0 %v9564_v47 }
 0xb18   :  { %8323 = vmatmul.mubr.msk.f32.vlgmr.msra.gmra.mrb[56].mxu0 %vm462_vm7, %v4156_v36 }
 0xb19   :  { %9075 = vmatpush3.bf16.msra.mxu0 %v10629_v22  ;;  %8333 = vmatprep.mubr.msk.f32.mxu0 %vm9565_vm8, %v9563_v32 }
 0xb1a   :  { %9076 = vmatprep.subr.bf16.mxu0 %v9564_v47 }
 0xb1d   :  { %9078 = vmatpush3.bf16.msra.mxu0 %v10639_v25 }
 0xb1e   :  { %9085 = vmatprep.subr.bf16.mxu0 %v9564_v47 }
 0xb4d   :  { %v4064_v48 = vpop.permute.xlu0 %4063  ;;  %v4028_v49 = vpop.permute.xlu1 %4027 }
 0xb4e   :  { %4090 = vst.msk [vmem:[#allocation5] sm:$0xff] %vm462_vm7, %v4064_v48  ;;  %4054 = vst.msk [vmem:[#allocation4] sm:$0xff] %vm462_vm7, %v4028_v49 }
 0xb51   :  { %v4100_v50 = vpop.permute.xlu1 %4099  ;;  %v4030_v52 = vpop.permute.xlu0 %4029 }
 0xb52   :  { %4126 = vst.msk [vmem:[#allocation6] sm:$0xff] %vm462_vm7, %v4100_v50  ;;  %4055 = vst.msk [vmem:[#allocation4 + $0x8] sm:$0xff] %vm462_vm7, %v4030_v52 }
 0xb55   :  { %v4066_v53 = vpop.permute.xlu1 %4065  ;;  %v4102_v54 = vpop.permute.xlu0 %4101  ;;  %v4232_v19 = vld [vmem:[#allocation4] sm:$0xff]  ;;  %v4304_v27 = vld [vmem:[#allocation5] sm:$0xff] }
 0xb56   :  { %4091 = vst.msk [vmem:[#allocation5 + $0x8] sm:$0xff] %vm462_vm7, %v4066_v53  ;;  %4127 = vst.msk [vmem:[#allocation6 + $0x8] sm:$0xff] %vm462_vm7, %v4102_v54 }
 0xb59   :  { %v4068_v56 = vpop.permute.xlu0 %4067  ;;  %v4032_v57 = vpop.permute.xlu1 %4031  ;;  %v4376_v36 = vld [vmem:[#allocation6] sm:$0xff] }
 0xb5a   :  { %4092 = vst.msk [vmem:[#allocation5 + $0x10] sm:$0xff] %vm462_vm7, %v4068_v56  ;;  %4056 = vst.msk [vmem:[#allocation4 + $0x10] sm:$0xff] %vm462_vm7, %v4032_v57 }
 0xb5d   :  { %v4104_v59 = vpop.permute.xlu1 %4103  ;;  %v4034_v61 = vpop.permute.xlu0 %4033 }
 0xb5e   :  { %4128 = vst.msk [vmem:[#allocation6 + $0x10] sm:$0xff] %vm462_vm7, %v4104_v59  ;;  %4057 = vst.msk [vmem:[#allocation4 + $0x18] sm:$0xff] %vm462_vm7, %v4034_v61 }
 0xb61   :  { %v4070_v55 = vpop.permute.xlu1 %4069  ;;  %v4106_v62 = vpop.permute.xlu0 %4105 }
 0xb62   :  { %4093 = vst.msk [vmem:[#allocation5 + $0x18] sm:$0xff] %vm462_vm7, %v4070_v55  ;;  %4129 = vst.msk [vmem:[#allocation6 + $0x18] sm:$0xff] %vm462_vm7, %v4106_v62 }
 0xb65   :  { %v4072_v0 = vpop.permute.xlu0 %4071  ;;  %v4036_v1 = vpop.permute.xlu1 %4035 }
 0xb66   :  { %4094 = vst.msk [vmem:[#allocation5 + $0x20] sm:$0xff] %vm462_vm7, %v4072_v0  ;;  %4058 = vst.msk [vmem:[#allocation4 + $0x20] sm:$0xff] %vm462_vm7, %v4036_v1  ;;  %v4477_v1 = vld [vmem:[#allocation3 + $0x8] sm:$0xff] }
 0xb69   :  { %v4108_v63 = vpop.permute.xlu1 %4107  ;;  %v4038_v2 = vpop.permute.xlu0 %4037 }
 0xb6a   :  { %4130 = vst.msk [vmem:[#allocation6 + $0x20] sm:$0xff] %vm462_vm7, %v4108_v63  ;;  %4059 = vst.msk [vmem:[#allocation4 + $0x28] sm:$0xff] %vm462_vm7, %v4038_v2  ;;  %v4552_v2 = vld [vmem:[#allocation4 + $0x8] sm:$0xff] }
 0xb6d   :  { %v4074_v3 = vpop.permute.xlu1 %4073  ;;  %v4110_v4 = vpop.permute.xlu0 %4109 }
 0xb6e   :  { %4095 = vst.msk [vmem:[#allocation5 + $0x28] sm:$0xff] %vm462_vm7, %v4074_v3  ;;  %4131 = vst.msk [vmem:[#allocation6 + $0x28] sm:$0xff] %vm462_vm7, %v4110_v4 }
 0xb71   :  { %v4076_v5 = vpop.permute.xlu0 %4075 }
 0xb72   :  { %4096 = vst.msk [vmem:[#allocation5 + $0x30] sm:$0xff] %vm462_vm7, %v4076_v5  ;;  %v4040_v6 = vpop.permute.xlu1 %4039 }
 0xb73   :  { %4060 = vst.msk [vmem:[#allocation4 + $0x30] sm:$0xff] %vm462_vm7, %v4040_v6 }
 0xb75   :  { %v4042_v7 = vpop.permute.xlu0 %4041 }
 0xb76   :  { %v4112_v15 = vpop.permute.xlu1 %4111  ;;  %4061 = vst.msk [vmem:[#allocation4 + $0x38] sm:$0xff] %vm462_vm7, %v4042_v7 }
 0xb77   :  { %4132 = vst.msk [vmem:[#allocation6 + $0x30] sm:$0xff] %vm462_vm7, %v4112_v15 }
 0xb79   :  { %v4114_v30 = vpop.permute.xlu0 %4113 }
 0xb7a   :  { %v4078_v8 = vpop.permute.xlu1 %4077  ;;  %4133 = vst.msk [vmem:[#allocation6 + $0x38] sm:$0xff] %vm462_vm7, %v4114_v30 }
 0xb7b   :  { %4097 = vst.msk [vmem:[#allocation5 + $0x38] sm:$0xff] %vm462_vm7, %v4078_v8 }
 0xbd2   :  { %v4005_v35 = vpop.f32.mrb[72].mxu1 }
 0xbd3   :  { %v4006_v18 = vadd.f32 %v10666_v51, %v4005_v35  ;;  %v8280_v9 = vpop.f32.mrb[73].mxu1  ;;  %v4227_v13 = vpop.f32.mrb[50].mxu0  ;;  %v4696_v35 = vld [vmem:[#allocation6 + $0x8] sm:$0xff] }
 0xbd4   :  { %v4231_v14 = vadd.f32 %v4227_v13, %v4157_v11  ;;  %v8291_v16 = vpop.f32.mrb[51].mxu0 }
 0xbd5   :  { %4017 = vst.msk [vmem:[#allocation3 + $0x40] sm:$0xff] %vm462_vm7, %v4006_v18  ;;  %4079 = vrot.lane.b32.xlu0 %v4006_v18, %s9566_s23  ;;  %4043 = vrot.lane.b32.xlu1 %v4006_v18, %s9567_s24 }
 0xbd6   :  { %v7186_v17 = vmul.f32 -1.442695, %v4231_v14  ;;  %v4624_v14 = vld [vmem:[#allocation5 + $0x8] sm:$0xff] }
 0xbd8   :  { %9418 = vpow2.f32 %v7186_v17 }
 0xbd9   :  { %4115 = vrot.lane.b32.xlu1 %v4006_v18, %s9568_s25 }
 0xbdb   :  { %v4299_v20 = vpop.f32.mrb[52].mxu0 }
 0xbdc   :  { %v4303_v21 = vadd.f32 %v4299_v20, %v4232_v19  ;;  %v8302_v23 = vpop.f32.mrb[53].mxu0 }
 0xbde   :  { %v7187_v51 = vmul.f32 -1.442695, %v4303_v21 }
 0xbe0   :  { %9420 = vpow2.f32 %v7187_v51 }
 0xbe2   :  { %v9419_v24 = vpop.eup %9418 }
 0xbe3   :  { %v4451_v26 = vadd.f32 1.0, %v9419_v24  ;;  %v4371_v29 = vpop.f32.mrb[54].mxu0 }
 0xbe4   :  { %v4375_v31 = vadd.f32 %v4371_v29, %v4304_v27  ;;  %v8313_v58 = vpop.f32.mrb[55].mxu0 }
 0xbe5   :  { %9422 = vrcp.f32 %v4451_v26 }
 0xbe6   :  { %9424 = vtanh.f32 %v4375_v31 }
 0xbea   :  { %v9421_v10 = vpop.eup %9420 }
 0xbeb   :  { %v4457_v34 = vadd.f32 1.0, %v9421_v10  ;;  %v4443_v37 = vpop.f32.mrb[56].mxu0 }
 0xbec   :  { %v4447_v38 = vadd.f32 %v4443_v37, %v4376_v36  ;;  %v8324_v40 = vpop.f32.mrb[57].mxu0 }
 0xbed   :  { %9426 = vrcp.f32 %v4457_v34 }
 0xbee   :  { %v7188_v41 = vmul.f32 -1.442695, %v4447_v38 }
 0xbef   :  { %v9423_v43 = vpop.eup %9422 }
 0xbf0   :  { %v9425_v60 = vpop.eup %9424  ;;  %9428 = vpow2.f32 %v7188_v41 }
 0xbf1   :  { %v4469_v12 = vmul.f32 %v9425_v60, %v9423_v43  ;;  %v4797_v43 = vld [vmem:[#allocation3 + $0x10] sm:$0xff] }
 0xbf7   :  { %v9427_v48 = vpop.eup %9426 }
 0xbf8   :  { %v4468_v49 = vmul.f32 %v9427_v48, %v4467_v45 }
 0xbfa   :  { %v9429_v50 = vpop.eup %9428  ;;  %v4470_v52 = vadd.f32 %v4469_v12, %v4468_v49  ;;  %v4872_v12 = vld [vmem:[#allocation4 + $0x10] sm:$0xff] }
 0xbfb   :  { %v4464_v53 = vadd.f32 1.0, %v9429_v50 }
 0xbfc   :  { %9430 = vtanh.f32 %v4470_v52  ;;  %4473 = vst.msk [vmem:[#allocation9] sm:$0xff] %vm462_vm7, %v4470_v52 }
 0xbfd   :  { %9432 = vrcp.f32 %v4464_v53 }
 0xc03   :  { %v4787_v29 = vld [vmem:[#allocation9] sm:$0xff] }
 0xc06   :  { %v9431_v54 = vpop.eup %9430 }
 0xc07   :  { %v9433_v56 = vpop.eup %9432 }
 0xc08   :  { %v4472_v57 = vmul.f32 %v9433_v56, %v9431_v54 }
 0xc0a   :  { %4474 = vst.msk [vmem:[#allocation8] sm:$0xff] %vm462_vm7, %v4472_v57  ;;  %4475 = vst.msk [vmem:[#allocation7] sm:$0xff] %vm462_vm7, %v4472_v57  ;;  %v5016_v57 = vld [vmem:[#allocation6 + $0x10] sm:$0xff] }
 0xc11   :  { %v7036_v59 = vld [vmem:[#allocation7] sm:$0xff]  ;;  %v4476_v61 = vld [vmem:[#allocation8] sm:$0xff] }
 0xc12   :  { %7045 = vst.msk [vmem:[%s11094_s11] sm:$0xff] %vm462_vm7, %v7036_v59  ;;  %8334 = vmatmul.mubr.msk.f32.vlgmr.msra.gmra.mrb[58].mxu0 %vm462_vm7, %v4476_v61  ;;  %8345 = vmatmul.mubr.msk.f32.vlgmr.msra.gmra.mrb[74].mxu1 %vm462_vm7, %v4476_v61 }
 0xc13   :  { %9087 = vmatpush3.bf16.msra.mxu0 %v10728_v39  ;;  %9093 = vmatpush3.bf16.msra.mxu1 %v10753_v44 }
 0xc14   :  { %9088 = vmatprep.subr.bf16.mxu0 %v9564_v47  ;;  %9094 = vmatprep.subr.bf16.mxu1 %v9564_v47 }
 0xc15   :  { %8355 = vmatprep.mubr.msk.f32.mxu0 %vm9565_vm8, %v9563_v32  ;;  %8366 = vmatprep.mubr.msk.f32.mxu1 %vm9565_vm8, %v9563_v32 }
 0xc17   :  { %9090 = vmatpush3.bf16.msra.mxu0 %v10741_v42  ;;  %9096 = vmatpush3.bf16.msra.mxu1 %v10764_v46 }
 0xc18   :  { %9097 = vmatprep.subr.bf16.mxu0 %v9564_v47  ;;  %9103 = vmatprep.subr.bf16.mxu1 %v9564_v47 }
 0xc1a   :  { %8356 = vmatmul.mubr.msk.f32.vlgmr.msra.gmra.mrb[60].mxu0 %vm462_vm7, %v4476_v61  ;;  %8367 = vmatmul.mubr.msk.f32.vlgmr.msra.gmra.mrb[76].mxu1 %vm462_vm7, %v4476_v61 }
 0xc1b   :  { %9099 = vmatpush3.bf16.msra.mxu0 %v10629_v22  ;;  %9105 = vmatpush3.bf16.msra.mxu1 %v10649_v28 }
 0xc1c   :  { %9100 = vmatprep.subr.bf16.mxu0 %v9564_v47  ;;  %9106 = vmatprep.subr.bf16.mxu1 %v9564_v47 }
 0xc1d   :  { %8377 = vmatprep.mubr.msk.f32.mxu0 %vm9565_vm8, %v9563_v32  ;;  %8388 = vmatprep.mubr.msk.f32.mxu1 %vm9565_vm8, %v9563_v32 }
 0xc1f   :  { %9102 = vmatpush3.bf16.msra.mxu0 %v10639_v25  ;;  %9108 = vmatpush3.bf16.msra.mxu1 %v10659_v33 }
 0xc20   :  { %9109 = vmatprep.subr.bf16.mxu0 %v9564_v47  ;;  %9115 = vmatprep.subr.bf16.mxu1 %v9564_v47 }
 0xc47   :  { %v4080_v55 = vpop.permute.xlu0 %4079  ;;  %v4044_v62 = vpop.permute.xlu1 %4043 }
 0xc48   :  { %4098 = vst.msk [vmem:[#allocation5 + $0x40] sm:$0xff] %vm462_vm7, %v4080_v55  ;;  %4062 = vst.msk [vmem:[#allocation4 + $0x40] sm:$0xff] %vm462_vm7, %v4044_v62 }
 0xc4b   :  { %v4116_v0 = vpop.permute.xlu1 %4115 }
 0xc4c   :  { %4134 = vst.msk [vmem:[#allocation6 + $0x40] sm:$0xff] %vm462_vm7, %v4116_v0  ;;  %v4944_v0 = vld [vmem:[#allocation5 + $0x10] sm:$0xff] }
 0xce5   :  { %v4547_v63 = vpop.f32.mrb[58].mxu0  ;;  %v4619_v3 = vpop.f32.mrb[74].mxu1 }
 0xce6   :  { %v4551_v4 = vadd.f32 %v4547_v63, %v4477_v1  ;;  %v4623_v5 = vadd.f32 %v4619_v3, %v4552_v2  ;;  %v8335_v6 = vpop.f32.mrb[59].mxu0  ;;  %v8346_v7 = vpop.f32.mrb[75].mxu1 }
 0xce8   :  { %v7193_v15 = vmul.f32 -1.442695, %v4551_v4  ;;  %v7194_v30 = vmul.f32 -1.442695, %v4623_v5 }
 0xcea   :  { %9434 = vpow2.f32 %v7193_v15 }
 0xceb   :  { %9436 = vpow2.f32 %v7194_v30 }
 0xced   :  { %v4691_v8 = vpop.f32.mrb[60].mxu0  ;;  %v4763_v18 = vpop.f32.mrb[76].mxu1 }
 0xcee   :  { %v4767_v9 = vadd.f32 %v4763_v18, %v4696_v35  ;;  %v8357_v11 = vpop.f32.mrb[61].mxu0  ;;  %v8368_v13 = vpop.f32.mrb[77].mxu1  ;;  %v4695_v17 = vadd.f32 %v4691_v8, %v4624_v14 }
 0xcf0   :  { %v7195_v16 = vmul.f32 -1.442695, %v4767_v9 }
 0xcf2   :  { %9438 = vpow2.f32 %v7195_v16 }
 0xcf3   :  { %9440 = vtanh.f32 %v4695_v17 }
 0xcf4   :  { %v9435_v19 = vpop.eup %9434 }
 0xcf5   :  { %v9437_v20 = vpop.eup %9436  ;;  %v4771_v21 = vadd.f32 1.0, %v9435_v19 }
 0xcf6   :  { %v4777_v23 = vadd.f32 1.0, %v9437_v20  ;;  %v5117_v20 = vld [vmem:[#allocation3 + $0x18] sm:$0xff] }
 0xcf7   :  { %9442 = vrcp.f32 %v4771_v21 }
 0xcf8   :  { %9444 = vrcp.f32 %v4777_v23  ;;  %v5192_v23 = vld [vmem:[#allocation4 + $0x18] sm:$0xff] }
 0xcfc   :  { %v9439_v51 = vpop.eup %9438 }
 0xcfd   :  { %v9441_v24 = vpop.eup %9440  ;;  %v4784_v58 = vadd.f32 1.0, %v9439_v51 }
 0xcff   :  { %9446 = vrcp.f32 %v4784_v58 }
 0xd01   :  { %v9443_v26 = vpop.eup %9442 }
 0xd02   :  { %v9445_v27 = vpop.eup %9444  ;;  %v4789_v31 = vmul.f32 %v9443_v26, %v9441_v24 }
 0xd03   :  { %v4788_v10 = vmul.f32 %v9445_v27, %v4787_v29 }
 0xd05   :  { %v4790_v34 = vadd.f32 %v4789_v31, %v4788_v10 }
 0xd07   :  { %9448 = vtanh.f32 %v4790_v34  ;;  %4793 = vst.msk [vmem:[#allocation9] sm:$0xff] %vm462_vm7, %v4790_v34  ;;  %v5336_v34 = vld [vmem:[#allocation6 + $0x18] sm:$0xff] }
 0xd09   :  { %v9447_v36 = vpop.eup %9446 }
 0xd0e   :  { %v5107_v8 = vld [vmem:[#allocation9] sm:$0xff] }
 0xd11   :  { %v9449_v37 = vpop.eup %9448 }
 0xd12   :  { %v4792_v38 = vmul.f32 %v9449_v37, %v9447_v36 }
 0xd14   :  { %4794 = vst.msk [vmem:[#allocation8] sm:$0xff] %vm462_vm7, %v4792_v38  ;;  %4795 = vst.msk [vmem:[#allocation7 + $0x8] sm:$0xff] %vm462_vm7, %v4792_v38 }
 0xd1b   :  { %v7037_v40 = vld [vmem:[#allocation7 + $0x8] sm:$0xff] }
 0xd1c   :  { %v4796_v41 = vld [vmem:[#allocation8] sm:$0xff]  ;;  %7046 = vst.msk [vmem:[%s11094_s11 + $0x8] sm:$0xff] %vm462_vm7, %v7037_v40 }
 0xd1d   :  { %8378 = vmatmul.mubr.msk.f32.vlgmr.msra.gmra.mrb[62].mxu0 %vm462_vm7, %v4796_v41  ;;  %8389 = vmatmul.mubr.msk.f32.vlgmr.msra.gmra.mrb[78].mxu1 %vm462_vm7, %v4796_v41 }
 0xd1e   :  { %9111 = vmatpush3.bf16.msra.mxu0 %v10728_v39  ;;  %9117 = vmatpush3.bf16.msra.mxu1 %v10753_v44 }
 0xd1f   :  { %9112 = vmatprep.subr.bf16.mxu0 %v9564_v47  ;;  %9118 = vmatprep.subr.bf16.mxu1 %v9564_v47 }
 0xd20   :  { %8399 = vmatprep.mubr.msk.f32.mxu0 %vm9565_vm8, %v9563_v32  ;;  %8410 = vmatprep.mubr.msk.f32.mxu1 %vm9565_vm8, %v9563_v32 }
 0xd22   :  { %9114 = vmatpush3.bf16.msra.mxu0 %v10741_v42  ;;  %9120 = vmatpush3.bf16.msra.mxu1 %v10764_v46 }
 0xd23   :  { %9121 = vmatprep.subr.bf16.mxu0 %v9564_v47  ;;  %9127 = vmatprep.subr.bf16.mxu1 %v9564_v47 }
 0xd25   :  { %8400 = vmatmul.mubr.msk.f32.vlgmr.msra.gmra.mrb[64].mxu0 %vm462_vm7, %v4796_v41  ;;  %8411 = vmatmul.mubr.msk.f32.vlgmr.msra.gmra.mrb[80].mxu1 %vm462_vm7, %v4796_v41  ;;  %v5264_v41 = vld [vmem:[#allocation5 + $0x18] sm:$0xff] }
 0xd26   :  { %9123 = vmatpush3.bf16.msra.mxu0 %v10629_v22  ;;  %9129 = vmatpush3.bf16.msra.mxu1 %v10649_v28 }
 0xd27   :  { %9124 = vmatprep.subr.bf16.mxu0 %v9564_v47  ;;  %9130 = vmatprep.subr.bf16.mxu1 %v9564_v47 }
 0xd28   :  { %8421 = vmatprep.mubr.msk.f32.mxu0 %vm9565_vm8, %v9563_v32  ;;  %8432 = vmatprep.mubr.msk.f32.mxu1 %vm9565_vm8, %v9563_v32 }
 0xd2a   :  { %9126 = vmatpush3.bf16.msra.mxu0 %v10639_v25  ;;  %9132 = vmatpush3.bf16.msra.mxu1 %v10659_v33 }
 0xd2b   :  { %9133 = vmatprep.subr.bf16.mxu0 %v9564_v47  ;;  %9139 = vmatprep.subr.bf16.mxu1 %v9564_v47 }
 0xdf0   :  { %v4867_v60 = vpop.f32.mrb[62].mxu0  ;;  %v4939_v45 = vpop.f32.mrb[78].mxu1 }
 0xdf1   :  { %v4871_v48 = vadd.f32 %v4867_v60, %v4797_v43  ;;  %v4943_v49 = vadd.f32 %v4939_v45, %v4872_v12  ;;  %v8379_v50 = vpop.f32.mrb[63].mxu0  ;;  %v8390_v52 = vpop.f32.mrb[79].mxu1 }
 0xdf3   :  { %v7200_v53 = vmul.f32 -1.442695, %v4871_v48  ;;  %v7201_v54 = vmul.f32 -1.442695, %v4943_v49 }
 0xdf5   :  { %9450 = vpow2.f32 %v7200_v53 }
 0xdf6   :  { %9452 = vpow2.f32 %v7201_v54 }
 0xdf8   :  { %v5011_v56 = vpop.f32.mrb[64].mxu0  ;;  %v5083_v59 = vpop.f32.mrb[80].mxu1 }
 0xdf9   :  { %v5087_v61 = vadd.f32 %v5083_v59, %v5016_v57  ;;  %v8401_v55 = vpop.f32.mrb[65].mxu0  ;;  %v8412_v62 = vpop.f32.mrb[81].mxu1  ;;  %v5015_v63 = vadd.f32 %v5011_v56, %v4944_v0 }
 0xdfb   :  { %v7202_v1 = vmul.f32 -1.442695, %v5087_v61 }
 0xdfd   :  { %9454 = vpow2.f32 %v7202_v1 }
 0xdfe   :  { %9456 = vtanh.f32 %v5015_v63 }
 0xdff   :  { %v9451_v2 = vpop.eup %9450 }
 0xe00   :  { %v9453_v3 = vpop.eup %9452  ;;  %v5091_v4 = vadd.f32 1.0, %v9451_v2 }
 0xe01   :  { %v5097_v5 = vadd.f32 1.0, %v9453_v3  ;;  %v5437_v3 = vld [vmem:[#allocation3 + $0x20] sm:$0xff] }
 0xe02   :  { %9458 = vrcp.f32 %v5091_v4 }
 0xe03   :  { %9460 = vrcp.f32 %v5097_v5  ;;  %v5512_v5 = vld [vmem:[#allocation4 + $0x20] sm:$0xff] }
 0xe07   :  { %v9455_v6 = vpop.eup %9454 }
 0xe08   :  { %v9457_v7 = vpop.eup %9456  ;;  %v5104_v18 = vadd.f32 1.0, %v9455_v6 }
 0xe0a   :  { %9462 = vrcp.f32 %v5104_v18 }
 0xe0c   :  { %v9459_v15 = vpop.eup %9458 }
 0xe0d   :  { %v9461_v30 = vpop.eup %9460  ;;  %v5109_v35 = vmul.f32 %v9459_v15, %v9457_v7 }
 0xe0e   :  { %v5108_v9 = vmul.f32 %v9461_v30, %v5107_v8 }
 0xe10   :  { %v5110_v11 = vadd.f32 %v5109_v35, %v5108_v9 }
 0xe12   :  { %9464 = vtanh.f32 %v5110_v11  ;;  %5113 = vst.msk [vmem:[#allocation9] sm:$0xff] %vm462_vm7, %v5110_v11  ;;  %v5656_v11 = vld [vmem:[#allocation6 + $0x20] sm:$0xff] }
 0xe14   :  { %v9463_v13 = vpop.eup %9462 }
 0xe19   :  { %v5427_v56 = vld [vmem:[#allocation9] sm:$0xff] }
 0xe1c   :  { %v9465_v14 = vpop.eup %9464 }
 0xe1d   :  { %v5112_v16 = vmul.f32 %v9465_v14, %v9463_v13 }
 0xe1f   :  { %5114 = vst.msk [vmem:[#allocation8] sm:$0xff] %vm462_vm7, %v5112_v16  ;;  %5115 = vst.msk [vmem:[#allocation7 + $0x10] sm:$0xff] %vm462_vm7, %v5112_v16 }
 0xe26   :  { %v7038_v17 = vld [vmem:[#allocation7 + $0x10] sm:$0xff]  ;;  %v5116_v19 = vld [vmem:[#allocation8] sm:$0xff] }
 0xe27   :  { %7047 = vst.msk [vmem:[%s11094_s11 + $0x10] sm:$0xff] %vm462_vm7, %v7038_v17  ;;  %8422 = vmatmul.mubr.msk.f32.vlgmr.msra.gmra.mrb[66].mxu0 %vm462_vm7, %v5116_v19  ;;  %8433 = vmatmul.mubr.msk.f32.vlgmr.msra.gmra.mrb[82].mxu1 %vm462_vm7, %v5116_v19 }
 0xe28   :  { %9135 = vmatpush3.bf16.msra.mxu0 %v10728_v39  ;;  %9141 = vmatpush3.bf16.msra.mxu1 %v10753_v44 }
 0xe29   :  { %9136 = vmatprep.subr.bf16.mxu0 %v9564_v47  ;;  %9142 = vmatprep.subr.bf16.mxu1 %v9564_v47 }
 0xe2a   :  { %8443 = vmatprep.mubr.msk.f32.mxu0 %vm9565_vm8, %v9563_v32  ;;  %8454 = vmatprep.mubr.msk.f32.mxu1 %vm9565_vm8, %v9563_v32 }
 0xe2c   :  { %9138 = vmatpush3.bf16.msra.mxu0 %v10741_v42  ;;  %9144 = vmatpush3.bf16.msra.mxu1 %v10764_v46 }
 0xe2d   :  { %9145 = vmatprep.subr.bf16.mxu0 %v9564_v47  ;;  %9151 = vmatprep.subr.bf16.mxu1 %v9564_v47 }
 0xe2f   :  { %8444 = vmatmul.mubr.msk.f32.vlgmr.msra.gmra.mrb[68].mxu0 %vm462_vm7, %v5116_v19  ;;  %8455 = vmatmul.mubr.msk.f32.vlgmr.msra.gmra.mrb[84].mxu1 %vm462_vm7, %v5116_v19  ;;  %v5584_v19 = vld [vmem:[#allocation5 + $0x20] sm:$0xff] }
 0xe30   :  { %9147 = vmatpush3.bf16.msra.mxu0 %v10629_v22  ;;  %9153 = vmatpush3.bf16.msra.mxu1 %v10649_v28 }
 0xe31   :  { %9148 = vmatprep.subr.bf16.mxu0 %v9564_v47  ;;  %9154 = vmatprep.subr.bf16.mxu1 %v9564_v47 }
 0xe32   :  { %8465 = vmatprep.mubr.msk.f32.mxu0 %vm9565_vm8, %v9563_v32  ;;  %8476 = vmatprep.mubr.msk.f32.mxu1 %vm9565_vm8, %v9563_v32 }
 0xe34   :  { %9150 = vmatpush3.bf16.msra.mxu0 %v10639_v25  ;;  %9156 = vmatpush3.bf16.msra.mxu1 %v10659_v33 }
 0xe35   :  { %9157 = vmatprep.subr.bf16.mxu0 %v9564_v47  ;;  %9163 = vmatprep.subr.bf16.mxu1 %v9564_v47 }
 0xefa   :  { %v5187_v21 = vpop.f32.mrb[66].mxu0  ;;  %v5259_v51 = vpop.f32.mrb[82].mxu1 }
 0xefb   :  { %v5191_v24 = vadd.f32 %v5187_v21, %v5117_v20  ;;  %v5263_v26 = vadd.f32 %v5259_v51, %v5192_v23  ;;  %v8423_v27 = vpop.f32.mrb[67].mxu0  ;;  %v8434_v29 = vpop.f32.mrb[83].mxu1 }
 0xefd   :  { %v7207_v31 = vmul.f32 -1.442695, %v5191_v24  ;;  %v7208_v58 = vmul.f32 -1.442695, %v5263_v26 }
 0xeff   :  { %9466 = vpow2.f32 %v7207_v31 }
 0xf00   :  { %9468 = vpow2.f32 %v7208_v58 }
 0xf02   :  { %v5331_v10 = vpop.f32.mrb[68].mxu0  ;;  %v5403_v36 = vpop.f32.mrb[84].mxu1 }
 0xf03   :  { %v5407_v37 = vadd.f32 %v5403_v36, %v5336_v34  ;;  %v8445_v38 = vpop.f32.mrb[69].mxu0  ;;  %v8456_v40 = vpop.f32.mrb[85].mxu1  ;;  %v5335_v60 = vadd.f32 %v5331_v10, %v5264_v41 }
 0xf05   :  { %v7209_v43 = vmul.f32 -1.442695, %v5407_v37 }
 0xf07   :  { %9470 = vpow2.f32 %v7209_v43 }
 0xf08   :  { %9472 = vtanh.f32 %v5335_v60 }
 0xf09   :  { %v9467_v12 = vpop.eup %9466 }
 0xf0a   :  { %v9469_v45 = vpop.eup %9468  ;;  %v5411_v48 = vadd.f32 1.0, %v9467_v12 }
 0xf0b   :  { %v5417_v49 = vadd.f32 1.0, %v9469_v45  ;;  %v5757_v45 = vld [vmem:[#allocation3 + $0x28] sm:$0xff] }
 0xf0c   :  { %9474 = vrcp.f32 %v5411_v48 }
 0xf0d   :  { %9476 = vrcp.f32 %v5417_v49  ;;  %v5832_v49 = vld [vmem:[#allocation4 + $0x28] sm:$0xff] }
 0xf11   :  { %v9471_v50 = vpop.eup %9470 }
 0xf12   :  { %v9473_v52 = vpop.eup %9472  ;;  %v5424_v59 = vadd.f32 1.0, %v9471_v50 }
 0xf14   :  { %9478 = vrcp.f32 %v5424_v59 }
 0xf16   :  { %v9475_v53 = vpop.eup %9474 }
 0xf17   :  { %v9477_v54 = vpop.eup %9476  ;;  %v5429_v57 = vmul.f32 %v9475_v53, %v9473_v52 }
 0xf18   :  { %v5428_v61 = vmul.f32 %v9477_v54, %v5427_v56 }
 0xf1a   :  { %v5430_v55 = vadd.f32 %v5429_v57, %v5428_v61 }
 0xf1c   :  { %9480 = vtanh.f32 %v5430_v55  ;;  %5433 = vst.msk [vmem:[#allocation9] sm:$0xff] %vm462_vm7, %v5430_v55  ;;  %v5976_v55 = vld [vmem:[#allocation6 + $0x28] sm:$0xff] }
 0xf1e   :  { %v9479_v62 = vpop.eup %9478 }
 0xf23   :  { %v5747_v10 = vld [vmem:[#allocation9] sm:$0xff] }
 0xf26   :  { %v9481_v0 = vpop.eup %9480 }
 0xf27   :  { %v5432_v1 = vmul.f32 %v9481_v0, %v9479_v62 }
 0xf29   :  { %5434 = vst.msk [vmem:[#allocation8] sm:$0xff] %vm462_vm7, %v5432_v1  ;;  %5435 = vst.msk [vmem:[#allocation7 + $0x18] sm:$0xff] %vm462_vm7, %v5432_v1 }
 0xf30   :  { %v7039_v63 = vld [vmem:[#allocation7 + $0x18] sm:$0xff]  ;;  %v5436_v2 = vld [vmem:[#allocation8] sm:$0xff] }
 0xf31   :  { %7048 = vst.msk [vmem:[%s11094_s11 + $0x18] sm:$0xff] %vm462_vm7, %v7039_v63  ;;  %8466 = vmatmul.mubr.msk.f32.vlgmr.msra.gmra.mrb[70].mxu0 %vm462_vm7, %v5436_v2  ;;  %8477 = vmatmul.mubr.msk.f32.vlgmr.msra.gmra.mrb[86].mxu1 %vm462_vm7, %v5436_v2 }
 0xf32   :  { %9159 = vmatpush3.bf16.msra.mxu0 %v10728_v39  ;;  %9165 = vmatpush3.bf16.msra.mxu1 %v10753_v44 }
 0xf33   :  { %9160 = vmatprep.subr.bf16.mxu0 %v9564_v47  ;;  %9166 = vmatprep.subr.bf16.mxu1 %v9564_v47 }
 0xf34   :  { %8487 = vmatprep.mubr.msk.f32.mxu0 %vm9565_vm8, %v9563_v32  ;;  %8498 = vmatprep.mubr.msk.f32.mxu1 %vm9565_vm8, %v9563_v32 }
 0xf36   :  { %9162 = vmatpush3.bf16.msra.mxu0 %v10741_v42  ;;  %9168 = vmatpush3.bf16.msra.mxu1 %v10764_v46 }
 0xf37   :  { %9169 = vmatprep.subr.bf16.mxu0 %v9564_v47  ;;  %9175 = vmatprep.subr.bf16.mxu1 %v9564_v47 }
 0xf39   :  { %8488 = vmatmul.mubr.msk.f32.vlgmr.msra.gmra.mrb[72].mxu0 %vm462_vm7, %v5436_v2  ;;  %8499 = vmatmul.mubr.msk.f32.vlgmr.msra.gmra.mrb[88].mxu1 %vm462_vm7, %v5436_v2  ;;  %v5904_v2 = vld [vmem:[#allocation5 + $0x28] sm:$0xff] }
 0xf3a   :  { %9171 = vmatpush3.bf16.msra.mxu0 %v10629_v22  ;;  %9177 = vmatpush3.bf16.msra.mxu1 %v10649_v28 }
 0xf3b   :  { %9172 = vmatprep.subr.bf16.mxu0 %v9564_v47  ;;  %9178 = vmatprep.subr.bf16.mxu1 %v9564_v47 }
 0xf3c   :  { %8509 = vmatprep.mubr.msk.f32.mxu0 %vm9565_vm8, %v9563_v32  ;;  %8520 = vmatprep.mubr.msk.f32.mxu1 %vm9565_vm8, %v9563_v32 }
 0xf3e   :  { %9174 = vmatpush3.bf16.msra.mxu0 %v10639_v25  ;;  %9180 = vmatpush3.bf16.msra.mxu1 %v10659_v33 }
 0xf3f   :  { %9181 = vmatprep.subr.bf16.mxu0 %v9564_v47  ;;  %9187 = vmatprep.subr.bf16.mxu1 %v9564_v47 }
0x1004   :  { %v5507_v4 = vpop.f32.mrb[70].mxu0  ;;  %v5579_v6 = vpop.f32.mrb[86].mxu1 }
0x1005   :  { %v5511_v7 = vadd.f32 %v5507_v4, %v5437_v3  ;;  %v5583_v15 = vadd.f32 %v5579_v6, %v5512_v5  ;;  %v8467_v30 = vpop.f32.mrb[71].mxu0  ;;  %v8478_v8 = vpop.f32.mrb[87].mxu1 }
0x1007   :  { %v7214_v35 = vmul.f32 -1.442695, %v5511_v7  ;;  %v7215_v18 = vmul.f32 -1.442695, %v5583_v15 }
0x1009   :  { %9482 = vpow2.f32 %v7214_v35 }
0x100a   :  { %9484 = vpow2.f32 %v7215_v18 }
0x100c   :  { %v5651_v9 = vpop.f32.mrb[72].mxu0  ;;  %v5723_v13 = vpop.f32.mrb[88].mxu1 }
0x100d   :  { %v5727_v14 = vadd.f32 %v5723_v13, %v5656_v11  ;;  %v8489_v16 = vpop.f32.mrb[73].mxu0  ;;  %v8500_v17 = vpop.f32.mrb[89].mxu1  ;;  %v5655_v21 = vadd.f32 %v5651_v9, %v5584_v19 }
0x100f   :  { %v7216_v20 = vmul.f32 -1.442695, %v5727_v14 }
0x1011   :  { %9486 = vpow2.f32 %v7216_v20 }
0x1012   :  { %9488 = vtanh.f32 %v5655_v21 }
0x1013   :  { %v9483_v23 = vpop.eup %9482 }
0x1014   :  { %v9485_v51 = vpop.eup %9484  ;;  %v5731_v24 = vadd.f32 1.0, %v9483_v23 }
0x1015   :  { %v5737_v26 = vadd.f32 1.0, %v9485_v51  ;;  %v6077_v51 = vld [vmem:[#allocation3 + $0x30] sm:$0xff] }
0x1016   :  { %9490 = vrcp.f32 %v5731_v24 }
0x1017   :  { %9492 = vrcp.f32 %v5737_v26  ;;  %v6152_v26 = vld [vmem:[#allocation4 + $0x30] sm:$0xff] }
0x101b   :  { %v9487_v27 = vpop.eup %9486 }
0x101c   :  { %v9489_v29 = vpop.eup %9488  ;;  %v5744_v36 = vadd.f32 1.0, %v9487_v27 }
0x101e   :  { %9494 = vrcp.f32 %v5744_v36 }
0x1020   :  { %v9491_v31 = vpop.eup %9490 }
0x1021   :  { %v9493_v58 = vpop.eup %9492  ;;  %v5749_v34 = vmul.f32 %v9491_v31, %v9489_v29 }
0x1022   :  { %v5748_v37 = vmul.f32 %v9493_v58, %v5747_v10 }
0x1024   :  { %v5750_v38 = vadd.f32 %v5749_v34, %v5748_v37 }
0x1026   :  { %9496 = vtanh.f32 %v5750_v38  ;;  %5753 = vst.msk [vmem:[#allocation9] sm:$0xff] %vm462_vm7, %v5750_v38  ;;  %v6296_v38 = vld [vmem:[#allocation6 + $0x30] sm:$0xff] }
0x1028   :  { %v9495_v40 = vpop.eup %9494 }
0x102d   :  { %v6067_v9 = vld [vmem:[#allocation9] sm:$0xff] }
0x1030   :  { %v9497_v41 = vpop.eup %9496 }
0x1031   :  { %v5752_v43 = vmul.f32 %v9497_v41, %v9495_v40 }
0x1033   :  { %5754 = vst.msk [vmem:[#allocation8] sm:$0xff] %vm462_vm7, %v5752_v43  ;;  %5755 = vst.msk [vmem:[#allocation7 + $0x20] sm:$0xff] %vm462_vm7, %v5752_v43 }
0x103a   :  { %v7040_v60 = vld [vmem:[#allocation7 + $0x20] sm:$0xff]  ;;  %v5756_v12 = vld [vmem:[#allocation8] sm:$0xff] }
0x103b   :  { %7049 = vst.msk [vmem:[%s11094_s11 + $0x20] sm:$0xff] %vm462_vm7, %v7040_v60  ;;  %8510 = vmatmul.mubr.msk.f32.vlgmr.msra.gmra.mrb[74].mxu0 %vm462_vm7, %v5756_v12  ;;  %8521 = vmatmul.mubr.msk.f32.vlgmr.msra.gmra.mrb[90].mxu1 %vm462_vm7, %v5756_v12 }
0x103c   :  { %9183 = vmatpush3.bf16.msra.mxu0 %v10728_v39  ;;  %9189 = vmatpush3.bf16.msra.mxu1 %v10753_v44 }
0x103d   :  { %9184 = vmatprep.subr.bf16.mxu0 %v9564_v47  ;;  %9190 = vmatprep.subr.bf16.mxu1 %v9564_v47 }
0x103e   :  { %8531 = vmatprep.mubr.msk.f32.mxu0 %vm9565_vm8, %v9563_v32  ;;  %8542 = vmatprep.mubr.msk.f32.mxu1 %vm9565_vm8, %v9563_v32 }
0x1040   :  { %9186 = vmatpush3.bf16.msra.mxu0 %v10741_v42  ;;  %9192 = vmatpush3.bf16.msra.mxu1 %v10764_v46 }
0x1041   :  { %9193 = vmatprep.subr.bf16.mxu0 %v9564_v47  ;;  %9199 = vmatprep.subr.bf16.mxu1 %v9564_v47 }
0x1043   :  { %8532 = vmatmul.mubr.msk.f32.vlgmr.msra.gmra.mrb[76].mxu0 %vm462_vm7, %v5756_v12  ;;  %8543 = vmatmul.mubr.msk.f32.vlgmr.msra.gmra.mrb[92].mxu1 %vm462_vm7, %v5756_v12  ;;  %v6224_v12 = vld [vmem:[#allocation5 + $0x30] sm:$0xff] }
0x1044   :  { %9195 = vmatpush3.bf16.msra.mxu0 %v10629_v22  ;;  %9201 = vmatpush3.bf16.msra.mxu1 %v10649_v28 }
0x1045   :  { %9196 = vmatprep.subr.bf16.mxu0 %v9564_v47  ;;  %9202 = vmatprep.subr.bf16.mxu1 %v9564_v47 }
0x1046   :  { %8553 = vmatprep.mubr.msk.f32.mxu0 %vm9565_vm8, %v9563_v32  ;;  %8564 = vmatprep.mubr.msk.f32.mxu1 %vm9565_vm8, %v9563_v32 }
0x1048   :  { %9198 = vmatpush3.bf16.msra.mxu0 %v10639_v25  ;;  %9204 = vmatpush3.bf16.msra.mxu1 %v10659_v33 }
0x1049   :  { %9205 = vmatprep.subr.bf16.mxu0 %v9564_v47  ;;  %9211 = vmatprep.subr.bf16.mxu1 %v9564_v47 }
0x110e   :  { %v5827_v48 = vpop.f32.mrb[74].mxu0  ;;  %v5899_v50 = vpop.f32.mrb[90].mxu1 }
0x110f   :  { %v5831_v52 = vadd.f32 %v5827_v48, %v5757_v45  ;;  %v5903_v53 = vadd.f32 %v5899_v50, %v5832_v49  ;;  %v8511_v54 = vpop.f32.mrb[75].mxu0  ;;  %v8522_v56 = vpop.f32.mrb[91].mxu1 }
0x1111   :  { %v7221_v57 = vmul.f32 -1.442695, %v5831_v52  ;;  %v7222_v59 = vmul.f32 -1.442695, %v5903_v53 }
0x1113   :  { %9498 = vpow2.f32 %v7221_v57 }
0x1114   :  { %9500 = vpow2.f32 %v7222_v59 }
0x1116   :  { %v5971_v61 = vpop.f32.mrb[76].mxu0  ;;  %v6043_v62 = vpop.f32.mrb[92].mxu1 }
0x1117   :  { %v6047_v0 = vadd.f32 %v6043_v62, %v5976_v55  ;;  %v8533_v1 = vpop.f32.mrb[77].mxu0  ;;  %v8544_v63 = vpop.f32.mrb[93].mxu1  ;;  %v5975_v4 = vadd.f32 %v5971_v61, %v5904_v2 }
0x1119   :  { %v7223_v3 = vmul.f32 -1.442695, %v6047_v0 }
0x111b   :  { %9502 = vpow2.f32 %v7223_v3 }
0x111c   :  { %9504 = vtanh.f32 %v5975_v4 }
0x111d   :  { %v9499_v5 = vpop.eup %9498 }
0x111e   :  { %v9501_v6 = vpop.eup %9500  ;;  %v6051_v7 = vadd.f32 1.0, %v9499_v5 }
0x111f   :  { %v6057_v15 = vadd.f32 1.0, %v9501_v6  ;;  %v6472_v6 = vld [vmem:[#allocation4 + $0x38] sm:$0xff] }
0x1120   :  { %9506 = vrcp.f32 %v6051_v7 }
0x1121   :  { %9508 = vrcp.f32 %v6057_v15 }
0x1125   :  { %v9503_v30 = vpop.eup %9502 }
0x1126   :  { %v9505_v8 = vpop.eup %9504  ;;  %v6064_v13 = vadd.f32 1.0, %v9503_v30 }
0x1128   :  { %9510 = vrcp.f32 %v6064_v13 }
0x112a   :  { %v9507_v35 = vpop.eup %9506 }
0x112b   :  { %v9509_v18 = vpop.eup %9508  ;;  %v6069_v11 = vmul.f32 %v9507_v35, %v9505_v8 }
0x112c   :  { %v6068_v14 = vmul.f32 %v9509_v18, %v6067_v9 }
0x112e   :  { %v6070_v16 = vadd.f32 %v6069_v11, %v6068_v14 }
0x1130   :  { %9512 = vtanh.f32 %v6070_v16  ;;  %6073 = vst.msk [vmem:[#allocation9] sm:$0xff] %vm462_vm7, %v6070_v16 }
0x1132   :  { %v9511_v17 = vpop.eup %9510 }
0x1137   :  { %v6387_v61 = vld [vmem:[#allocation9] sm:$0xff] }
0x113a   :  { %v9513_v19 = vpop.eup %9512 }
0x113b   :  { %v6072_v20 = vmul.f32 %v9513_v19, %v9511_v17  ;;  %v6544_v17 = vld [vmem:[#allocation5 + $0x38] sm:$0xff] }
0x113d   :  { %6074 = vst.msk [vmem:[#allocation8] sm:$0xff] %vm462_vm7, %v6072_v20  ;;  %6075 = vst.msk [vmem:[#allocation7 + $0x28] sm:$0xff] %vm462_vm7, %v6072_v20 }
0x1144   :  { %v7041_v21 = vld [vmem:[#allocation7 + $0x28] sm:$0xff] }
0x1145   :  { %v6076_v23 = vld [vmem:[#allocation8] sm:$0xff]  ;;  %7050 = vst.msk [vmem:[%s11094_s11 + $0x28] sm:$0xff] %vm462_vm7, %v7041_v21 }
0x1146   :  { %8554 = vmatmul.mubr.msk.f32.vlgmr.msra.gmra.mrb[78].mxu0 %vm462_vm7, %v6076_v23  ;;  %8565 = vmatmul.mubr.msk.f32.vlgmr.msra.gmra.mrb[94].mxu1 %vm462_vm7, %v6076_v23 }
0x1147   :  { %9207 = vmatpush3.bf16.msra.mxu0 %v10728_v39  ;;  %9213 = vmatpush3.bf16.msra.mxu1 %v10753_v44 }
0x1148   :  { %9208 = vmatprep.subr.bf16.mxu0 %v9564_v47  ;;  %9214 = vmatprep.subr.bf16.mxu1 %v9564_v47 }
0x1149   :  { %8575 = vmatprep.mubr.msk.f32.mxu0 %vm9565_vm8, %v9563_v32  ;;  %8586 = vmatprep.mubr.msk.f32.mxu1 %vm9565_vm8, %v9563_v32 }
0x114b   :  { %9210 = vmatpush3.bf16.msra.mxu0 %v10741_v42  ;;  %9216 = vmatpush3.bf16.msra.mxu1 %v10764_v46 }
0x114c   :  { %9217 = vmatprep.subr.bf16.mxu0 %v9564_v47  ;;  %9223 = vmatprep.subr.bf16.mxu1 %v9564_v47 }
0x114e   :  { %8576 = vmatmul.mubr.msk.f32.vlgmr.msra.gmra.mrb[80].mxu0 %vm462_vm7, %v6076_v23  ;;  %8587 = vmatmul.mubr.msk.f32.vlgmr.msra.gmra.mrb[96].mxu1 %vm462_vm7, %v6076_v23 }
0x114f   :  { %9219 = vmatpush3.bf16.msra.mxu0 %v10629_v22  ;;  %9225 = vmatpush3.bf16.msra.mxu1 %v10649_v28 }
0x1150   :  { %9220 = vmatprep.subr.bf16.mxu0 %v9564_v47  ;;  %9226 = vmatprep.subr.bf16.mxu1 %v9564_v47 }
0x1151   :  { %8597 = vmatprep.mubr.msk.f32.mxu0 %vm9565_vm8, %v9563_v32  ;;  %8608 = vmatprep.mubr.msk.f32.mxu1 %vm9565_vm8, %v9563_v32 }
0x1153   :  { %9222 = vmatpush3.bf16.msra.mxu0 %v10639_v25  ;;  %9228 = vmatpush3.bf16.msra.mxu1 %v10659_v33 }
0x1154   :  { %9229 = vmatprep.subr.bf16.mxu0 %v9564_v47  ;;  %9235 = vmatprep.subr.bf16.mxu1 %v9564_v47 }
0x1219   :  { %v6147_v24 = vpop.f32.mrb[78].mxu0  ;;  %v6219_v27 = vpop.f32.mrb[94].mxu1 }
0x121a   :  { %v6151_v29 = vadd.f32 %v6147_v24, %v6077_v51  ;;  %v6223_v31 = vadd.f32 %v6219_v27, %v6152_v26  ;;  %v8555_v58 = vpop.f32.mrb[79].mxu0  ;;  %v8566_v10 = vpop.f32.mrb[95].mxu1 }
0x121c   :  { %v7228_v34 = vmul.f32 -1.442695, %v6151_v29  ;;  %v7229_v36 = vmul.f32 -1.442695, %v6223_v31 }
0x121e   :  { %9514 = vpow2.f32 %v7228_v34 }
0x121f   :  { %9516 = vpow2.f32 %v7229_v36 }
0x1221   :  { %v6291_v37 = vpop.f32.mrb[80].mxu0  ;;  %v6363_v40 = vpop.f32.mrb[96].mxu1 }
0x1222   :  { %v6367_v41 = vadd.f32 %v6363_v40, %v6296_v38  ;;  %v8577_v43 = vpop.f32.mrb[81].mxu0  ;;  %v8588_v60 = vpop.f32.mrb[97].mxu1  ;;  %v6295_v48 = vadd.f32 %v6291_v37, %v6224_v12  ;;  %v6792_v12 = vld [vmem:[#allocation4 + $0x40] sm:$0xff] }
0x1224   :  { %v7230_v45 = vmul.f32 -1.442695, %v6367_v41 }
0x1226   :  { %9518 = vpow2.f32 %v7230_v45 }
0x1227   :  { %9520 = vtanh.f32 %v6295_v48 }
0x1228   :  { %v9515_v49 = vpop.eup %9514 }
0x1229   :  { %v9517_v50 = vpop.eup %9516  ;;  %v6371_v52 = vadd.f32 1.0, %v9515_v49 }
0x122a   :  { %v6377_v53 = vadd.f32 1.0, %v9517_v50 }
0x122b   :  { %9522 = vrcp.f32 %v6371_v52 }
0x122c   :  { %9524 = vrcp.f32 %v6377_v53 }
0x1230   :  { %v9519_v54 = vpop.eup %9518 }
0x1231   :  { %v9521_v56 = vpop.eup %9520  ;;  %v6384_v62 = vadd.f32 1.0, %v9519_v54 }
0x1233   :  { %9526 = vrcp.f32 %v6384_v62 }
0x1235   :  { %v9523_v57 = vpop.eup %9522 }
0x1236   :  { %v9525_v59 = vpop.eup %9524  ;;  %v6389_v55 = vmul.f32 %v9523_v57, %v9521_v56 }
0x1237   :  { %v6388_v0 = vmul.f32 %v9525_v59, %v6387_v61  ;;  %v6864_v59 = vld [vmem:[#allocation5 + $0x40] sm:$0xff] }
0x1239   :  { %v6390_v1 = vadd.f32 %v6389_v55, %v6388_v0 }
0x123b   :  { %9528 = vtanh.f32 %v6390_v1  ;;  %6393 = vst.msk [vmem:[#allocation9] sm:$0xff] %vm462_vm7, %v6390_v1 }
0x123d   :  { %v9527_v63 = vpop.eup %9526 }
0x1242   :  { %v6707_v58 = vld [vmem:[#allocation9] sm:$0xff] }
0x1245   :  { %v9529_v2 = vpop.eup %9528 }
0x1246   :  { %v6392_v3 = vmul.f32 %v9529_v2, %v9527_v63 }
0x1248   :  { %6394 = vst.msk [vmem:[#allocation8] sm:$0xff] %vm462_vm7, %v6392_v3  ;;  %6395 = vst.msk [vmem:[#allocation7 + $0x30] sm:$0xff] %vm462_vm7, %v6392_v3 }
0x124f   :  { %v7042_v4 = vld [vmem:[#allocation7 + $0x30] sm:$0xff]  ;;  %v6396_v5 = vld [vmem:[#allocation8] sm:$0xff] }
0x1250   :  { %7051 = vst.msk [vmem:[%s11094_s11 + $0x30] sm:$0xff] %vm462_vm7, %v7042_v4  ;;  %8598 = vmatmul.mubr.msk.f32.vlgmr.msra.gmra.mrb[82].mxu0 %vm462_vm7, %v6396_v5  ;;  %8609 = vmatmul.mubr.msk.f32.vlgmr.msra.gmra.mrb[98].mxu1 %vm462_vm7, %v6396_v5 }
0x1251   :  { %9231 = vmatpush3.bf16.msra.mxu0 %v10728_v39  ;;  %9237 = vmatpush3.bf16.msra.mxu1 %v10753_v44 }
0x1252   :  { %9232 = vmatprep.subr.bf16.mxu0 %v9564_v47  ;;  %9238 = vmatprep.subr.bf16.mxu1 %v9564_v47 }
0x1253   :  { %8619 = vmatprep.mubr.msk.f32.mxu0 %vm9565_vm8, %v9563_v32  ;;  %8630 = vmatprep.mubr.msk.f32.mxu1 %vm9565_vm8, %v9563_v32 }
0x1255   :  { %9234 = vmatpush3.bf16.msra.mxu0 %v10741_v42  ;;  %9240 = vmatpush3.bf16.msra.mxu1 %v10764_v46 }
0x1256   :  { %9241 = vmatprep.subr.bf16.mxu0 %v9564_v47  ;;  %9247 = vmatprep.subr.bf16.mxu1 %v9564_v47 }
0x1258   :  { %8620 = vmatmul.mubr.msk.f32.vlgmr.msra.gmra.mrb[84].mxu0 %vm462_vm7, %v6396_v5  ;;  %8631 = vmatmul.mubr.msk.f32.vlgmr.msra.gmra.mrb[100].mxu1 %vm462_vm7, %v6396_v5 }
0x1259   :  { %9243 = vmatpush3.bf16.msra.mxu0 %v10629_v22  ;;  %9249 = vmatpush3.bf16.msra.mxu1 %v10649_v28  ;;  %v6397_v22 = vld [vmem:[#allocation3 + $0x38] sm:$0xff] }
0x125a   :  { %9244 = vmatprep.subr.bf16.mxu0 %v9564_v47  ;;  %9250 = vmatprep.subr.bf16.mxu1 %v9564_v47 }
0x125b   :  { %8641 = vmatprep.mubr.msk.f32.mxu0 %vm9565_vm8, %v9563_v32  ;;  %8652 = vmatprep.mubr.msk.f32.mxu1 %vm9565_vm8, %v9563_v32 }
0x125d   :  { %9246 = vmatpush3.bf16.msra.mxu0 %v10639_v25  ;;  %9252 = vmatpush3.bf16.msra.mxu1 %v10659_v33  ;;  %v6616_v25 = vld [vmem:[#allocation6 + $0x38] sm:$0xff] }
0x125e   :  { %9253 = vmatprep.subr.bf16.mxu0 %v9564_v47  ;;  %9259 = vmatprep.subr.bf16.mxu1 %v9564_v47 }
0x1323   :  { %v6467_v28 = vpop.f32.mrb[82].mxu0  ;;  %v6539_v7 = vpop.f32.mrb[98].mxu1 }
0x1324   :  { %v6471_v15 = vadd.f32 %v6467_v28, %v6397_v22  ;;  %v6543_v30 = vadd.f32 %v6539_v7, %v6472_v6  ;;  %v8599_v8 = vpop.f32.mrb[83].mxu0  ;;  %v8610_v35 = vpop.f32.mrb[99].mxu1 }
0x1326   :  { %v7235_v18 = vmul.f32 -1.442695, %v6471_v15  ;;  %v7236_v9 = vmul.f32 -1.442695, %v6543_v30 }
0x1328   :  { %9530 = vpow2.f32 %v7235_v18 }
0x1329   :  { %9532 = vpow2.f32 %v7236_v9 }
0x132b   :  { %v6611_v11 = vpop.f32.mrb[84].mxu0  ;;  %v6683_v13 = vpop.f32.mrb[100].mxu1 }
0x132c   :  { %v6687_v33 = vadd.f32 %v6683_v13, %v6616_v25  ;;  %v8621_v14 = vpop.f32.mrb[85].mxu0  ;;  %v8632_v16 = vpop.f32.mrb[101].mxu1  ;;  %v6615_v20 = vadd.f32 %v6611_v11, %v6544_v17 }
0x132e   :  { %v7237_v19 = vmul.f32 -1.442695, %v6687_v33 }
0x1330   :  { %9534 = vpow2.f32 %v7237_v19 }
0x1331   :  { %9536 = vtanh.f32 %v6615_v20 }
0x1332   :  { %v9531_v21 = vpop.eup %9530 }
0x1333   :  { %v9533_v23 = vpop.eup %9532  ;;  %v6691_v51 = vadd.f32 1.0, %v9531_v21 }
0x1334   :  { %v6697_v24 = vadd.f32 1.0, %v9533_v23 }
0x1335   :  { %9538 = vrcp.f32 %v6691_v51 }
0x1336   :  { %9540 = vrcp.f32 %v6697_v24 }
0x133a   :  { %v9535_v26 = vpop.eup %9534 }
0x133b   :  { %v9537_v27 = vpop.eup %9536  ;;  %v6704_v34 = vadd.f32 1.0, %v9535_v26 }
0x133d   :  { %9542 = vrcp.f32 %v6704_v34 }
0x133f   :  { %v9539_v29 = vpop.eup %9538 }
0x1340   :  { %v9541_v31 = vpop.eup %9540  ;;  %v6709_v10 = vmul.f32 %v9539_v29, %v9537_v27 }
0x1341   :  { %v6708_v36 = vmul.f32 %v9541_v31, %v6707_v58 }
0x1343   :  { %v6710_v37 = vadd.f32 %v6709_v10, %v6708_v36 }
0x1345   :  { %9544 = vtanh.f32 %v6710_v37  ;;  %6713 = vst.msk [vmem:[#allocation9] sm:$0xff] %vm462_vm7, %v6710_v37 }
0x1347   :  { %v9543_v38 = vpop.eup %9542 }
0x134c   :  { %v7027_v22 = vld [vmem:[#allocation9] sm:$0xff] }
0x134f   :  { %v9545_v40 = vpop.eup %9544 }
0x1350   :  { %v6712_v41 = vmul.f32 %v9545_v40, %v9543_v38 }
0x1352   :  { %6714 = vst.msk [vmem:[#allocation8] sm:$0xff] %vm462_vm7, %v6712_v41  ;;  %6715 = vst.msk [vmem:[#allocation7 + $0x38] sm:$0xff] %vm462_vm7, %v6712_v41 }
0x1359   :  { %v7043_v43 = vld [vmem:[#allocation7 + $0x38] sm:$0xff]  ;;  %v6716_v60 = vld [vmem:[#allocation8] sm:$0xff] }
0x135a   :  { %7052 = vst.msk [vmem:[%s11094_s11 + $0x38] sm:$0xff] %vm462_vm7, %v7043_v43  ;;  %8642 = vmatmul.mubr.msk.f32.vlgmr.msra.gmra.mrb[86].mxu0 %vm462_vm7, %v6716_v60  ;;  %8653 = vmatmul.mubr.msk.f32.vlgmr.msra.gmra.mrb[102].mxu1 %vm462_vm7, %v6716_v60 }
0x135b   :  { %9255 = vmatpush3.bf16.msra.mxu0 %v10728_v39  ;;  %9261 = vmatpush3.bf16.msra.mxu1 %v10753_v44  ;;  %v6717_v39 = vld [vmem:[#allocation3 + $0x40] sm:$0xff] }
0x135c   :  { %9256 = vmatprep.subr.bf16.mxu0 %v9564_v47  ;;  %9262 = vmatprep.subr.bf16.mxu1 %v9564_v47 }
0x135d   :  { %8663 = vmatprep.mubr.msk.f32.mxu0 %vm9565_vm8, %v9563_v32  ;;  %8674 = vmatprep.mubr.msk.f32.mxu1 %vm9565_vm8, %v9563_v32 }
0x135f   :  { %9258 = vmatpush3.bf16.msra.mxu0 %v10741_v42  ;;  %9264 = vmatpush3.bf16.msra.mxu1 %v10764_v46  ;;  %v6936_v42 = vld [vmem:[#allocation6 + $0x40] sm:$0xff] }
0x1362   :  { %8664 = vmatmul.mubr.msk.f32.vlgmr.msra.gmra.mrb[88].mxu0 %vm462_vm7, %v6716_v60  ;;  %8675 = vmatmul.mubr.msk.f32.vlgmr.msra.gmra.mrb[104].mxu1 %vm462_vm7, %v6716_v60 }
0x142d   :  { %v6787_v44 = vpop.f32.mrb[86].mxu0  ;;  %v6859_v45 = vpop.f32.mrb[102].mxu1 }
0x142e   :  { %v6791_v48 = vadd.f32 %v6787_v44, %v6717_v39  ;;  %v6863_v47 = vadd.f32 %v6859_v45, %v6792_v12  ;;  %v8643_v49 = vpop.f32.mrb[87].mxu0  ;;  %v8654_v50 = vpop.f32.mrb[103].mxu1 }
0x1430   :  { %v7242_v52 = vmul.f32 -1.442695, %v6791_v48  ;;  %v7243_v53 = vmul.f32 -1.442695, %v6863_v47 }
0x1432   :  { %9546 = vpow2.f32 %v7242_v52 }
0x1433   :  { %9548 = vpow2.f32 %v7243_v53 }
0x1435   :  { %v6931_v32 = vpop.f32.mrb[88].mxu0  ;;  %v7003_v54 = vpop.f32.mrb[104].mxu1 }
0x1436   :  { %v7007_v46 = vadd.f32 %v7003_v54, %v6936_v42  ;;  %v8665_v56 = vpop.f32.mrb[89].mxu0  ;;  %v8676_v57 = vpop.f32.mrb[105].mxu1  ;;  %v6935_v55 = vadd.f32 %v6931_v32, %v6864_v59 }
0x1438   :  { %v7244_v61 = vmul.f32 -1.442695, %v7007_v46 }
0x143a   :  { %9550 = vpow2.f32 %v7244_v61 }
0x143b   :  { %9552 = vtanh.f32 %v6935_v55 }
0x143c   :  { %v9547_v62 = vpop.eup %9546 }
0x143d   :  { %v9549_v0 = vpop.eup %9548  ;;  %v7011_v1 = vadd.f32 1.0, %v9547_v62 }
0x143e   :  { %v7017_v63 = vadd.f32 1.0, %v9549_v0 }
0x143f   :  { %9554 = vrcp.f32 %v7011_v1 }
0x1440   :  { %9556 = vrcp.f32 %v7017_v63 }
0x1444   :  { %v9551_v2 = vpop.eup %9550 }
0x1445   :  { %v9553_v3 = vpop.eup %9552  ;;  %v7024_v6 = vadd.f32 1.0, %v9551_v2 }
0x1447   :  { %9558 = vrcp.f32 %v7024_v6 }
0x1449   :  { %v9555_v4 = vpop.eup %9554 }
0x144a   :  { %v9557_v5 = vpop.eup %9556  ;;  %v7029_v28 = vmul.f32 %v9555_v4, %v9553_v3 }
0x144b   :  { %v7028_v7 = vmul.f32 %v9557_v5, %v7027_v22 }
0x144d   :  { %v7030_v15 = vadd.f32 %v7029_v28, %v7028_v7 }
0x144f   :  { %9560 = vtanh.f32 %v7030_v15  ;;  %7033 = vst.msk [vmem:[#allocation9] sm:$0xff] %vm462_vm7, %v7030_v15 }
0x1451   :  { %v9559_v30 = vpop.eup %9558 }
0x1459   :  { %v9561_v8 = vpop.eup %9560 }
0x145a   :  { %v7032_v35 = vmul.f32 %v9561_v8, %v9559_v30 }
0x145c   :  { %7034 = vst.msk [vmem:[#allocation8] sm:$0xff] %vm462_vm7, %v7032_v35  ;;  %7035 = vst.msk [vmem:[#allocation7 + $0x40] sm:$0xff] %vm462_vm7, %v7032_v35 }
0x1463   :  { %v7044_v18 = vld [vmem:[#allocation7 + $0x40] sm:$0xff] }
0x1464   :  { %7053 = vst.msk [vmem:[%s11094_s11 + $0x40] sm:$0xff] %vm462_vm7, %v7044_v18 }

</bundles_post_ra>
